<compile_context>
chip_gen: v5e
topology: v5e:2x2
jax: 0.10.0
libtpu: 0.0.40
codegen_flags: <defaults>
</compile_context>

<pallas_src>
import functools
import math

import jax
import jax.numpy as jnp
from jax.experimental import pallas as pl
from jax.experimental.pallas import tpu as pltpu

# Fits v7x's 64 MiB physical VMEM, generous headroom on v5e/v6e (128 MiB).
_VMEM_LIMIT = 48 * 1024 * 1024


def _round_up(x, m):
    return ((x + m - 1) // m) * m


def _pick_row_tile(M):
    """Largest row tile <= 512 dividing M (multiple of 8); prefer >=2 grid steps."""
    for tm in (512, 256):
        if M % tm == 0 and M // tm >= 2:
            return tm
    for tm in (512, 256, 128, 64, 32, 16, 8):
        if M % tm == 0:
            return tm
    return M  # small / odd M: one whole-array block (allowed: equals full dims)


# ---------------------------------------------------------------------------
# Pallas kernels
# ---------------------------------------------------------------------------
def _linear_kernel(x_ref, w_ref, b_ref, *rest, relu, has_residual):
    """o = (relu?)(x @ w + b) (+ r). Matmul in bf16 on the MXU, f32 accumulate."""
    if has_residual:
        r_ref, o_ref = rest
    else:
        (o_ref,) = rest
    acc = jnp.dot(x_ref[...].astype(jnp.bfloat16), w_ref[...],
                  preferred_element_type=jnp.float32)
    acc = acc + b_ref[...]
    if relu:
        acc = jnp.maximum(acc, 0.0)
    if has_residual:
        acc = acc + r_ref[...]
    o_ref[...] = acc.astype(o_ref.dtype)


def linear_pallas(x, w, b, residual=None, relu=False):
    """Row-tiled matmul + bias (+ReLU) (+residual). Weights are bf16, I/O f32."""
    M, K = x.shape
    _, Nout = w.shape
    b2 = b.reshape(1, Nout).astype(jnp.float32)
    has_res = residual is not None
    TM = _pick_row_tile(M)
    grid = (M // TM,)

    in_specs = [
        pl.BlockSpec((TM, K), lambda i: (i, 0)),      # activation rows
        pl.BlockSpec((K, Nout), lambda i: (0, 0)),    # weight (resident)
        pl.BlockSpec((1, Nout), lambda i: (0, 0)),    # bias
    ]
    args = [x, w, b2]
    if has_res:
        in_specs.append(pl.BlockSpec((TM, Nout), lambda i: (i, 0)))
        args.append(residual)

    return pl.pallas_call(
        functools.partial(_linear_kernel, relu=relu, has_residual=has_res),
        out_shape=jax.ShapeDtypeStruct((M, Nout), jnp.float32),
        grid_spec=pltpu.PrefetchScalarGridSpec(
            num_scalar_prefetch=0,
            grid=grid,
            in_specs=in_specs,
            out_specs=pl.BlockSpec((TM, Nout), lambda i: (i, 0)),
        ),
        compiler_params=pltpu.CompilerParams(
            dimension_semantics=("parallel",),
            vmem_limit_bytes=_VMEM_LIMIT),
    )(*args)


def _conv3x3_kernel(x_ref, w_ref, b_ref, *rest, relu, has_residual, H, W):
    """3x3 same-padded conv as 9 shifted matmuls accumulated in f32 (no im2col).

    x_ref: (H+2, W+2, C) halo-padded activation; w_ref: (9, C, N); o_ref: (H*W, N).
    """
    if has_residual:
        r_ref, o_ref = rest
    else:
        (o_ref,) = rest
    C = x_ref.shape[-1]
    Nout = w_ref.shape[-1]
    acc = jnp.zeros((H * W, Nout), jnp.float32)
    for t in range(9):
        dy, dx = divmod(t, 3)
        xs = x_ref[dy:dy + H, dx:dx + W, :].reshape(H * W, C)
        acc = acc + jnp.dot(xs.astype(jnp.bfloat16), w_ref[t],
                            preferred_element_type=jnp.float32)
    acc = acc + b_ref[...]
    if relu:
        acc = jnp.maximum(acc, 0.0)
    if has_residual:
        acc = acc + r_ref[...]
    o_ref[...] = acc.astype(o_ref.dtype)


def conv3x3_pallas(x_nhwc, w9, b, residual=None, relu=False, out_dtype=jnp.float32):
    """x_nhwc: (B, H, W, C); w9: (9, C, N) bf16; residual: (B, H*W, N) f32 or None."""
    B, H, W, C = x_nhwc.shape
    Nout = w9.shape[-1]
    HW = H * W
    xp = jnp.pad(x_nhwc, ((0, 0), (1, 1), (1, 1), (0, 0)))   # halo pad (glue, small)
    b2 = b.reshape(1, Nout).astype(jnp.float32)
    has_res = residual is not None

    in_specs = [
        pl.BlockSpec((None, H + 2, W + 2, C), lambda i: (i, 0, 0, 0)),
        pl.BlockSpec((9, C, Nout), lambda i: (0, 0, 0)),
        pl.BlockSpec((1, Nout), lambda i: (0, 0)),
    ]
    args = [xp, w9, b2]
    if has_res:
        in_specs.append(pl.BlockSpec((None, HW, Nout), lambda i: (i, 0, 0)))
        args.append(residual)

    return pl.pallas_call(
        functools.partial(_conv3x3_kernel, relu=relu, has_residual=has_res, H=H, W=W),
        out_shape=jax.ShapeDtypeStruct((B, HW, Nout), out_dtype),
        grid_spec=pltpu.PrefetchScalarGridSpec(
            num_scalar_prefetch=0,
            grid=(B,),
            in_specs=in_specs,
            out_specs=pl.BlockSpec((None, HW, Nout), lambda i: (i, 0, 0)),
        ),
        compiler_params=pltpu.CompilerParams(
            dimension_semantics=("parallel",),
            vmem_limit_bytes=_VMEM_LIMIT),
    )(*args)


def _attn_kernel(qkv_ref, *out_refs, nh, dkp, dv, scale, return_attn):
    """All heads for one batch element. qkv_ref: (N, width) bf16 with layout
    [q(nh*dkp) | k(nh*dkp) | v(nh*dv) | pad]; padded q/k columns are exact zeros."""
    if return_attn:
        o_ref, a_ref = out_refs
    else:
        (o_ref,) = out_refs
    qkv = qkv_ref[...]
    k_off = nh * dkp
    v_off = 2 * nh * dkp
    outs = []
    for h in range(nh):
        qh = qkv[:, h * dkp:(h + 1) * dkp]                       # (N, dkp) bf16
        kh = qkv[:, k_off + h * dkp:k_off + (h + 1) * dkp]       # (N, dkp) bf16
        vh = qkv[:, v_off + h * dv:v_off + (h + 1) * dv]         # (N, dv)  bf16
        # scores = q @ k^T, contraction done in-kernel (no wrapper transpose).
        s = jax.lax.dot_general(
            qh, kh, dimension_numbers=(((1,), (1,)), ((), ())),
            preferred_element_type=jnp.float32) * scale          # (N, N) f32
        s = s - jnp.max(s, axis=-1, keepdims=True)
        p = jnp.exp(s)
        p = p * pl.reciprocal(jnp.sum(p, axis=-1, keepdims=True), approx=True)
        if return_attn:
            a_ref[h] = p.astype(a_ref.dtype)
        outs.append(jnp.dot(p.astype(jnp.bfloat16), vh,
                            preferred_element_type=jnp.float32))
    # Single lane-dense store of all heads (nh*dv is a multiple of 128 here).
    o_ref[...] = jnp.concatenate(outs, axis=-1).astype(o_ref.dtype)


def attention_pallas(qkv, *, n_head, dkp, dv, scale, return_attn=True):
    """qkv: (B, N, width) bf16 -> out (B, N, n_head*dv) f32 [, attn (B, n_head, N, N)]."""
    B, N, width = qkv.shape
    if return_attn:
        out_shape = (jax.ShapeDtypeStruct((B, N, n_head * dv), jnp.float32),
                     jax.ShapeDtypeStruct((B, n_head, N, N), jnp.float32))
        out_specs = (pl.BlockSpec((None, N, n_head * dv), lambda b: (b, 0, 0)),
                     pl.BlockSpec((None, n_head, N, N), lambda b: (b, 0, 0, 0)))
    else:
        out_shape = jax.ShapeDtypeStruct((B, N, n_head * dv), jnp.float32)
        out_specs = pl.BlockSpec((None, N, n_head * dv), lambda b: (b, 0, 0))

    res = pl.pallas_call(
        functools.partial(_attn_kernel, nh=n_head, dkp=dkp, dv=dv, scale=scale,
                          return_attn=return_attn),
        out_shape=out_shape,
        grid_spec=pltpu.PrefetchScalarGridSpec(
            num_scalar_prefetch=0,
            grid=(B,),
            in_specs=[pl.BlockSpec((None, N, width), lambda b: (b, 0, 0))],
            out_specs=out_specs,
        ),
        compiler_params=pltpu.CompilerParams(
            dimension_semantics=("parallel",),
            vmem_limit_bytes=_VMEM_LIMIT),
    )(qkv)
    if return_attn:
        return res
    return res, None


# ---------------------------------------------------------------------------
# Parameters (random init mirroring the reconstructed PyTorch sub-modules)
# ---------------------------------------------------------------------------
def init_params(key, n_head, d_model, d_feature, d_attention, ffn_depth):
    C = d_model
    keys = jax.random.split(key, 4 + ffn_depth)

    def w(k, shape, fan_in):
        return jax.random.normal(k, shape, jnp.float32) / math.sqrt(fan_in)

    return {
        "wq": w(keys[0], (9, C, n_head * d_attention), 9 * C),
        "bq": jnp.zeros((n_head * d_attention,), jnp.float32),
        "wk": w(keys[1], (9, C, n_head * d_attention), 9 * C),
        "bk": jnp.zeros((n_head * d_attention,), jnp.float32),
        "wv": w(keys[2], (9, C, n_head * d_feature), 9 * C),
        "bv": jnp.zeros((n_head * d_feature,), jnp.float32),
        "wo": w(keys[3], (n_head * d_feature, C), n_head * d_feature),
        "bo": jnp.zeros((C,), jnp.float32),
        "ffn": [(w(keys[4 + i], (9, C, C), 9 * C), jnp.zeros((C,), jnp.float32))
                for i in range(ffn_depth)],
    }


def prepare_params(raw, n_head, d_attention, d_feature):
    """Fuse Q|K|V conv weights (lane-dense, per-head q/k padded to 8) and pre-cast
    all matmul weights to bf16. One-time, outside the jitted forward."""
    wq, wk, wv = raw["wq"], raw["wk"], raw["wv"]
    nine, C, _ = wq.shape
    dkp = max(8, _round_up(d_attention, 8))        # pad tiny q/k head dim to 8 only
    qk_w = n_head * dkp
    v_w = n_head * d_feature
    width = _round_up(2 * qk_w + v_w, 128)         # lane-dense fused projection

    w_qkv = jnp.zeros((nine, C, width), jnp.float32)
    b_qkv = jnp.zeros((width,), jnp.float32)
    for h in range(n_head):
        sq = slice(h * d_attention, (h + 1) * d_attention)
        w_qkv = w_qkv.at[:, :, h * dkp:h * dkp + d_attention].set(wq[:, :, sq])
        b_qkv = b_qkv.at[h * dkp:h * dkp + d_attention].set(raw["bq"][sq])
        w_qkv = w_qkv.at[:, :, qk_w + h * dkp:qk_w + h * dkp + d_attention].set(wk[:, :, sq])
        b_qkv = b_qkv.at[qk_w + h * dkp:qk_w + h * dkp + d_attention].set(raw["bk"][sq])
    w_qkv = w_qkv.at[:, :, 2 * qk_w:2 * qk_w + v_w].set(wv)
    b_qkv = b_qkv.at[2 * qk_w:2 * qk_w + v_w].set(raw["bv"])

    params = {
        "w_qkv": w_qkv.astype(jnp.bfloat16),
        "b_qkv": b_qkv,
        "wo": raw["wo"].astype(jnp.bfloat16),
        "bo": raw["bo"],
        "ffn": [(wf.astype(jnp.bfloat16), bf) for wf, bf in raw["ffn"]],
    }
    meta = {"dkp": dkp, "qkv_width": width}
    return params, meta


# ---------------------------------------------------------------------------
# Forward pass (matches EncoderLayer.forward semantics)
# ---------------------------------------------------------------------------
def encoder_layer_forward(params, enc_input, *, n_head, d_attention, d_feature, dkp):
    """enc_input: NCHW (B, d_model, H, W) — PyTorch convention."""
    B, C, H, W = enc_input.shape
    N = H * W
    M = B * N

    x_nhwc = jnp.transpose(enc_input, (0, 2, 3, 1))    # NCHW -> NHWC (channels to lanes)
    x2d = x_nhwc.reshape(M, C)

    # ---- MultiHeadConvAttention -------------------------------------------
    # Fused Q|K|V 3x3-conv projection: single pass over the activation,
    # lane-dense bf16 output consumed directly by the attention kernel.
    qkv = conv3x3_pallas(x_nhwc, params["w_qkv"], params["b_qkv"],
                         out_dtype=jnp.bfloat16)                     # (B, N, width)

    scale = 1.0 / math.sqrt(d_attention)
    attn_out, enc_slf_attn = attention_pallas(
        qkv, n_head=n_head, dkp=dkp, dv=d_feature, scale=scale, return_attn=True)
    # attn_out: (B, N, n_head*d_feature) — heads already merged on the lane dim.

    # Output projection (1x1 conv) with `enc_output += residual` fused in.
    # TODO(synk): dropout inside the sub-modules is identity (eval mode).
    h = linear_pallas(attn_out.reshape(M, n_head * d_feature),
                      params["wo"], params["bo"], residual=x2d)      # (M, C) f32

    # ---- FeedForward: ffn_depth x 3x3 conv, ReLU between, residual fused ----
    ffn_residual = h
    depth = len(params["ffn"])
    for i, (wf, bf) in enumerate(params["ffn"]):
        last = (i == depth - 1)
        h = conv3x3_pallas(
            h.reshape(B, H, W, C), wf, bf,
            residual=ffn_residual.reshape(B, N, C) if last else None,
            relu=not last)                                           # (B, N, C) f32
        h = h.reshape(M, C)

    enc_output = jnp.transpose(h.reshape(B, H, W, C), (0, 3, 1, 2))  # back to NCHW
    return enc_output, enc_slf_attn


# ---------------------------------------------------------------------------
if __name__ == "__main__":
    n_head, d_model, d_feature, d_attention, ffn_depth = 4, 32, 32, 1, 2
    B, H, W = 2, 8, 8

    key = jax.random.PRNGKey(0)
    pkey, xkey = jax.random.split(key)
    raw = init_params(pkey, n_head, d_model, d_feature, d_attention, ffn_depth)
    params, meta = prepare_params(raw, n_head, d_attention, d_feature)
    enc_input = jax.random.normal(xkey, (B, d_model, H, W), jnp.float32)

    fwd = jax.jit(functools.partial(
        encoder_layer_forward,
        n_head=n_head, d_attention=d_attention, d_feature=d_feature,
        dkp=meta["dkp"]))

    enc_output, enc_slf_attn = fwd(params, enc_input)
    jax.block_until_ready((enc_output, enc_slf_attn))

    assert enc_output.shape == enc_input.shape
    assert enc_slf_attn.shape == (B, n_head, H * W, H * W)
    assert bool(jnp.all(jnp.isfinite(enc_output)))
    assert bool(jnp.all(jnp.isfinite(enc_slf_attn)))
    print("KERNEL_OK")
</pallas_src>

<mosaic_0001>
module attributes {stable_mosaic.version = 11 : i64} {
  func.func @_conv3x3_kernel(%arg0: i32, %arg1: memref<1x10x10x32xf32, #tpu.memory_space<vmem>>, %arg2: memref<9x32x256xbf16, #tpu.memory_space<vmem>>, %arg3: memref<1x256xf32, #tpu.memory_space<vmem>>, %arg4: memref<1x64x256xbf16, #tpu.memory_space<vmem>>) attributes {dimension_semantics = [#tpu.dimension_semantics<parallel>], iteration_bounds = array<i64: 2>, scalar_prefetch = 0 : i64, scratch_operands = 0 : i64, tpu.core_type = #tpu.core_type<tc>, window_params = [{transform_indices = @transform_0, window_bounds = array<i64: 1, 10, 10, 32>}, {pipeline_mode = #tpu.pipeline_mode<synchronous>, transform_indices = @transform_1, window_bounds = array<i64: 9, 32, 256>}, {pipeline_mode = #tpu.pipeline_mode<synchronous>, transform_indices = @transform_2, window_bounds = array<i64: 1, 256>}, {transform_indices = @transform_3, window_bounds = array<i64: 1, 64, 256>}]} {
    %cst = arith.constant 0.000000e+00 : f32
    %0 = vector.broadcast %cst : f32 to vector<64x256xf32>
    %c0 = arith.constant 0 : index
    %c0_0 = arith.constant 0 : index
    %c0_1 = arith.constant 0 : index
    %c0_2 = arith.constant 0 : index
    %1 = vector.load %arg1[%c0, %c0_0, %c0_1, %c0_2] : memref<1x10x10x32xf32, #tpu.memory_space<vmem>>, vector<1x8x8x32xf32>
    %2 = vector.shape_cast %1 : vector<1x8x8x32xf32> to vector<8x8x32xf32>
    %3 = vector.shape_cast %2 : vector<8x8x32xf32> to vector<64x32xf32>
    %4 = arith.truncf %3 : vector<64x32xf32> to vector<64x32xbf16>
    %c0_3 = arith.constant 0 : index
    %c0_4 = arith.constant 0 : index
    %c0_5 = arith.constant 0 : index
    %5 = vector.load %arg2[%c0_3, %c0_4, %c0_5] : memref<9x32x256xbf16, #tpu.memory_space<vmem>>, vector<1x32x256xbf16>
    %6 = vector.shape_cast %5 : vector<1x32x256xbf16> to vector<32x256xbf16>
    %cst_6 = arith.constant dense<0.000000e+00> : vector<64x256xf32>
    %7 = tpu.matmul %4, %6, %cst_6 {dimension_numbers = #tpu.dot_dimension_numbers<[1], [0], [0], [1], [0, 0, 1, 1], [], []>} : vector<64x32xbf16>, vector<32x256xbf16>, vector<64x256xf32> -> vector<64x256xf32>
    %8 = arith.addf %0, %7 : vector<64x256xf32>
    %c0_7 = arith.constant 0 : index
    %c0_8 = arith.constant 0 : index
    %c1 = arith.constant 1 : index
    %c0_9 = arith.constant 0 : index
    %9 = vector.load %arg1[%c0_7, %c0_8, %c1, %c0_9] : memref<1x10x10x32xf32, #tpu.memory_space<vmem>>, vector<1x8x8x32xf32>
    %10 = vector.shape_cast %9 : vector<1x8x8x32xf32> to vector<8x8x32xf32>
    %11 = vector.shape_cast %10 : vector<8x8x32xf32> to vector<64x32xf32>
    %12 = arith.truncf %11 : vector<64x32xf32> to vector<64x32xbf16>
    %c1_10 = arith.constant 1 : index
    %c0_11 = arith.constant 0 : index
    %c0_12 = arith.constant 0 : index
    %13 = vector.load %arg2[%c1_10, %c0_11, %c0_12] : memref<9x32x256xbf16, #tpu.memory_space<vmem>>, vector<1x32x256xbf16>
    %14 = vector.shape_cast %13 : vector<1x32x256xbf16> to vector<32x256xbf16>
    %cst_13 = arith.constant dense<0.000000e+00> : vector<64x256xf32>
    %15 = tpu.matmul %12, %14, %cst_13 {dimension_numbers = #tpu.dot_dimension_numbers<[1], [0], [0], [1], [0, 0, 1, 1], [], []>} : vector<64x32xbf16>, vector<32x256xbf16>, vector<64x256xf32> -> vector<64x256xf32>
    %16 = arith.addf %8, %15 : vector<64x256xf32>
    %c0_14 = arith.constant 0 : index
    %c0_15 = arith.constant 0 : index
    %c2 = arith.constant 2 : index
    %c0_16 = arith.constant 0 : index
    %17 = vector.load %arg1[%c0_14, %c0_15, %c2, %c0_16] : memref<1x10x10x32xf32, #tpu.memory_space<vmem>>, vector<1x8x8x32xf32>
    %18 = vector.shape_cast %17 : vector<1x8x8x32xf32> to vector<8x8x32xf32>
    %19 = vector.shape_cast %18 : vector<8x8x32xf32> to vector<64x32xf32>
    %20 = arith.truncf %19 : vector<64x32xf32> to vector<64x32xbf16>
    %c2_17 = arith.constant 2 : index
    %c0_18 = arith.constant 0 : index
    %c0_19 = arith.constant 0 : index
    %21 = vector.load %arg2[%c2_17, %c0_18, %c0_19] : memref<9x32x256xbf16, #tpu.memory_space<vmem>>, vector<1x32x256xbf16>
    %22 = vector.shape_cast %21 : vector<1x32x256xbf16> to vector<32x256xbf16>
    %cst_20 = arith.constant dense<0.000000e+00> : vector<64x256xf32>
    %23 = tpu.matmul %20, %22, %cst_20 {dimension_numbers = #tpu.dot_dimension_numbers<[1], [0], [0], [1], [0, 0, 1, 1], [], []>} : vector<64x32xbf16>, vector<32x256xbf16>, vector<64x256xf32> -> vector<64x256xf32>
    %24 = arith.addf %16, %23 : vector<64x256xf32>
    %c0_21 = arith.constant 0 : index
    %c1_22 = arith.constant 1 : index
    %c0_23 = arith.constant 0 : index
    %c0_24 = arith.constant 0 : index
    %25 = vector.load %arg1[%c0_21, %c1_22, %c0_23, %c0_24] : memref<1x10x10x32xf32, #tpu.memory_space<vmem>>, vector<1x8x8x32xf32>
    %26 = vector.shape_cast %25 : vector<1x8x8x32xf32> to vector<8x8x32xf32>
    %27 = vector.shape_cast %26 : vector<8x8x32xf32> to vector<64x32xf32>
    %28 = arith.truncf %27 : vector<64x32xf32> to vector<64x32xbf16>
    %c3 = arith.constant 3 : index
    %c0_25 = arith.constant 0 : index
    %c0_26 = arith.constant 0 : index
    %29 = vector.load %arg2[%c3, %c0_25, %c0_26] : memref<9x32x256xbf16, #tpu.memory_space<vmem>>, vector<1x32x256xbf16>
    %30 = vector.shape_cast %29 : vector<1x32x256xbf16> to vector<32x256xbf16>
    %cst_27 = arith.constant dense<0.000000e+00> : vector<64x256xf32>
    %31 = tpu.matmul %28, %30, %cst_27 {dimension_numbers = #tpu.dot_dimension_numbers<[1], [0], [0], [1], [0, 0, 1, 1], [], []>} : vector<64x32xbf16>, vector<32x256xbf16>, vector<64x256xf32> -> vector<64x256xf32>
    %32 = arith.addf %24, %31 : vector<64x256xf32>
    %c0_28 = arith.constant 0 : index
    %c1_29 = arith.constant 1 : index
    %c1_30 = arith.constant 1 : index
    %c0_31 = arith.constant 0 : index
    %33 = vector.load %arg1[%c0_28, %c1_29, %c1_30, %c0_31] : memref<1x10x10x32xf32, #tpu.memory_space<vmem>>, vector<1x8x8x32xf32>
    %34 = vector.shape_cast %33 : vector<1x8x8x32xf32> to vector<8x8x32xf32>
    %35 = vector.shape_cast %34 : vector<8x8x32xf32> to vector<64x32xf32>
    %36 = arith.truncf %35 : vector<64x32xf32> to vector<64x32xbf16>
    %c4 = arith.constant 4 : index
    %c0_32 = arith.constant 0 : index
    %c0_33 = arith.constant 0 : index
    %37 = vector.load %arg2[%c4, %c0_32, %c0_33] : memref<9x32x256xbf16, #tpu.memory_space<vmem>>, vector<1x32x256xbf16>
    %38 = vector.shape_cast %37 : vector<1x32x256xbf16> to vector<32x256xbf16>
    %cst_34 = arith.constant dense<0.000000e+00> : vector<64x256xf32>
    %39 = tpu.matmul %36, %38, %cst_34 {dimension_numbers = #tpu.dot_dimension_numbers<[1], [0], [0], [1], [0, 0, 1, 1], [], []>} : vector<64x32xbf16>, vector<32x256xbf16>, vector<64x256xf32> -> vector<64x256xf32>
    %40 = arith.addf %32, %39 : vector<64x256xf32>
    %c0_35 = arith.constant 0 : index
    %c1_36 = arith.constant 1 : index
    %c2_37 = arith.constant 2 : index
    %c0_38 = arith.constant 0 : index
    %41 = vector.load %arg1[%c0_35, %c1_36, %c2_37, %c0_38] : memref<1x10x10x32xf32, #tpu.memory_space<vmem>>, vector<1x8x8x32xf32>
    %42 = vector.shape_cast %41 : vector<1x8x8x32xf32> to vector<8x8x32xf32>
    %43 = vector.shape_cast %42 : vector<8x8x32xf32> to vector<64x32xf32>
    %44 = arith.truncf %43 : vector<64x32xf32> to vector<64x32xbf16>
    %c5 = arith.constant 5 : index
    %c0_39 = arith.constant 0 : index
    %c0_40 = arith.constant 0 : index
    %45 = vector.load %arg2[%c5, %c0_39, %c0_40] : memref<9x32x256xbf16, #tpu.memory_space<vmem>>, vector<1x32x256xbf16>
    %46 = vector.shape_cast %45 : vector<1x32x256xbf16> to vector<32x256xbf16>
    %cst_41 = arith.constant dense<0.000000e+00> : vector<64x256xf32>
    %47 = tpu.matmul %44, %46, %cst_41 {dimension_numbers = #tpu.dot_dimension_numbers<[1], [0], [0], [1], [0, 0, 1, 1], [], []>} : vector<64x32xbf16>, vector<32x256xbf16>, vector<64x256xf32> -> vector<64x256xf32>
    %48 = arith.addf %40, %47 : vector<64x256xf32>
    %c0_42 = arith.constant 0 : index
    %c2_43 = arith.constant 2 : index
    %c0_44 = arith.constant 0 : index
    %c0_45 = arith.constant 0 : index
    %49 = vector.load %arg1[%c0_42, %c2_43, %c0_44, %c0_45] : memref<1x10x10x32xf32, #tpu.memory_space<vmem>>, vector<1x8x8x32xf32>
    %50 = vector.shape_cast %49 : vector<1x8x8x32xf32> to vector<8x8x32xf32>
    %51 = vector.shape_cast %50 : vector<8x8x32xf32> to vector<64x32xf32>
    %52 = arith.truncf %51 : vector<64x32xf32> to vector<64x32xbf16>
    %c6 = arith.constant 6 : index
    %c0_46 = arith.constant 0 : index
    %c0_47 = arith.constant 0 : index
    %53 = vector.load %arg2[%c6, %c0_46, %c0_47] : memref<9x32x256xbf16, #tpu.memory_space<vmem>>, vector<1x32x256xbf16>
    %54 = vector.shape_cast %53 : vector<1x32x256xbf16> to vector<32x256xbf16>
    %cst_48 = arith.constant dense<0.000000e+00> : vector<64x256xf32>
    %55 = tpu.matmul %52, %54, %cst_48 {dimension_numbers = #tpu.dot_dimension_numbers<[1], [0], [0], [1], [0, 0, 1, 1], [], []>} : vector<64x32xbf16>, vector<32x256xbf16>, vector<64x256xf32> -> vector<64x256xf32>
    %56 = arith.addf %48, %55 : vector<64x256xf32>
    %c0_49 = arith.constant 0 : index
    %c2_50 = arith.constant 2 : index
    %c1_51 = arith.constant 1 : index
    %c0_52 = arith.constant 0 : index
    %57 = vector.load %arg1[%c0_49, %c2_50, %c1_51, %c0_52] : memref<1x10x10x32xf32, #tpu.memory_space<vmem>>, vector<1x8x8x32xf32>
    %58 = vector.shape_cast %57 : vector<1x8x8x32xf32> to vector<8x8x32xf32>
    %59 = vector.shape_cast %58 : vector<8x8x32xf32> to vector<64x32xf32>
    %60 = arith.truncf %59 : vector<64x32xf32> to vector<64x32xbf16>
    %c7 = arith.constant 7 : index
    %c0_53 = arith.constant 0 : index
    %c0_54 = arith.constant 0 : index
    %61 = vector.load %arg2[%c7, %c0_53, %c0_54] : memref<9x32x256xbf16, #tpu.memory_space<vmem>>, vector<1x32x256xbf16>
    %62 = vector.shape_cast %61 : vector<1x32x256xbf16> to vector<32x256xbf16>
    %cst_55 = arith.constant dense<0.000000e+00> : vector<64x256xf32>
    %63 = tpu.matmul %60, %62, %cst_55 {dimension_numbers = #tpu.dot_dimension_numbers<[1], [0], [0], [1], [0, 0, 1, 1], [], []>} : vector<64x32xbf16>, vector<32x256xbf16>, vector<64x256xf32> -> vector<64x256xf32>
    %64 = arith.addf %56, %63 : vector<64x256xf32>
    %c0_56 = arith.constant 0 : index
    %c2_57 = arith.constant 2 : index
    %c2_58 = arith.constant 2 : index
    %c0_59 = arith.constant 0 : index
    %65 = vector.load %arg1[%c0_56, %c2_57, %c2_58, %c0_59] : memref<1x10x10x32xf32, #tpu.memory_space<vmem>>, vector<1x8x8x32xf32>
    %66 = vector.shape_cast %65 : vector<1x8x8x32xf32> to vector<8x8x32xf32>
    %67 = vector.shape_cast %66 : vector<8x8x32xf32> to vector<64x32xf32>
    %68 = arith.truncf %67 : vector<64x32xf32> to vector<64x32xbf16>
    %c8 = arith.constant 8 : index
    %c0_60 = arith.constant 0 : index
    %c0_61 = arith.constant 0 : index
    %69 = vector.load %arg2[%c8, %c0_60, %c0_61] : memref<9x32x256xbf16, #tpu.memory_space<vmem>>, vector<1x32x256xbf16>
    %70 = vector.shape_cast %69 : vector<1x32x256xbf16> to vector<32x256xbf16>
    %cst_62 = arith.constant dense<0.000000e+00> : vector<64x256xf32>
    %71 = tpu.matmul %68, %70, %cst_62 {dimension_numbers = #tpu.dot_dimension_numbers<[1], [0], [0], [1], [0, 0, 1, 1], [], []>} : vector<64x32xbf16>, vector<32x256xbf16>, vector<64x256xf32> -> vector<64x256xf32>
    %72 = arith.addf %64, %71 : vector<64x256xf32>
    %c0_63 = arith.constant 0 : index
    %c0_64 = arith.constant 0 : index
    %73 = vector.load %arg3[%c0_63, %c0_64] : memref<1x256xf32, #tpu.memory_space<vmem>>, vector<1x256xf32>
    %74 = vector.broadcast %73 : vector<1x256xf32> to vector<64x256xf32>
    %75 = arith.addf %72, %74 : vector<64x256xf32>
    %76 = arith.truncf %75 : vector<64x256xf32> to vector<64x256xbf16>
    %c0_65 = arith.constant 0 : index
    %c0_66 = arith.constant 0 : index
    %c0_67 = arith.constant 0 : index
    %77 = vector.load %arg4[%c0_65, %c0_66, %c0_67] : memref<1x64x256xbf16, #tpu.memory_space<vmem>>, vector<1x64x256xbf16>
    %78 = vector.shape_cast %77 : vector<1x64x256xbf16> to vector<64x256xbf16>
    %79 = vector.shape_cast %76 : vector<64x256xbf16> to vector<1x64x256xbf16>
    tpu.vector_store %arg4[%c0_65, %c0_66, %c0_67], %79 {strides = array<i32>} : memref<1x64x256xbf16, #tpu.memory_space<vmem>>, vector<1x64x256xbf16>,
    return
  }
  func.func @transform_0(%arg0: i32) -> (i32, i32, i32, i32) {
    %c0_i32 = arith.constant 0 : i32
    %c0_i32_0 = arith.constant 0 : i32
    %c0_i32_1 = arith.constant 0 : i32
    %c0_i32_2 = arith.constant 0 : i32
    return %arg0, %c0_i32, %c0_i32_0, %c0_i32_1 : i32, i32, i32, i32
  }
  func.func @transform_1(%arg0: i32) -> (i32, i32, i32) {
    %c0_i32 = arith.constant 0 : i32
    %c0_i32_0 = arith.constant 0 : i32
    %c0_i32_1 = arith.constant 0 : i32
    %c0_i32_2 = arith.constant 0 : i32
    return %c0_i32, %c0_i32_0, %c0_i32_1 : i32, i32, i32
  }
  func.func @transform_2(%arg0: i32) -> (i32, i32) {
    %c0_i32 = arith.constant 0 : i32
    %c0_i32_0 = arith.constant 0 : i32
    %c0_i32_1 = arith.constant 0 : i32
    return %c0_i32, %c0_i32_0 : i32, i32
  }
  func.func @transform_3(%arg0: i32) -> (i32, i32, i32) {
    %c0_i32 = arith.constant 0 : i32
    %c0_i32_0 = arith.constant 0 : i32
    %c0_i32_1 = arith.constant 0 : i32
    return %arg0, %c0_i32, %c0_i32_0 : i32, i32, i32
  }
}

module attributes {stable_mosaic.version = 11 : i64} {
  func.func @_attn_kernel(%arg0: i32, %arg1: memref<1x64x256xbf16, #tpu.memory_space<vmem>>, %arg2: memref<1x64x128xf32, #tpu.memory_space<vmem>>, %arg3: memref<1x4x64x64xf32, #tpu.memory_space<vmem>>) attributes {dimension_semantics = [#tpu.dimension_semantics<parallel>], iteration_bounds = array<i64: 2>, scalar_prefetch = 0 : i64, scratch_operands = 0 : i64, tpu.core_type = #tpu.core_type<tc>, window_params = [{transform_indices = @transform_0, window_bounds = array<i64: 1, 64, 256>}, {transform_indices = @transform_1, window_bounds = array<i64: 1, 64, 128>}, {transform_indices = @transform_2, window_bounds = array<i64: 1, 4, 64, 64>}]} {
    %c0 = arith.constant 0 : index
    %c0_0 = arith.constant 0 : index
    %c0_1 = arith.constant 0 : index
    %0 = vector.load %arg1[%c0, %c0_0, %c0_1] : memref<1x64x256xbf16, #tpu.memory_space<vmem>>, vector<1x64x256xbf16>
    %1 = vector.shape_cast %0 : vector<1x64x256xbf16> to vector<64x256xbf16>
    %2 = vector.extract_strided_slice %1 {offsets = [0, 0], sizes = [64, 8], strides = [1, 1]} : vector<64x256xbf16> to vector<64x8xbf16>
    %3 = vector.extract_strided_slice %1 {offsets = [0, 32], sizes = [64, 8], strides = [1, 1]} : vector<64x256xbf16> to vector<64x8xbf16>
    %4 = vector.extract_strided_slice %1 {offsets = [0, 64], sizes = [64, 32], strides = [1, 1]} : vector<64x256xbf16> to vector<64x32xbf16>
    %cst = arith.constant dense<0.000000e+00> : vector<64x64xf32>
    %5 = tpu.matmul %2, %3, %cst {dimension_numbers = #tpu.dot_dimension_numbers<[1], [1], [0], [0], [0, 0, 1, 0], [], []>} : vector<64x8xbf16>, vector<64x8xbf16>, vector<64x64xf32> -> vector<64x64xf32>
    %cst_2 = arith.constant 1.000000e+00 : f32
    %6 = vector.broadcast %cst_2 : f32 to vector<64x64xf32>
    %7 = arith.mulf %5, %6 : vector<64x64xf32>
    %cst_3 = arith.constant dense<0xFF800000> : vector<64xf32>
    %8 = vector.multi_reduction <maximumf>, %7, %cst_3 [1] : vector<64x64xf32> to vector<64xf32>
    %9 = vector.shape_cast %8 : vector<64xf32> to vector<64x1xf32>
    %10 = vector.broadcast %9 : vector<64x1xf32> to vector<64x64xf32>
    %11 = arith.subf %7, %10 : vector<64x64xf32>
    %12 = math.exp %11 : vector<64x64xf32>
    %cst_4 = arith.constant dense<0.000000e+00> : vector<64xf32>
    %13 = vector.multi_reduction <add>, %12, %cst_4 [1] : vector<64x64xf32> to vector<64xf32>
    %14 = vector.shape_cast %13 : vector<64xf32> to vector<64x1xf32>
    %15 = tpu.reciprocal %14 {approx = true} : vector<64x1xf32> -> vector<64x1xf32>
    %16 = vector.broadcast %15 : vector<64x1xf32> to vector<64x64xf32>
    %17 = arith.mulf %12, %16 : vector<64x64xf32>
    %c0_5 = arith.constant 0 : index
    %c0_6 = arith.constant 0 : index
    %c0_7 = arith.constant 0 : index
    %c0_8 = arith.constant 0 : index
    %18 = vector.load %arg3[%c0_5, %c0_6, %c0_7, %c0_8] : memref<1x4x64x64xf32, #tpu.memory_space<vmem>>, vector<1x1x64x64xf32>
    %19 = vector.shape_cast %18 : vector<1x1x64x64xf32> to vector<64x64xf32>
    %20 = vector.shape_cast %17 : vector<64x64xf32> to vector<1x1x64x64xf32>
    tpu.vector_store %arg3[%c0_5, %c0_6, %c0_7, %c0_8], %20 {strides = array<i32>} : memref<1x4x64x64xf32, #tpu.memory_space<vmem>>, vector<1x1x64x64xf32>,
    %21 = arith.truncf %17 : vector<64x64xf32> to vector<64x64xbf16>
    %cst_9 = arith.constant dense<0.000000e+00> : vector<64x32xf32>
    %22 = tpu.matmul %21, %4, %cst_9 {dimension_numbers = #tpu.dot_dimension_numbers<[1], [0], [0], [1], [0, 0, 1, 1], [], []>} : vector<64x64xbf16>, vector<64x32xbf16>, vector<64x32xf32> -> vector<64x32xf32>
    %23 = vector.extract_strided_slice %1 {offsets = [0, 8], sizes = [64, 8], strides = [1, 1]} : vector<64x256xbf16> to vector<64x8xbf16>
    %24 = vector.extract_strided_slice %1 {offsets = [0, 40], sizes = [64, 8], strides = [1, 1]} : vector<64x256xbf16> to vector<64x8xbf16>
    %25 = vector.extract_strided_slice %1 {offsets = [0, 96], sizes = [64, 32], strides = [1, 1]} : vector<64x256xbf16> to vector<64x32xbf16>
    %cst_10 = arith.constant dense<0.000000e+00> : vector<64x64xf32>
    %26 = tpu.matmul %23, %24, %cst_10 {dimension_numbers = #tpu.dot_dimension_numbers<[1], [1], [0], [0], [0, 0, 1, 0], [], []>} : vector<64x8xbf16>, vector<64x8xbf16>, vector<64x64xf32> -> vector<64x64xf32>
    %cst_11 = arith.constant 1.000000e+00 : f32
    %27 = vector.broadcast %cst_11 : f32 to vector<64x64xf32>
    %28 = arith.mulf %26, %27 : vector<64x64xf32>
    %cst_12 = arith.constant dense<0xFF800000> : vector<64xf32>
    %29 = vector.multi_reduction <maximumf>, %28, %cst_12 [1] : vector<64x64xf32> to vector<64xf32>
    %30 = vector.shape_cast %29 : vector<64xf32> to vector<64x1xf32>
    %31 = vector.broadcast %30 : vector<64x1xf32> to vector<64x64xf32>
    %32 = arith.subf %28, %31 : vector<64x64xf32>
    %33 = math.exp %32 : vector<64x64xf32>
    %cst_13 = arith.constant dense<0.000000e+00> : vector<64xf32>
    %34 = vector.multi_reduction <add>, %33, %cst_13 [1] : vector<64x64xf32> to vector<64xf32>
    %35 = vector.shape_cast %34 : vector<64xf32> to vector<64x1xf32>
    %36 = tpu.reciprocal %35 {approx = true} : vector<64x1xf32> -> vector<64x1xf32>
    %37 = vector.broadcast %36 : vector<64x1xf32> to vector<64x64xf32>
    %38 = arith.mulf %33, %37 : vector<64x64xf32>
    %c0_14 = arith.constant 0 : index
    %c1 = arith.constant 1 : index
    %c0_15 = arith.constant 0 : index
    %c0_16 = arith.constant 0 : index
    %39 = vector.load %arg3[%c0_14, %c1, %c0_15, %c0_16] : memref<1x4x64x64xf32, #tpu.memory_space<vmem>>, vector<1x1x64x64xf32>
    %40 = vector.shape_cast %39 : vector<1x1x64x64xf32> to vector<64x64xf32>
    %41 = vector.shape_cast %38 : vector<64x64xf32> to vector<1x1x64x64xf32>
    tpu.vector_store %arg3[%c0_14, %c1, %c0_15, %c0_16], %41 {strides = array<i32>} : memref<1x4x64x64xf32, #tpu.memory_space<vmem>>, vector<1x1x64x64xf32>,
    %42 = arith.truncf %38 : vector<64x64xf32> to vector<64x64xbf16>
    %cst_17 = arith.constant dense<0.000000e+00> : vector<64x32xf32>
    %43 = tpu.matmul %42, %25, %cst_17 {dimension_numbers = #tpu.dot_dimension_numbers<[1], [0], [0], [1], [0, 0, 1, 1], [], []>} : vector<64x64xbf16>, vector<64x32xbf16>, vector<64x32xf32> -> vector<64x32xf32>
    %44 = vector.extract_strided_slice %1 {offsets = [0, 16], sizes = [64, 8], strides = [1, 1]} : vector<64x256xbf16> to vector<64x8xbf16>
    %45 = vector.extract_strided_slice %1 {offsets = [0, 48], sizes = [64, 8], strides = [1, 1]} : vector<64x256xbf16> to vector<64x8xbf16>
    %46 = vector.extract_strided_slice %1 {offsets = [0, 128], sizes = [64, 32], strides = [1, 1]} : vector<64x256xbf16> to vector<64x32xbf16>
    %cst_18 = arith.constant dense<0.000000e+00> : vector<64x64xf32>
    %47 = tpu.matmul %44, %45, %cst_18 {dimension_numbers = #tpu.dot_dimension_numbers<[1], [1], [0], [0], [0, 0, 1, 0], [], []>} : vector<64x8xbf16>, vector<64x8xbf16>, vector<64x64xf32> -> vector<64x64xf32>
    %cst_19 = arith.constant 1.000000e+00 : f32
    %48 = vector.broadcast %cst_19 : f32 to vector<64x64xf32>
    %49 = arith.mulf %47, %48 : vector<64x64xf32>
    %cst_20 = arith.constant dense<0xFF800000> : vector<64xf32>
    %50 = vector.multi_reduction <maximumf>, %49, %cst_20 [1] : vector<64x64xf32> to vector<64xf32>
    %51 = vector.shape_cast %50 : vector<64xf32> to vector<64x1xf32>
    %52 = vector.broadcast %51 : vector<64x1xf32> to vector<64x64xf32>
    %53 = arith.subf %49, %52 : vector<64x64xf32>
    %54 = math.exp %53 : vector<64x64xf32>
    %cst_21 = arith.constant dense<0.000000e+00> : vector<64xf32>
    %55 = vector.multi_reduction <add>, %54, %cst_21 [1] : vector<64x64xf32> to vector<64xf32>
    %56 = vector.shape_cast %55 : vector<64xf32> to vector<64x1xf32>
    %57 = tpu.reciprocal %56 {approx = true} : vector<64x1xf32> -> vector<64x1xf32>
    %58 = vector.broadcast %57 : vector<64x1xf32> to vector<64x64xf32>
    %59 = arith.mulf %54, %58 : vector<64x64xf32>
    %c0_22 = arith.constant 0 : index
    %c2 = arith.constant 2 : index
    %c0_23 = arith.constant 0 : index
    %c0_24 = arith.constant 0 : index
    %60 = vector.load %arg3[%c0_22, %c2, %c0_23, %c0_24] : memref<1x4x64x64xf32, #tpu.memory_space<vmem>>, vector<1x1x64x64xf32>
    %61 = vector.shape_cast %60 : vector<1x1x64x64xf32> to vector<64x64xf32>
    %62 = vector.shape_cast %59 : vector<64x64xf32> to vector<1x1x64x64xf32>
    tpu.vector_store %arg3[%c0_22, %c2, %c0_23, %c0_24], %62 {strides = array<i32>} : memref<1x4x64x64xf32, #tpu.memory_space<vmem>>, vector<1x1x64x64xf32>,
    %63 = arith.truncf %59 : vector<64x64xf32> to vector<64x64xbf16>
    %cst_25 = arith.constant dense<0.000000e+00> : vector<64x32xf32>
    %64 = tpu.matmul %63, %46, %cst_25 {dimension_numbers = #tpu.dot_dimension_numbers<[1], [0], [0], [1], [0, 0, 1, 1], [], []>} : vector<64x64xbf16>, vector<64x32xbf16>, vector<64x32xf32> -> vector<64x32xf32>
    %65 = vector.extract_strided_slice %1 {offsets = [0, 24], sizes = [64, 8], strides = [1, 1]} : vector<64x256xbf16> to vector<64x8xbf16>
    %66 = vector.extract_strided_slice %1 {offsets = [0, 56], sizes = [64, 8], strides = [1, 1]} : vector<64x256xbf16> to vector<64x8xbf16>
    %67 = vector.extract_strided_slice %1 {offsets = [0, 160], sizes = [64, 32], strides = [1, 1]} : vector<64x256xbf16> to vector<64x32xbf16>
    %cst_26 = arith.constant dense<0.000000e+00> : vector<64x64xf32>
    %68 = tpu.matmul %65, %66, %cst_26 {dimension_numbers = #tpu.dot_dimension_numbers<[1], [1], [0], [0], [0, 0, 1, 0], [], []>} : vector<64x8xbf16>, vector<64x8xbf16>, vector<64x64xf32> -> vector<64x64xf32>
    %cst_27 = arith.constant 1.000000e+00 : f32
    %69 = vector.broadcast %cst_27 : f32 to vector<64x64xf32>
    %70 = arith.mulf %68, %69 : vector<64x64xf32>
    %cst_28 = arith.constant dense<0xFF800000> : vector<64xf32>
    %71 = vector.multi_reduction <maximumf>, %70, %cst_28 [1] : vector<64x64xf32> to vector<64xf32>
    %72 = vector.shape_cast %71 : vector<64xf32> to vector<64x1xf32>
    %73 = vector.broadcast %72 : vector<64x1xf32> to vector<64x64xf32>
    %74 = arith.subf %70, %73 : vector<64x64xf32>
    %75 = math.exp %74 : vector<64x64xf32>
    %cst_29 = arith.constant dense<0.000000e+00> : vector<64xf32>
    %76 = vector.multi_reduction <add>, %75, %cst_29 [1] : vector<64x64xf32> to vector<64xf32>
    %77 = vector.shape_cast %76 : vector<64xf32> to vector<64x1xf32>
    %78 = tpu.reciprocal %77 {approx = true} : vector<64x1xf32> -> vector<64x1xf32>
    %79 = vector.broadcast %78 : vector<64x1xf32> to vector<64x64xf32>
    %80 = arith.mulf %75, %79 : vector<64x64xf32>
    %c0_30 = arith.constant 0 : index
    %c3 = arith.constant 3 : index
    %c0_31 = arith.constant 0 : index
    %c0_32 = arith.constant 0 : index
    %81 = vector.load %arg3[%c0_30, %c3, %c0_31, %c0_32] : memref<1x4x64x64xf32, #tpu.memory_space<vmem>>, vector<1x1x64x64xf32>
    %82 = vector.shape_cast %81 : vector<1x1x64x64xf32> to vector<64x64xf32>
    %83 = vector.shape_cast %80 : vector<64x64xf32> to vector<1x1x64x64xf32>
    tpu.vector_store %arg3[%c0_30, %c3, %c0_31, %c0_32], %83 {strides = array<i32>} : memref<1x4x64x64xf32, #tpu.memory_space<vmem>>, vector<1x1x64x64xf32>,
    %84 = arith.truncf %80 : vector<64x64xf32> to vector<64x64xbf16>
    %cst_33 = arith.constant dense<0.000000e+00> : vector<64x32xf32>
    %85 = tpu.matmul %84, %67, %cst_33 {dimension_numbers = #tpu.dot_dimension_numbers<[1], [0], [0], [1], [0, 0, 1, 1], [], []>} : vector<64x64xbf16>, vector<64x32xbf16>, vector<64x32xf32> -> vector<64x32xf32>
    %86 = tpu.concatenate %22, %43, %64, %85 in 1 : vector<64x32xf32>, vector<64x32xf32>, vector<64x32xf32>, vector<64x32xf32> -> vector<64x128xf32>
    %c0_34 = arith.constant 0 : index
    %c0_35 = arith.constant 0 : index
    %c0_36 = arith.constant 0 : index
    %87 = vector.load %arg2[%c0_34, %c0_35, %c0_36] : memref<1x64x128xf32, #tpu.memory_space<vmem>>, vector<1x64x128xf32>
    %88 = vector.shape_cast %87 : vector<1x64x128xf32> to vector<64x128xf32>
    %89 = vector.shape_cast %86 : vector<64x128xf32> to vector<1x64x128xf32>
    tpu.vector_store %arg2[%c0_34, %c0_35, %c0_36], %89 {strides = array<i32>} : memref<1x64x128xf32, #tpu.memory_space<vmem>>, vector<1x64x128xf32>,
    return
  }
  func.func @transform_0(%arg0: i32) -> (i32, i32, i32) {
    %c0_i32 = arith.constant 0 : i32
    %c0_i32_0 = arith.constant 0 : i32
    %c0_i32_1 = arith.constant 0 : i32
    return %arg0, %c0_i32, %c0_i32_0 : i32, i32, i32
  }
  func.func @transform_1(%arg0: i32) -> (i32, i32, i32) {
    %c0_i32 = arith.constant 0 : i32
    %c0_i32_0 = arith.constant 0 : i32
    %c0_i32_1 = arith.constant 0 : i32
    return %arg0, %c0_i32, %c0_i32_0 : i32, i32, i32
  }
  func.func @transform_2(%arg0: i32) -> (i32, i32, i32, i32) {
    %c0_i32 = arith.constant 0 : i32
    %c0_i32_0 = arith.constant 0 : i32
    %c0_i32_1 = arith.constant 0 : i32
    %c0_i32_2 = arith.constant 0 : i32
    return %arg0, %c0_i32, %c0_i32_0, %c0_i32_1 : i32, i32, i32, i32
  }
}

module attributes {stable_mosaic.version = 11 : i64} {
  func.func @_linear_kernel(%arg0: i32, %arg1: memref<128x128xf32, #tpu.memory_space<vmem>>, %arg2: memref<128x32xbf16, #tpu.memory_space<vmem>>, %arg3: memref<1x32xf32, #tpu.memory_space<vmem>>, %arg4: memref<128x32xf32, #tpu.memory_space<vmem>>, %arg5: memref<128x32xf32, #tpu.memory_space<vmem>>) attributes {dimension_semantics = [#tpu.dimension_semantics<parallel>], iteration_bounds = array<i64: 1>, scalar_prefetch = 0 : i64, scratch_operands = 0 : i64, tpu.core_type = #tpu.core_type<tc>, window_params = [{transform_indices = @transform_0, window_bounds = array<i64: 128, 128>}, {pipeline_mode = #tpu.pipeline_mode<synchronous>, transform_indices = @transform_1, window_bounds = array<i64: 128, 32>}, {pipeline_mode = #tpu.pipeline_mode<synchronous>, transform_indices = @transform_2, window_bounds = array<i64: 1, 32>}, {transform_indices = @transform_3, window_bounds = array<i64: 128, 32>}, {transform_indices = @transform_4, window_bounds = array<i64: 128, 32>}]} {
    %c0 = arith.constant 0 : index
    %c0_0 = arith.constant 0 : index
    %0 = vector.load %arg1[%c0, %c0_0] : memref<128x128xf32, #tpu.memory_space<vmem>>, vector<128x128xf32>
    %1 = arith.truncf %0 : vector<128x128xf32> to vector<128x128xbf16>
    %c0_1 = arith.constant 0 : index
    %c0_2 = arith.constant 0 : index
    %2 = vector.load %arg2[%c0_1, %c0_2] : memref<128x32xbf16, #tpu.memory_space<vmem>>, vector<128x32xbf16>
    %cst = arith.constant dense<0.000000e+00> : vector<128x32xf32>
    %3 = tpu.matmul %1, %2, %cst {dimension_numbers = #tpu.dot_dimension_numbers<[1], [0], [0], [1], [0, 0, 1, 1], [], []>} : vector<128x128xbf16>, vector<128x32xbf16>, vector<128x32xf32> -> vector<128x32xf32>
    %c0_3 = arith.constant 0 : index
    %c0_4 = arith.constant 0 : index
    %4 = vector.load %arg3[%c0_3, %c0_4] : memref<1x32xf32, #tpu.memory_space<vmem>>, vector<1x32xf32>
    %5 = vector.broadcast %4 : vector<1x32xf32> to vector<128x32xf32>
    %6 = arith.addf %3, %5 : vector<128x32xf32>
    %c0_5 = arith.constant 0 : index
    %c0_6 = arith.constant 0 : index
    %7 = vector.load %arg4[%c0_5, %c0_6] : memref<128x32xf32, #tpu.memory_space<vmem>>, vector<128x32xf32>
    %8 = arith.addf %6, %7 : vector<128x32xf32>
    %c0_7 = arith.constant 0 : index
    %c0_8 = arith.constant 0 : index
    %9 = vector.load %arg5[%c0_7, %c0_8] : memref<128x32xf32, #tpu.memory_space<vmem>>, vector<128x32xf32>
    tpu.vector_store %arg5[%c0_7, %c0_8], %8 {strides = array<i32>} : memref<128x32xf32, #tpu.memory_space<vmem>>, vector<128x32xf32>,
    return
  }
  func.func @transform_0(%arg0: i32) -> (i32, i32) {
    %c0_i32 = arith.constant 0 : i32
    %c0_i32_0 = arith.constant 0 : i32
    return %arg0, %c0_i32 : i32, i32
  }
  func.func @transform_1(%arg0: i32) -> (i32, i32) {
    %c0_i32 = arith.constant 0 : i32
    %c0_i32_0 = arith.constant 0 : i32
    %c0_i32_1 = arith.constant 0 : i32
    return %c0_i32, %c0_i32_0 : i32, i32
  }
  func.func @transform_2(%arg0: i32) -> (i32, i32) {
    %c0_i32 = arith.constant 0 : i32
    %c0_i32_0 = arith.constant 0 : i32
    %c0_i32_1 = arith.constant 0 : i32
    return %c0_i32, %c0_i32_0 : i32, i32
  }
  func.func @transform_3(%arg0: i32) -> (i32, i32) {
    %c0_i32 = arith.constant 0 : i32
    %c0_i32_0 = arith.constant 0 : i32
    return %arg0, %c0_i32 : i32, i32
  }
  func.func @transform_4(%arg0: i32) -> (i32, i32) {
    %c0_i32 = arith.constant 0 : i32
    %c0_i32_0 = arith.constant 0 : i32
    return %arg0, %c0_i32 : i32, i32
  }
}

module attributes {stable_mosaic.version = 11 : i64} {
  func.func @_conv3x3_kernel(%arg0: i32, %arg1: memref<1x10x10x32xf32, #tpu.memory_space<vmem>>, %arg2: memref<9x32x32xbf16, #tpu.memory_space<vmem>>, %arg3: memref<1x32xf32, #tpu.memory_space<vmem>>, %arg4: memref<1x64x32xf32, #tpu.memory_space<vmem>>) attributes {dimension_semantics = [#tpu.dimension_semantics<parallel>], iteration_bounds = array<i64: 2>, scalar_prefetch = 0 : i64, scratch_operands = 0 : i64, tpu.core_type = #tpu.core_type<tc>, window_params = [{transform_indices = @transform_0, window_bounds = array<i64: 1, 10, 10, 32>}, {pipeline_mode = #tpu.pipeline_mode<synchronous>, transform_indices = @transform_1, window_bounds = array<i64: 9, 32, 32>}, {pipeline_mode = #tpu.pipeline_mode<synchronous>, transform_indices = @transform_2, window_bounds = array<i64: 1, 32>}, {transform_indices = @transform_3, window_bounds = array<i64: 1, 64, 32>}]} {
    %cst = arith.constant 0.000000e+00 : f32
    %0 = vector.broadcast %cst : f32 to vector<64x32xf32>
    %c0 = arith.constant 0 : index
    %c0_0 = arith.constant 0 : index
    %c0_1 = arith.constant 0 : index
    %c0_2 = arith.constant 0 : index
    %1 = vector.load %arg1[%c0, %c0_0, %c0_1, %c0_2] : memref<1x10x10x32xf32, #tpu.memory_space<vmem>>, vector<1x8x8x32xf32>
    %2 = vector.shape_cast %1 : vector<1x8x8x32xf32> to vector<8x8x32xf32>
    %3 = vector.shape_cast %2 : vector<8x8x32xf32> to vector<64x32xf32>
    %4 = arith.truncf %3 : vector<64x32xf32> to vector<64x32xbf16>
    %c0_3 = arith.constant 0 : index
    %c0_4 = arith.constant 0 : index
    %c0_5 = arith.constant 0 : index
    %5 = vector.load %arg2[%c0_3, %c0_4, %c0_5] : memref<9x32x32xbf16, #tpu.memory_space<vmem>>, vector<1x32x32xbf16>
    %6 = vector.shape_cast %5 : vector<1x32x32xbf16> to vector<32x32xbf16>
    %cst_6 = arith.constant dense<0.000000e+00> : vector<64x32xf32>
    %7 = tpu.matmul %4, %6, %cst_6 {dimension_numbers = #tpu.dot_dimension_numbers<[1], [0], [0], [1], [0, 0, 1, 1], [], []>} : vector<64x32xbf16>, vector<32x32xbf16>, vector<64x32xf32> -> vector<64x32xf32>
    %8 = arith.addf %0, %7 : vector<64x32xf32>
    %c0_7 = arith.constant 0 : index
    %c0_8 = arith.constant 0 : index
    %c1 = arith.constant 1 : index
    %c0_9 = arith.constant 0 : index
    %9 = vector.load %arg1[%c0_7, %c0_8, %c1, %c0_9] : memref<1x10x10x32xf32, #tpu.memory_space<vmem>>, vector<1x8x8x32xf32>
    %10 = vector.shape_cast %9 : vector<1x8x8x32xf32> to vector<8x8x32xf32>
    %11 = vector.shape_cast %10 : vector<8x8x32xf32> to vector<64x32xf32>
    %12 = arith.truncf %11 : vector<64x32xf32> to vector<64x32xbf16>
    %c1_10 = arith.constant 1 : index
    %c0_11 = arith.constant 0 : index
    %c0_12 = arith.constant 0 : index
    %13 = vector.load %arg2[%c1_10, %c0_11, %c0_12] : memref<9x32x32xbf16, #tpu.memory_space<vmem>>, vector<1x32x32xbf16>
    %14 = vector.shape_cast %13 : vector<1x32x32xbf16> to vector<32x32xbf16>
    %cst_13 = arith.constant dense<0.000000e+00> : vector<64x32xf32>
    %15 = tpu.matmul %12, %14, %cst_13 {dimension_numbers = #tpu.dot_dimension_numbers<[1], [0], [0], [1], [0, 0, 1, 1], [], []>} : vector<64x32xbf16>, vector<32x32xbf16>, vector<64x32xf32> -> vector<64x32xf32>
    %16 = arith.addf %8, %15 : vector<64x32xf32>
    %c0_14 = arith.constant 0 : index
    %c0_15 = arith.constant 0 : index
    %c2 = arith.constant 2 : index
    %c0_16 = arith.constant 0 : index
    %17 = vector.load %arg1[%c0_14, %c0_15, %c2, %c0_16] : memref<1x10x10x32xf32, #tpu.memory_space<vmem>>, vector<1x8x8x32xf32>
    %18 = vector.shape_cast %17 : vector<1x8x8x32xf32> to vector<8x8x32xf32>
    %19 = vector.shape_cast %18 : vector<8x8x32xf32> to vector<64x32xf32>
    %20 = arith.truncf %19 : vector<64x32xf32> to vector<64x32xbf16>
    %c2_17 = arith.constant 2 : index
    %c0_18 = arith.constant 0 : index
    %c0_19 = arith.constant 0 : index
    %21 = vector.load %arg2[%c2_17, %c0_18, %c0_19] : memref<9x32x32xbf16, #tpu.memory_space<vmem>>, vector<1x32x32xbf16>
    %22 = vector.shape_cast %21 : vector<1x32x32xbf16> to vector<32x32xbf16>
    %cst_20 = arith.constant dense<0.000000e+00> : vector<64x32xf32>
    %23 = tpu.matmul %20, %22, %cst_20 {dimension_numbers = #tpu.dot_dimension_numbers<[1], [0], [0], [1], [0, 0, 1, 1], [], []>} : vector<64x32xbf16>, vector<32x32xbf16>, vector<64x32xf32> -> vector<64x32xf32>
    %24 = arith.addf %16, %23 : vector<64x32xf32>
    %c0_21 = arith.constant 0 : index
    %c1_22 = arith.constant 1 : index
    %c0_23 = arith.constant 0 : index
    %c0_24 = arith.constant 0 : index
    %25 = vector.load %arg1[%c0_21, %c1_22, %c0_23, %c0_24] : memref<1x10x10x32xf32, #tpu.memory_space<vmem>>, vector<1x8x8x32xf32>
    %26 = vector.shape_cast %25 : vector<1x8x8x32xf32> to vector<8x8x32xf32>
    %27 = vector.shape_cast %26 : vector<8x8x32xf32> to vector<64x32xf32>
    %28 = arith.truncf %27 : vector<64x32xf32> to vector<64x32xbf16>
    %c3 = arith.constant 3 : index
    %c0_25 = arith.constant 0 : index
    %c0_26 = arith.constant 0 : index
    %29 = vector.load %arg2[%c3, %c0_25, %c0_26] : memref<9x32x32xbf16, #tpu.memory_space<vmem>>, vector<1x32x32xbf16>
    %30 = vector.shape_cast %29 : vector<1x32x32xbf16> to vector<32x32xbf16>
    %cst_27 = arith.constant dense<0.000000e+00> : vector<64x32xf32>
    %31 = tpu.matmul %28, %30, %cst_27 {dimension_numbers = #tpu.dot_dimension_numbers<[1], [0], [0], [1], [0, 0, 1, 1], [], []>} : vector<64x32xbf16>, vector<32x32xbf16>, vector<64x32xf32> -> vector<64x32xf32>
    %32 = arith.addf %24, %31 : vector<64x32xf32>
    %c0_28 = arith.constant 0 : index
    %c1_29 = arith.constant 1 : index
    %c1_30 = arith.constant 1 : index
    %c0_31 = arith.constant 0 : index
    %33 = vector.load %arg1[%c0_28, %c1_29, %c1_30, %c0_31] : memref<1x10x10x32xf32, #tpu.memory_space<vmem>>, vector<1x8x8x32xf32>
    %34 = vector.shape_cast %33 : vector<1x8x8x32xf32> to vector<8x8x32xf32>
    %35 = vector.shape_cast %34 : vector<8x8x32xf32> to vector<64x32xf32>
    %36 = arith.truncf %35 : vector<64x32xf32> to vector<64x32xbf16>
    %c4 = arith.constant 4 : index
    %c0_32 = arith.constant 0 : index
    %c0_33 = arith.constant 0 : index
    %37 = vector.load %arg2[%c4, %c0_32, %c0_33] : memref<9x32x32xbf16, #tpu.memory_space<vmem>>, vector<1x32x32xbf16>
    %38 = vector.shape_cast %37 : vector<1x32x32xbf16> to vector<32x32xbf16>
    %cst_34 = arith.constant dense<0.000000e+00> : vector<64x32xf32>
    %39 = tpu.matmul %36, %38, %cst_34 {dimension_numbers = #tpu.dot_dimension_numbers<[1], [0], [0], [1], [0, 0, 1, 1], [], []>} : vector<64x32xbf16>, vector<32x32xbf16>, vector<64x32xf32> -> vector<64x32xf32>
    %40 = arith.addf %32, %39 : vector<64x32xf32>
    %c0_35 = arith.constant 0 : index
    %c1_36 = arith.constant 1 : index
    %c2_37 = arith.constant 2 : index
    %c0_38 = arith.constant 0 : index
    %41 = vector.load %arg1[%c0_35, %c1_36, %c2_37, %c0_38] : memref<1x10x10x32xf32, #tpu.memory_space<vmem>>, vector<1x8x8x32xf32>
    %42 = vector.shape_cast %41 : vector<1x8x8x32xf32> to vector<8x8x32xf32>
    %43 = vector.shape_cast %42 : vector<8x8x32xf32> to vector<64x32xf32>
    %44 = arith.truncf %43 : vector<64x32xf32> to vector<64x32xbf16>
    %c5 = arith.constant 5 : index
    %c0_39 = arith.constant 0 : index
    %c0_40 = arith.constant 0 : index
    %45 = vector.load %arg2[%c5, %c0_39, %c0_40] : memref<9x32x32xbf16, #tpu.memory_space<vmem>>, vector<1x32x32xbf16>
    %46 = vector.shape_cast %45 : vector<1x32x32xbf16> to vector<32x32xbf16>
    %cst_41 = arith.constant dense<0.000000e+00> : vector<64x32xf32>
    %47 = tpu.matmul %44, %46, %cst_41 {dimension_numbers = #tpu.dot_dimension_numbers<[1], [0], [0], [1], [0, 0, 1, 1], [], []>} : vector<64x32xbf16>, vector<32x32xbf16>, vector<64x32xf32> -> vector<64x32xf32>
    %48 = arith.addf %40, %47 : vector<64x32xf32>
    %c0_42 = arith.constant 0 : index
    %c2_43 = arith.constant 2 : index
    %c0_44 = arith.constant 0 : index
    %c0_45 = arith.constant 0 : index
    %49 = vector.load %arg1[%c0_42, %c2_43, %c0_44, %c0_45] : memref<1x10x10x32xf32, #tpu.memory_space<vmem>>, vector<1x8x8x32xf32>
    %50 = vector.shape_cast %49 : vector<1x8x8x32xf32> to vector<8x8x32xf32>
    %51 = vector.shape_cast %50 : vector<8x8x32xf32> to vector<64x32xf32>
    %52 = arith.truncf %51 : vector<64x32xf32> to vector<64x32xbf16>
    %c6 = arith.constant 6 : index
    %c0_46 = arith.constant 0 : index
    %c0_47 = arith.constant 0 : index
    %53 = vector.load %arg2[%c6, %c0_46, %c0_47] : memref<9x32x32xbf16, #tpu.memory_space<vmem>>, vector<1x32x32xbf16>
    %54 = vector.shape_cast %53 : vector<1x32x32xbf16> to vector<32x32xbf16>
    %cst_48 = arith.constant dense<0.000000e+00> : vector<64x32xf32>
    %55 = tpu.matmul %52, %54, %cst_48 {dimension_numbers = #tpu.dot_dimension_numbers<[1], [0], [0], [1], [0, 0, 1, 1], [], []>} : vector<64x32xbf16>, vector<32x32xbf16>, vector<64x32xf32> -> vector<64x32xf32>
    %56 = arith.addf %48, %55 : vector<64x32xf32>
    %c0_49 = arith.constant 0 : index
    %c2_50 = arith.constant 2 : index
    %c1_51 = arith.constant 1 : index
    %c0_52 = arith.constant 0 : index
    %57 = vector.load %arg1[%c0_49, %c2_50, %c1_51, %c0_52] : memref<1x10x10x32xf32, #tpu.memory_space<vmem>>, vector<1x8x8x32xf32>
    %58 = vector.shape_cast %57 : vector<1x8x8x32xf32> to vector<8x8x32xf32>
    %59 = vector.shape_cast %58 : vector<8x8x32xf32> to vector<64x32xf32>
    %60 = arith.truncf %59 : vector<64x32xf32> to vector<64x32xbf16>
    %c7 = arith.constant 7 : index
    %c0_53 = arith.constant 0 : index
    %c0_54 = arith.constant 0 : index
    %61 = vector.load %arg2[%c7, %c0_53, %c0_54] : memref<9x32x32xbf16, #tpu.memory_space<vmem>>, vector<1x32x32xbf16>
    %62 = vector.shape_cast %61 : vector<1x32x32xbf16> to vector<32x32xbf16>
    %cst_55 = arith.constant dense<0.000000e+00> : vector<64x32xf32>
    %63 = tpu.matmul %60, %62, %cst_55 {dimension_numbers = #tpu.dot_dimension_numbers<[1], [0], [0], [1], [0, 0, 1, 1], [], []>} : vector<64x32xbf16>, vector<32x32xbf16>, vector<64x32xf32> -> vector<64x32xf32>
    %64 = arith.addf %56, %63 : vector<64x32xf32>
    %c0_56 = arith.constant 0 : index
    %c2_57 = arith.constant 2 : index
    %c2_58 = arith.constant 2 : index
    %c0_59 = arith.constant 0 : index
    %65 = vector.load %arg1[%c0_56, %c2_57, %c2_58, %c0_59] : memref<1x10x10x32xf32, #tpu.memory_space<vmem>>, vector<1x8x8x32xf32>
    %66 = vector.shape_cast %65 : vector<1x8x8x32xf32> to vector<8x8x32xf32>
    %67 = vector.shape_cast %66 : vector<8x8x32xf32> to vector<64x32xf32>
    %68 = arith.truncf %67 : vector<64x32xf32> to vector<64x32xbf16>
    %c8 = arith.constant 8 : index
    %c0_60 = arith.constant 0 : index
    %c0_61 = arith.constant 0 : index
    %69 = vector.load %arg2[%c8, %c0_60, %c0_61] : memref<9x32x32xbf16, #tpu.memory_space<vmem>>, vector<1x32x32xbf16>
    %70 = vector.shape_cast %69 : vector<1x32x32xbf16> to vector<32x32xbf16>
    %cst_62 = arith.constant dense<0.000000e+00> : vector<64x32xf32>
    %71 = tpu.matmul %68, %70, %cst_62 {dimension_numbers = #tpu.dot_dimension_numbers<[1], [0], [0], [1], [0, 0, 1, 1], [], []>} : vector<64x32xbf16>, vector<32x32xbf16>, vector<64x32xf32> -> vector<64x32xf32>
    %72 = arith.addf %64, %71 : vector<64x32xf32>
    %c0_63 = arith.constant 0 : index
    %c0_64 = arith.constant 0 : index
    %73 = vector.load %arg3[%c0_63, %c0_64] : memref<1x32xf32, #tpu.memory_space<vmem>>, vector<1x32xf32>
    %74 = vector.broadcast %73 : vector<1x32xf32> to vector<64x32xf32>
    %75 = arith.addf %72, %74 : vector<64x32xf32>
    %cst_65 = arith.constant 0.000000e+00 : f32
    %76 = vector.broadcast %cst_65 : f32 to vector<64x32xf32>
    %77 = arith.maximumf %75, %76 : vector<64x32xf32>
    %c0_66 = arith.constant 0 : index
    %c0_67 = arith.constant 0 : index
    %c0_68 = arith.constant 0 : index
    %78 = vector.load %arg4[%c0_66, %c0_67, %c0_68] : memref<1x64x32xf32, #tpu.memory_space<vmem>>, vector<1x64x32xf32>
    %79 = vector.shape_cast %78 : vector<1x64x32xf32> to vector<64x32xf32>
    %80 = vector.shape_cast %77 : vector<64x32xf32> to vector<1x64x32xf32>
    tpu.vector_store %arg4[%c0_66, %c0_67, %c0_68], %80 {strides = array<i32>} : memref<1x64x32xf32, #tpu.memory_space<vmem>>, vector<1x64x32xf32>,
    return
  }
  func.func @transform_0(%arg0: i32) -> (i32, i32, i32, i32) {
    %c0_i32 = arith.constant 0 : i32
    %c0_i32_0 = arith.constant 0 : i32
    %c0_i32_1 = arith.constant 0 : i32
    %c0_i32_2 = arith.constant 0 : i32
    return %arg0, %c0_i32, %c0_i32_0, %c0_i32_1 : i32, i32, i32, i32
  }
  func.func @transform_1(%arg0: i32) -> (i32, i32, i32) {
    %c0_i32 = arith.constant 0 : i32
    %c0_i32_0 = arith.constant 0 : i32
    %c0_i32_1 = arith.constant 0 : i32
    %c0_i32_2 = arith.constant 0 : i32
    return %c0_i32, %c0_i32_0, %c0_i32_1 : i32, i32, i32
  }
  func.func @transform_2(%arg0: i32) -> (i32, i32) {
    %c0_i32 = arith.constant 0 : i32
    %c0_i32_0 = arith.constant 0 : i32
    %c0_i32_1 = arith.constant 0 : i32
    return %c0_i32, %c0_i32_0 : i32, i32
  }
  func.func @transform_3(%arg0: i32) -> (i32, i32, i32) {
    %c0_i32 = arith.constant 0 : i32
    %c0_i32_0 = arith.constant 0 : i32
    %c0_i32_1 = arith.constant 0 : i32
    return %arg0, %c0_i32, %c0_i32_0 : i32, i32, i32
  }
}

module attributes {stable_mosaic.version = 11 : i64} {
  func.func @_conv3x3_kernel(%arg0: i32, %arg1: memref<1x10x10x32xf32, #tpu.memory_space<vmem>>, %arg2: memref<9x32x32xbf16, #tpu.memory_space<vmem>>, %arg3: memref<1x32xf32, #tpu.memory_space<vmem>>, %arg4: memref<1x64x32xf32, #tpu.memory_space<vmem>>, %arg5: memref<1x64x32xf32, #tpu.memory_space<vmem>>) attributes {dimension_semantics = [#tpu.dimension_semantics<parallel>], iteration_bounds = array<i64: 2>, scalar_prefetch = 0 : i64, scratch_operands = 0 : i64, tpu.core_type = #tpu.core_type<tc>, window_params = [{transform_indices = @transform_0, window_bounds = array<i64: 1, 10, 10, 32>}, {pipeline_mode = #tpu.pipeline_mode<synchronous>, transform_indices = @transform_1, window_bounds = array<i64: 9, 32, 32>}, {pipeline_mode = #tpu.pipeline_mode<synchronous>, transform_indices = @transform_2, window_bounds = array<i64: 1, 32>}, {transform_indices = @transform_3, window_bounds = array<i64: 1, 64, 32>}, {transform_indices = @transform_4, window_bounds = array<i64: 1, 64, 32>}]} {
    %cst = arith.constant 0.000000e+00 : f32
    %0 = vector.broadcast %cst : f32 to vector<64x32xf32>
    %c0 = arith.constant 0 : index
    %c0_0 = arith.constant 0 : index
    %c0_1 = arith.constant 0 : index
    %c0_2 = arith.constant 0 : index
    %1 = vector.load %arg1[%c0, %c0_0, %c0_1, %c0_2] : memref<1x10x10x32xf32, #tpu.memory_space<vmem>>, vector<1x8x8x32xf32>
    %2 = vector.shape_cast %1 : vector<1x8x8x32xf32> to vector<8x8x32xf32>
    %3 = vector.shape_cast %2 : vector<8x8x32xf32> to vector<64x32xf32>
    %4 = arith.truncf %3 : vector<64x32xf32> to vector<64x32xbf16>
    %c0_3 = arith.constant 0 : index
    %c0_4 = arith.constant 0 : index
    %c0_5 = arith.constant 0 : index
    %5 = vector.load %arg2[%c0_3, %c0_4, %c0_5] : memref<9x32x32xbf16, #tpu.memory_space<vmem>>, vector<1x32x32xbf16>
    %6 = vector.shape_cast %5 : vector<1x32x32xbf16> to vector<32x32xbf16>
    %cst_6 = arith.constant dense<0.000000e+00> : vector<64x32xf32>
    %7 = tpu.matmul %4, %6, %cst_6 {dimension_numbers = #tpu.dot_dimension_numbers<[1], [0], [0], [1], [0, 0, 1, 1], [], []>} : vector<64x32xbf16>, vector<32x32xbf16>, vector<64x32xf32> -> vector<64x32xf32>
    %8 = arith.addf %0, %7 : vector<64x32xf32>
    %c0_7 = arith.constant 0 : index
    %c0_8 = arith.constant 0 : index
    %c1 = arith.constant 1 : index
    %c0_9 = arith.constant 0 : index
    %9 = vector.load %arg1[%c0_7, %c0_8, %c1, %c0_9] : memref<1x10x10x32xf32, #tpu.memory_space<vmem>>, vector<1x8x8x32xf32>
    %10 = vector.shape_cast %9 : vector<1x8x8x32xf32> to vector<8x8x32xf32>
    %11 = vector.shape_cast %10 : vector<8x8x32xf32> to vector<64x32xf32>
    %12 = arith.truncf %11 : vector<64x32xf32> to vector<64x32xbf16>
    %c1_10 = arith.constant 1 : index
    %c0_11 = arith.constant 0 : index
    %c0_12 = arith.constant 0 : index
    %13 = vector.load %arg2[%c1_10, %c0_11, %c0_12] : memref<9x32x32xbf16, #tpu.memory_space<vmem>>, vector<1x32x32xbf16>
    %14 = vector.shape_cast %13 : vector<1x32x32xbf16> to vector<32x32xbf16>
    %cst_13 = arith.constant dense<0.000000e+00> : vector<64x32xf32>
    %15 = tpu.matmul %12, %14, %cst_13 {dimension_numbers = #tpu.dot_dimension_numbers<[1], [0], [0], [1], [0, 0, 1, 1], [], []>} : vector<64x32xbf16>, vector<32x32xbf16>, vector<64x32xf32> -> vector<64x32xf32>
    %16 = arith.addf %8, %15 : vector<64x32xf32>
    %c0_14 = arith.constant 0 : index
    %c0_15 = arith.constant 0 : index
    %c2 = arith.constant 2 : index
    %c0_16 = arith.constant 0 : index
    %17 = vector.load %arg1[%c0_14, %c0_15, %c2, %c0_16] : memref<1x10x10x32xf32, #tpu.memory_space<vmem>>, vector<1x8x8x32xf32>
    %18 = vector.shape_cast %17 : vector<1x8x8x32xf32> to vector<8x8x32xf32>
    %19 = vector.shape_cast %18 : vector<8x8x32xf32> to vector<64x32xf32>
    %20 = arith.truncf %19 : vector<64x32xf32> to vector<64x32xbf16>
    %c2_17 = arith.constant 2 : index
    %c0_18 = arith.constant 0 : index
    %c0_19 = arith.constant 0 : index
    %21 = vector.load %arg2[%c2_17, %c0_18, %c0_19] : memref<9x32x32xbf16, #tpu.memory_space<vmem>>, vector<1x32x32xbf16>
    %22 = vector.shape_cast %21 : vector<1x32x32xbf16> to vector<32x32xbf16>
    %cst_20 = arith.constant dense<0.000000e+00> : vector<64x32xf32>
    %23 = tpu.matmul %20, %22, %cst_20 {dimension_numbers = #tpu.dot_dimension_numbers<[1], [0], [0], [1], [0, 0, 1, 1], [], []>} : vector<64x32xbf16>, vector<32x32xbf16>, vector<64x32xf32> -> vector<64x32xf32>
    %24 = arith.addf %16, %23 : vector<64x32xf32>
    %c0_21 = arith.constant 0 : index
    %c1_22 = arith.constant 1 : index
    %c0_23 = arith.constant 0 : index
    %c0_24 = arith.constant 0 : index
    %25 = vector.load %arg1[%c0_21, %c1_22, %c0_23, %c0_24] : memref<1x10x10x32xf32, #tpu.memory_space<vmem>>, vector<1x8x8x32xf32>
    %26 = vector.shape_cast %25 : vector<1x8x8x32xf32> to vector<8x8x32xf32>
    %27 = vector.shape_cast %26 : vector<8x8x32xf32> to vector<64x32xf32>
    %28 = arith.truncf %27 : vector<64x32xf32> to vector<64x32xbf16>
    %c3 = arith.constant 3 : index
    %c0_25 = arith.constant 0 : index
    %c0_26 = arith.constant 0 : index
    %29 = vector.load %arg2[%c3, %c0_25, %c0_26] : memref<9x32x32xbf16, #tpu.memory_space<vmem>>, vector<1x32x32xbf16>
    %30 = vector.shape_cast %29 : vector<1x32x32xbf16> to vector<32x32xbf16>
    %cst_27 = arith.constant dense<0.000000e+00> : vector<64x32xf32>
    %31 = tpu.matmul %28, %30, %cst_27 {dimension_numbers = #tpu.dot_dimension_numbers<[1], [0], [0], [1], [0, 0, 1, 1], [], []>} : vector<64x32xbf16>, vector<32x32xbf16>, vector<64x32xf32> -> vector<64x32xf32>
    %32 = arith.addf %24, %31 : vector<64x32xf32>
    %c0_28 = arith.constant 0 : index
    %c1_29 = arith.constant 1 : index
    %c1_30 = arith.constant 1 : index
    %c0_31 = arith.constant 0 : index
    %33 = vector.load %arg1[%c0_28, %c1_29, %c1_30, %c0_31] : memref<1x10x10x32xf32, #tpu.memory_space<vmem>>, vector<1x8x8x32xf32>
    %34 = vector.shape_cast %33 : vector<1x8x8x32xf32> to vector<8x8x32xf32>
    %35 = vector.shape_cast %34 : vector<8x8x32xf32> to vector<64x32xf32>
    %36 = arith.truncf %35 : vector<64x32xf32> to vector<64x32xbf16>
    %c4 = arith.constant 4 : index
    %c0_32 = arith.constant 0 : index
    %c0_33 = arith.constant 0 : index
    %37 = vector.load %arg2[%c4, %c0_32, %c0_33] : memref<9x32x32xbf16, #tpu.memory_space<vmem>>, vector<1x32x32xbf16>
    %38 = vector.shape_cast %37 : vector<1x32x32xbf16> to vector<32x32xbf16>
    %cst_34 = arith.constant dense<0.000000e+00> : vector<64x32xf32>
    %39 = tpu.matmul %36, %38, %cst_34 {dimension_numbers = #tpu.dot_dimension_numbers<[1], [0], [0], [1], [0, 0, 1, 1], [], []>} : vector<64x32xbf16>, vector<32x32xbf16>, vector<64x32xf32> -> vector<64x32xf32>
    %40 = arith.addf %32, %39 : vector<64x32xf32>
    %c0_35 = arith.constant 0 : index
    %c1_36 = arith.constant 1 : index
    %c2_37 = arith.constant 2 : index
    %c0_38 = arith.constant 0 : index
    %41 = vector.load %arg1[%c0_35, %c1_36, %c2_37, %c0_38] : memref<1x10x10x32xf32, #tpu.memory_space<vmem>>, vector<1x8x8x32xf32>
    %42 = vector.shape_cast %41 : vector<1x8x8x32xf32> to vector<8x8x32xf32>
    %43 = vector.shape_cast %42 : vector<8x8x32xf32> to vector<64x32xf32>
    %44 = arith.truncf %43 : vector<64x32xf32> to vector<64x32xbf16>
    %c5 = arith.constant 5 : index
    %c0_39 = arith.constant 0 : index
    %c0_40 = arith.constant 0 : index
    %45 = vector.load %arg2[%c5, %c0_39, %c0_40] : memref<9x32x32xbf16, #tpu.memory_space<vmem>>, vector<1x32x32xbf16>
    %46 = vector.shape_cast %45 : vector<1x32x32xbf16> to vector<32x32xbf16>
    %cst_41 = arith.constant dense<0.000000e+00> : vector<64x32xf32>
    %47 = tpu.matmul %44, %46, %cst_41 {dimension_numbers = #tpu.dot_dimension_numbers<[1], [0], [0], [1], [0, 0, 1, 1], [], []>} : vector<64x32xbf16>, vector<32x32xbf16>, vector<64x32xf32> -> vector<64x32xf32>
    %48 = arith.addf %40, %47 : vector<64x32xf32>
    %c0_42 = arith.constant 0 : index
    %c2_43 = arith.constant 2 : index
    %c0_44 = arith.constant 0 : index
    %c0_45 = arith.constant 0 : index
    %49 = vector.load %arg1[%c0_42, %c2_43, %c0_44, %c0_45] : memref<1x10x10x32xf32, #tpu.memory_space<vmem>>, vector<1x8x8x32xf32>
    %50 = vector.shape_cast %49 : vector<1x8x8x32xf32> to vector<8x8x32xf32>
    %51 = vector.shape_cast %50 : vector<8x8x32xf32> to vector<64x32xf32>
    %52 = arith.truncf %51 : vector<64x32xf32> to vector<64x32xbf16>
    %c6 = arith.constant 6 : index
    %c0_46 = arith.constant 0 : index
    %c0_47 = arith.constant 0 : index
    %53 = vector.load %arg2[%c6, %c0_46, %c0_47] : memref<9x32x32xbf16, #tpu.memory_space<vmem>>, vector<1x32x32xbf16>
    %54 = vector.shape_cast %53 : vector<1x32x32xbf16> to vector<32x32xbf16>
    %cst_48 = arith.constant dense<0.000000e+00> : vector<64x32xf32>
    %55 = tpu.matmul %52, %54, %cst_48 {dimension_numbers = #tpu.dot_dimension_numbers<[1], [0], [0], [1], [0, 0, 1, 1], [], []>} : vector<64x32xbf16>, vector<32x32xbf16>, vector<64x32xf32> -> vector<64x32xf32>
    %56 = arith.addf %48, %55 : vector<64x32xf32>
    %c0_49 = arith.constant 0 : index
    %c2_50 = arith.constant 2 : index
    %c1_51 = arith.constant 1 : index
    %c0_52 = arith.constant 0 : index
    %57 = vector.load %arg1[%c0_49, %c2_50, %c1_51, %c0_52] : memref<1x10x10x32xf32, #tpu.memory_space<vmem>>, vector<1x8x8x32xf32>
    %58 = vector.shape_cast %57 : vector<1x8x8x32xf32> to vector<8x8x32xf32>
    %59 = vector.shape_cast %58 : vector<8x8x32xf32> to vector<64x32xf32>
    %60 = arith.truncf %59 : vector<64x32xf32> to vector<64x32xbf16>
    %c7 = arith.constant 7 : index
    %c0_53 = arith.constant 0 : index
    %c0_54 = arith.constant 0 : index
    %61 = vector.load %arg2[%c7, %c0_53, %c0_54] : memref<9x32x32xbf16, #tpu.memory_space<vmem>>, vector<1x32x32xbf16>
    %62 = vector.shape_cast %61 : vector<1x32x32xbf16> to vector<32x32xbf16>
    %cst_55 = arith.constant dense<0.000000e+00> : vector<64x32xf32>
    %63 = tpu.matmul %60, %62, %cst_55 {dimension_numbers = #tpu.dot_dimension_numbers<[1], [0], [0], [1], [0, 0, 1, 1], [], []>} : vector<64x32xbf16>, vector<32x32xbf16>, vector<64x32xf32> -> vector<64x32xf32>
    %64 = arith.addf %56, %63 : vector<64x32xf32>
    %c0_56 = arith.constant 0 : index
    %c2_57 = arith.constant 2 : index
    %c2_58 = arith.constant 2 : index
    %c0_59 = arith.constant 0 : index
    %65 = vector.load %arg1[%c0_56, %c2_57, %c2_58, %c0_59] : memref<1x10x10x32xf32, #tpu.memory_space<vmem>>, vector<1x8x8x32xf32>
    %66 = vector.shape_cast %65 : vector<1x8x8x32xf32> to vector<8x8x32xf32>
    %67 = vector.shape_cast %66 : vector<8x8x32xf32> to vector<64x32xf32>
    %68 = arith.truncf %67 : vector<64x32xf32> to vector<64x32xbf16>
    %c8 = arith.constant 8 : index
    %c0_60 = arith.constant 0 : index
    %c0_61 = arith.constant 0 : index
    %69 = vector.load %arg2[%c8, %c0_60, %c0_61] : memref<9x32x32xbf16, #tpu.memory_space<vmem>>, vector<1x32x32xbf16>
    %70 = vector.shape_cast %69 : vector<1x32x32xbf16> to vector<32x32xbf16>
    %cst_62 = arith.constant dense<0.000000e+00> : vector<64x32xf32>
    %71 = tpu.matmul %68, %70, %cst_62 {dimension_numbers = #tpu.dot_dimension_numbers<[1], [0], [0], [1], [0, 0, 1, 1], [], []>} : vector<64x32xbf16>, vector<32x32xbf16>, vector<64x32xf32> -> vector<64x32xf32>
    %72 = arith.addf %64, %71 : vector<64x32xf32>
    %c0_63 = arith.constant 0 : index
    %c0_64 = arith.constant 0 : index
    %73 = vector.load %arg3[%c0_63, %c0_64] : memref<1x32xf32, #tpu.memory_space<vmem>>, vector<1x32xf32>
    %74 = vector.broadcast %73 : vector<1x32xf32> to vector<64x32xf32>
    %75 = arith.addf %72, %74 : vector<64x32xf32>
    %c0_65 = arith.constant 0 : index
    %c0_66 = arith.constant 0 : index
    %c0_67 = arith.constant 0 : index
    %76 = vector.load %arg4[%c0_65, %c0_66, %c0_67] : memref<1x64x32xf32, #tpu.memory_space<vmem>>, vector<1x64x32xf32>
    %77 = vector.shape_cast %76 : vector<1x64x32xf32> to vector<64x32xf32>
    %78 = arith.addf %75, %77 : vector<64x32xf32>
    %c0_68 = arith.constant 0 : index
    %c0_69 = arith.constant 0 : index
    %c0_70 = arith.constant 0 : index
    %79 = vector.load %arg5[%c0_68, %c0_69, %c0_70] : memref<1x64x32xf32, #tpu.memory_space<vmem>>, vector<1x64x32xf32>
    %80 = vector.shape_cast %79 : vector<1x64x32xf32> to vector<64x32xf32>
    %81 = vector.shape_cast %78 : vector<64x32xf32> to vector<1x64x32xf32>
    tpu.vector_store %arg5[%c0_68, %c0_69, %c0_70], %81 {strides = array<i32>} : memref<1x64x32xf32, #tpu.memory_space<vmem>>, vector<1x64x32xf32>,
    return
  }
  func.func @transform_0(%arg0: i32) -> (i32, i32, i32, i32) {
    %c0_i32 = arith.constant 0 : i32
    %c0_i32_0 = arith.constant 0 : i32
    %c0_i32_1 = arith.constant 0 : i32
    %c0_i32_2 = arith.constant 0 : i32
    return %arg0, %c0_i32, %c0_i32_0, %c0_i32_1 : i32, i32, i32, i32
  }
  func.func @transform_1(%arg0: i32) -> (i32, i32, i32) {
    %c0_i32 = arith.constant 0 : i32
    %c0_i32_0 = arith.constant 0 : i32
    %c0_i32_1 = arith.constant 0 : i32
    %c0_i32_2 = arith.constant 0 : i32
    return %c0_i32, %c0_i32_0, %c0_i32_1 : i32, i32, i32
  }
  func.func @transform_2(%arg0: i32) -> (i32, i32) {
    %c0_i32 = arith.constant 0 : i32
    %c0_i32_0 = arith.constant 0 : i32
    %c0_i32_1 = arith.constant 0 : i32
    return %c0_i32, %c0_i32_0 : i32, i32
  }
  func.func @transform_3(%arg0: i32) -> (i32, i32, i32) {
    %c0_i32 = arith.constant 0 : i32
    %c0_i32_0 = arith.constant 0 : i32
    %c0_i32_1 = arith.constant 0 : i32
    return %arg0, %c0_i32, %c0_i32_0 : i32, i32, i32
  }
  func.func @transform_4(%arg0: i32) -> (i32, i32, i32) {
    %c0_i32 = arith.constant 0 : i32
    %c0_i32_0 = arith.constant 0 : i32
    %c0_i32_1 = arith.constant 0 : i32
    return %arg0, %c0_i32, %c0_i32_0 : i32, i32, i32
  }
}

</mosaic_0001>

<bundles_post_ra>
// kernel: encoder_layer_forward.7
= control target key start
LH: loop header
LB: loop body
LE: loop exit
PB: predicated region body
PF: predicated region fallthrough
CT: control target
= control target key end

     0   :  { %vm190_vm0 = vcmask 261120   ;;  %s506_s1 = inlined_call_operand.vmem [shape: bf16[128,32], index: 1, kind: input, shape index: {}]   ;;  %s507_s2 = inlined_call_operand.vmem [shape: f32[1,32], index: 2, kind: input, shape index: {}]   ;;  %s508_s0 = inlined_call_operand.vmem [shape: f32[128,128], index: 0, kind: input, shape index: {}]   ;;  %s509_s3 = inlined_call_operand.vmem [shape: f32[128,32], index: 3, kind: input, shape index: {}]   ;;  %s510_s4 = inlined_call_operand.vmem [shape: f32[128,32], index: 4, kind: output, shape index: {}]  }
   0x1   :  { %v250_v0 = vld [vmem:[%s506_s1 + $0x38] sm:$0xff]  ;;  %v249_v1 = vld [vmem:[%s506_s1 + $0x30] sm:$0xff]  ;;  %v248_v2 = vld [vmem:[%s506_s1 + $0x28] sm:$0xff] }
   0x2   :  { %109 = vmatpush.bf16.msra.mxu0 %v250_v0  ;;  %251 = vmatpush.bf16.msra.mxu1 %v250_v0  ;;  %v247_v3 = vld [vmem:[%s506_s1 + $0x20] sm:$0xff]  ;;  %v246_v4 = vld [vmem:[%s506_s1 + $0x18] sm:$0xff]  ;;  %v245_v5 = vld [vmem:[%s506_s1 + $0x10] sm:$0xff] }
   0x3   :  { %252 = vmatpush.bf16.msra.mxu2 %v250_v0  ;;  %253 = vmatpush.bf16.msra.mxu3 %v250_v0  ;;  %v244_v6 = vld [vmem:[%s506_s1 + $0x8] sm:$0xff]  ;;  %v243_v7 = vld [vmem:[%s506_s1] sm:$0xff]  ;;  %v19_v20 = vld [vmem:[%s508_s0 + $0x10] sm:$0xff] }
   0x4   :  { %v17_v8 = vld [vmem:[%s508_s0] sm:$0xff]  ;;  %v18_v9 = vld [vmem:[%s508_s0 + $0x8] sm:$0xff]  ;;  %v20_v21 = vld [vmem:[%s508_s0 + $0x18] sm:$0xff] }
   0x5   :  { %v21_v10 = vld [vmem:[%s508_s0 + $0x20] sm:$0xff]  ;;  %v22_v11 = vld [vmem:[%s508_s0 + $0x28] sm:$0xff]  ;;  %v33_v16 = vpack.c.bf16 %v18_v9, %v17_v8  ;;  %v23_v22 = vld [vmem:[%s508_s0 + $0x30] sm:$0xff]  ;;  %v34_v28 = vpack.c.bf16 %v20_v21, %v19_v20 }
   0x6   :  { %110 = vmatpush.bf16.msra.mxu0 %v249_v1  ;;  %254 = vmatpush.bf16.msra.mxu1 %v249_v1  ;;  %v25_v12 = vld [vmem:[%s508_s0 + $0x40] sm:$0xff]  ;;  %v26_v13 = vld [vmem:[%s508_s0 + $0x48] sm:$0xff]  ;;  %v35_v17 = vpack.c.bf16 %v22_v11, %v21_v10  ;;  %v24_v23 = vld [vmem:[%s508_s0 + $0x38] sm:$0xff] }
   0x7   :  { %255 = vmatpush.bf16.msra.mxu2 %v249_v1  ;;  %256 = vmatpush.bf16.msra.mxu3 %v249_v1  ;;  %v29_v14 = vld [vmem:[%s508_s0 + $0x60] sm:$0xff]  ;;  %v30_v15 = vld [vmem:[%s508_s0 + $0x68] sm:$0xff]  ;;  %v37_v18 = vpack.c.bf16 %v26_v13, %v25_v12  ;;  %v27_v24 = vld [vmem:[%s508_s0 + $0x50] sm:$0xff]  ;;  %v36_v29 = vpack.c.bf16 %v24_v23, %v23_v22 }
   0x8   :  { %v39_v19 = vpack.c.bf16 %v30_v15, %v29_v14  ;;  %v28_v25 = vld [vmem:[%s508_s0 + $0x58] sm:$0xff]  ;;  %v31_v26 = vld [vmem:[%s508_s0 + $0x70] sm:$0xff]  ;;  %v376_v32 = vld [vmem:[%s507_s2] ss:$0 sm:$0xff] }
   0x9   :  { %v32_v27 = vld [vmem:[%s508_s0 + $0x78] sm:$0xff]  ;;  %v38_v30 = vpack.c.bf16 %v28_v25, %v27_v24  ;;  %v158_v34 = vld [vmem:[%s509_s3] sm:$0xff]  ;;  %v159_v48 = vld [vmem:[%s509_s3 + $0x8] sm:$0xff] }
   0xa   :  { %111 = vmatpush.bf16.msra.mxu0 %v248_v2  ;;  %257 = vmatpush.bf16.msra.mxu1 %v248_v2  ;;  %v40_v31 = vpack.c.bf16 %v32_v27, %v31_v26  ;;  %v162_v36 = vld [vmem:[%s509_s3 + $0x20] sm:$0xff]  ;;  %v163_v50 = vld [vmem:[%s509_s3 + $0x28] sm:$0xff]  ;;  %v160_v0 = vld [vmem:[%s509_s3 + $0x10] sm:$0xff] }
   0xb   :  { %258 = vmatpush.bf16.msra.mxu2 %v248_v2  ;;  %259 = vmatpush.bf16.msra.mxu3 %v248_v2  ;;  %v166_v42 = vld [vmem:[%s509_s3 + $0x40] sm:$0xff]  ;;  %v167_v58 = vld [vmem:[%s509_s3 + $0x48] sm:$0xff]  ;;  %v164_v2 = vld [vmem:[%s509_s3 + $0x30] sm:$0xff] }
   0xc   :  { %v170_v44 = vld [vmem:[%s509_s3 + $0x60] sm:$0xff]  ;;  %v171_v60 = vld [vmem:[%s509_s3 + $0x68] sm:$0xff]  ;;  %v168_v10 = vld [vmem:[%s509_s3 + $0x50] sm:$0xff] }
   0xd   :  { %v172_v12 = vld [vmem:[%s509_s3 + $0x70] sm:$0xff]  ;;  %v169_v26 = vld [vmem:[%s509_s3 + $0x58] sm:$0xff] }
   0xe   :  { %112 = vmatpush.bf16.msra.mxu0 %v247_v3  ;;  %260 = vmatpush.bf16.msra.mxu1 %v247_v3 }
   0xf   :  { %261 = vmatpush.bf16.msra.mxu2 %v247_v3  ;;  %262 = vmatpush.bf16.msra.mxu3 %v247_v3 }
  0x12   :  { %113 = vmatpush.bf16.msra.mxu0 %v246_v4  ;;  %263 = vmatpush.bf16.msra.mxu1 %v246_v4 }
  0x13   :  { %264 = vmatpush.bf16.msra.mxu2 %v246_v4  ;;  %265 = vmatpush.bf16.msra.mxu3 %v246_v4 }
  0x16   :  { %114 = vmatpush.bf16.msra.mxu0 %v245_v5  ;;  %266 = vmatpush.bf16.msra.mxu1 %v245_v5 }
  0x17   :  { %267 = vmatpush.bf16.msra.mxu2 %v245_v5  ;;  %268 = vmatpush.bf16.msra.mxu3 %v245_v5 }
  0x1a   :  { %115 = vmatpush.bf16.msra.mxu0 %v244_v6  ;;  %269 = vmatpush.bf16.msra.mxu1 %v244_v6 }
  0x1b   :  { %270 = vmatpush.bf16.msra.mxu2 %v244_v6  ;;  %271 = vmatpush.bf16.msra.mxu3 %v244_v6 }
  0x1e   :  { %116 = vmatpush.bf16.msra.mxu0 %v243_v7  ;;  %272 = vmatpush.bf16.msra.mxu1 %v243_v7 }
  0x1f   :  { %273 = vmatpush.bf16.msra.mxu2 %v243_v7  ;;  %274 = vmatpush.bf16.msra.mxu3 %v243_v7 }
  0x21   :  { %117 = vmatmul.bf16.vlgmr.msra.gmra.mxu0 %v33_v16  ;;  %127 = vmatmul.bf16.vlgmr.msra.gmra.mxu1 %v35_v17  ;;  %v161_v16 = vld [vmem:[%s509_s3 + $0x18] sm:$0xff] }
  0x22   :  { %137 = vmatmul.bf16.vlgmr.msra.gmra.mxu2 %v37_v18  ;;  %147 = vmatmul.bf16.vlgmr.msra.gmra.mxu3 %v39_v19  ;;  %v165_v18 = vld [vmem:[%s509_s3 + $0x38] sm:$0xff] }
  0x31   :  { %122 = vmatmul.bf16.gmra.mxu0 %v34_v28  ;;  %132 = vmatmul.bf16.gmra.mxu1 %v36_v29  ;;  %v173_v28 = vld [vmem:[%s509_s3 + $0x78] sm:$0xff] }
  0x32   :  { %142 = vmatmul.bf16.gmra.mxu2 %v38_v30  ;;  %152 = vmatmul.bf16.gmra.mxu3 %v40_v31 }
  0x9e   :  { %v118_v33 = vpop.f32.mrf.mxu0  ;;  %v128_v35 = vpop.f32.mrf.mxu1 }
  0x9f   :  { %v119_v37 = vadd.f32 %v376_v32, %v118_v33  ;;  %v129_v38 = vadd.f32 %v376_v32, %v128_v35 }
  0xa1   :  { %v174_v39 = vadd.f32 %v158_v34, %v119_v37  ;;  %v178_v40 = vadd.f32 %v162_v36, %v129_v38 }
  0xa3   :  { %191 = vst.msk [vmem:[%s510_s4] sm:$0xff] %vm190_vm0, %v174_v39 }
  0xa4   :  { %195 = vst.msk [vmem:[%s510_s4 + $0x20] sm:$0xff] %vm190_vm0, %v178_v40 }
  0xa5   :  { %v138_v41 = vpop.f32.mrf.mxu2  ;;  %v148_v43 = vpop.f32.mrf.mxu3 }
  0xa6   :  { %v139_v45 = vadd.f32 %v376_v32, %v138_v41  ;;  %v149_v46 = vadd.f32 %v376_v32, %v148_v43  ;;  %v120_v47 = vpop.f32.mrf.mxu0  ;;  %v130_v49 = vpop.f32.mrf.mxu1 }
  0xa7   :  { %v121_v51 = vadd.f32 %v376_v32, %v120_v47  ;;  %v131_v52 = vadd.f32 %v376_v32, %v130_v49 }
  0xa8   :  { %v182_v53 = vadd.f32 %v166_v42, %v139_v45  ;;  %v186_v54 = vadd.f32 %v170_v44, %v149_v46 }
  0xa9   :  { %v175_v55 = vadd.f32 %v159_v48, %v121_v51  ;;  %v179_v56 = vadd.f32 %v163_v50, %v131_v52 }
  0xaa   :  { %199 = vst.msk [vmem:[%s510_s4 + $0x40] sm:$0xff] %vm190_vm0, %v182_v53 }
  0xab   :  { %203 = vst.msk [vmem:[%s510_s4 + $0x60] sm:$0xff] %vm190_vm0, %v186_v54 }
  0xac   :  { %192 = vst.msk [vmem:[%s510_s4 + $0x8] sm:$0xff] %vm190_vm0, %v175_v55 }
  0xad   :  { %196 = vst.msk [vmem:[%s510_s4 + $0x28] sm:$0xff] %vm190_vm0, %v179_v56  ;;  %v140_v57 = vpop.f32.mrf.mxu2  ;;  %v150_v59 = vpop.f32.mrf.mxu3 }
  0xae   :  { %v141_v61 = vadd.f32 %v376_v32, %v140_v57  ;;  %v151_v62 = vadd.f32 %v376_v32, %v150_v59  ;;  %v123_v63 = vpop.f32.mrf.mxu0  ;;  %v133_v1 = vpop.f32.mrf.mxu1 }
  0xaf   :  { %v124_v3 = vadd.f32 %v376_v32, %v123_v63  ;;  %v134_v4 = vadd.f32 %v376_v32, %v133_v1 }
  0xb0   :  { %v183_v5 = vadd.f32 %v167_v58, %v141_v61  ;;  %v187_v6 = vadd.f32 %v171_v60, %v151_v62 }
  0xb1   :  { %v176_v7 = vadd.f32 %v160_v0, %v124_v3  ;;  %v180_v8 = vadd.f32 %v164_v2, %v134_v4 }
  0xb2   :  { %200 = vst.msk [vmem:[%s510_s4 + $0x48] sm:$0xff] %vm190_vm0, %v183_v5 }
  0xb3   :  { %204 = vst.msk [vmem:[%s510_s4 + $0x68] sm:$0xff] %vm190_vm0, %v187_v6 }
  0xb4   :  { %193 = vst.msk [vmem:[%s510_s4 + $0x10] sm:$0xff] %vm190_vm0, %v176_v7 }
  0xb5   :  { %197 = vst.msk [vmem:[%s510_s4 + $0x30] sm:$0xff] %vm190_vm0, %v180_v8  ;;  %v143_v9 = vpop.f32.mrf.mxu2  ;;  %v153_v11 = vpop.f32.mrf.mxu3 }
  0xb6   :  { %v144_v13 = vadd.f32 %v376_v32, %v143_v9  ;;  %v154_v14 = vadd.f32 %v376_v32, %v153_v11  ;;  %v125_v15 = vpop.f32.mrf.mxu0  ;;  %v135_v17 = vpop.f32.mrf.mxu1 }
  0xb7   :  { %v126_v19 = vadd.f32 %v376_v32, %v125_v15  ;;  %v136_v20 = vadd.f32 %v376_v32, %v135_v17 }
  0xb8   :  { %v184_v21 = vadd.f32 %v168_v10, %v144_v13  ;;  %v188_v22 = vadd.f32 %v172_v12, %v154_v14 }
  0xb9   :  { %v177_v23 = vadd.f32 %v161_v16, %v126_v19  ;;  %v181_v24 = vadd.f32 %v165_v18, %v136_v20 }
  0xba   :  { %201 = vst.msk [vmem:[%s510_s4 + $0x50] sm:$0xff] %vm190_vm0, %v184_v21 }
  0xbb   :  { %205 = vst.msk [vmem:[%s510_s4 + $0x70] sm:$0xff] %vm190_vm0, %v188_v22 }
  0xbc   :  { %194 = vst.msk [vmem:[%s510_s4 + $0x18] sm:$0xff] %vm190_vm0, %v177_v23 }
  0xbd   :  { %198 = vst.msk [vmem:[%s510_s4 + $0x38] sm:$0xff] %vm190_vm0, %v181_v24  ;;  %v145_v25 = vpop.f32.mrf.mxu2  ;;  %v155_v27 = vpop.f32.mrf.mxu3 }
  0xbe   :  { %v146_v29 = vadd.f32 %v376_v32, %v145_v25  ;;  %v156_v30 = vadd.f32 %v376_v32, %v155_v27 }
  0xc0   :  { %v185_v31 = vadd.f32 %v169_v26, %v146_v29  ;;  %v189_v33 = vadd.f32 %v173_v28, %v156_v30 }
  0xc2   :  { %202 = vst.msk [vmem:[%s510_s4 + $0x58] sm:$0xff] %vm190_vm0, %v185_v31 }
  0xc3   :  { %206 = vst.msk [vmem:[%s510_s4 + $0x78] sm:$0xff] %vm190_vm0, %v189_v33 }

// kernel: encoder_layer_forward.6
= control target key start
LH: loop header
LB: loop body
LE: loop exit
PB: predicated region body
PF: predicated region fallthrough
CT: control target
= control target key end

     0   :  { %8 = vsyncpa [#allocation3], 0  ;;  %s2425_s0 = inlined_call_operand.vmem [shape: bf16[2,64,256], index: 0, kind: input, shape index: {}]   ;;  %s2426_s1 = inlined_call_operand.vmem [shape: f32[2,64,128], index: 1, kind: output, shape index: {0}]   ;;  %s2427_s2 = inlined_call_operand.hbm [shape: f32[2,4,64,64], index: 2, kind: output, shape index: {1}]  }
   0x1   :  { %10 = vsyncpa [#allocation3 + $0x1], 0  ;;  %s1695_s9 = smov 0   ;;  %s1697_s10 = smov 0  }
   0x2   :  { %s1699_s11 = smov 0   ;;  %s1701_s12 = smov 0  }
   0x3 LB: > { %s1716_s13 = sadd.s32 4294967295, %s1667_s12   ;;  %s1314_s14 = sadd.s32 4294967294, %s1667_s12   ;;  %s1667_s12 = sphi %s1701_s12, %s2433_s12   ;;  %s1663_s11 = sphi %s1699_s11, %s2432_s11   ;;  %s1659_s10 = sphi %s1697_s10, %s2431_s10   ;;  %s1655_s9 = sphi %s1695_s9, %s2430_s9  }
   0x4   : > { %s1720_s15 = sadd.s32 1, %s1667_s12   ;;  %s75_s16 = sadd.s32 1, %s1663_s11 }
   0x5   : > { %s72_s17 = ssub.s32 %s1667_s12, %s1720_s15  ;;  %p85_p0 = scmp.ne.s32.totalorder %s1663_s11, %s1659_s10 }
   0x6   : > { %p73_p1 = scmp.eq.s32.totalorder %s72_s17, 0  ;;  %p86_p2 = scmp.eq.s32.totalorder %s1716_s13, 1 }
   0x7   : > { %p91_p3 = scmp.ne.s32.totalorder %s1659_s10, %s1655_s9  ;;  %p92_p4 = scmp.eq.s32.totalorder %s1314_s14, 1 }
   0x8   : > { %s1731_s18 = scalar_select %p73_p1, %s1663_s11, %s75_s16  }
   0x9   : > { %p1733_p5 = por %p86_p2, %p85_p0  ;;  %p1737_p6 = por %p92_p4, %p91_p3 }
   0xa   : > { %p1317_p7 = scmp.ge.s32.totalorder %s1667_s12, 1  ;;  %p118_p8 = scmp.lt.s32.totalorder %s1667_s12, 3 }
   0xc   : > { %p119_p9 = pnand %p1317_p7, %p118_p8 }
   0xd   : > { %p145_p10 = scmp.lt.s32.totalorder (!%p119_p9), %s1716_s13, 1  ;;  %s1669_s26 = smov (!%p119_p9), 96  }
   0xe   : > { %122 = sbr.rel (%p119_p9) target bundleno = 1536 (0x600), region = 24  ;;  %s1670_s27 = smov (!%p119_p9), 88  }
   0xf   : > { %s1671_s28 = smov (!%p119_p9), 64   ;;  %s1672_s29 = smov (!%p119_p9), 120  }
  0x10   : > { %s1673_s30 = smov (!%p119_p9), 72   ;;  %s1674_s3 = smov (!%p119_p9), 80  }
  0x11   : > { %s1675_s4 = smov (!%p119_p9), 112   ;;  %s1676_s5 = smov (!%p119_p9), 104  }
  0x12   : > { %s142_s6 = sand.u32 (!%p119_p9), 1, %s1659_s10   ;;  %s1677_s14 = smov (!%p119_p9), 32  }
  0x13   : > { %s1745_s21 = scalar_select %p145_p10, %s1716_s13, 1  ;;  %vm192_vm0 = vcmask 64512   ;;  %vm246_vm1 = vcmask 523264  }
  0x14   : > { %s1318_s7 = sshll.u32 %s142_s6, 8  ;;  %s1426_s16 = sshll.u32 %s1716_s13, 8 }
  0x15   : > { %s1416_s22 = sshll.u32 %s1745_s21, 6  ;;  %s1917_s8 = scalar_lea.vmem [#allocation2], %s1318_s7 }
  0x16   : > { %s1753_s25 = scalar_lea.vmem %s2425_s0, %s1416_s22  ;;  %s1223_s24 = scalar_lea.hbm %s2427_s2, %s1426_s16 }
  0x17   : > { %v1337_v0 = vld [vmem:[%s1753_s25 + $0x30] sm:$0xf]  ;;  %v1425_v1 = vld [vmem:[%s1753_s25 + $0x34] sm:$0xf0]  ;;  %v1333_v6 = vld [vmem:[%s1753_s25 + $0x20] sm:$0xf] }
  0x18   : > { %v1757_v2 = vor.u32 %v1425_v1, %v1337_v0  ;;  %v1329_v3 = vld [vmem:[%s1753_s25 + $0x10] sm:$0xf]  ;;  %v1421_v4 = vld [vmem:[%s1753_s25 + $0x14] sm:$0xf0]  ;;  %v1423_v7 = vld [vmem:[%s1753_s25 + $0x24] sm:$0xf0] }
  0x19   : > { %v1761_v5 = vor.u32 %v1421_v4, %v1329_v3  ;;  %v1325_v8 = vld [vmem:[%s1753_s25] sm:$0xf]  ;;  %v1419_v9 = vld [vmem:[%s1753_s25 + $0x4] sm:$0xf0]  ;;  %v1771_v10 = vor.u32 %v1423_v7, %v1333_v6 }
  0x1a   : > { %190 = vrot.lane.b32.xlu0 %v1757_v2, %s1669_s26  ;;  %v1773_v11 = vor.u32 %v1419_v9, %v1325_v8  ;;  %414 = vrot.lane.b32.xlu2 %v1757_v2, %s1670_s27 }
  0x1b   : > { %186 = vrot.lane.b32.xlu1 %v1761_v5, %s1669_s26 }
  0x22   : > { %188 = vrot.lane.b32.xlu0 %v1771_v10, %s1669_s26  ;;  %408 = vrot.lane.b32.xlu2 %v1773_v11, %s1670_s27 }
  0x23   : > { %184 = vrot.lane.b32.xlu1 %v1773_v11, %s1669_s26 }
  0x2a   : > { %410 = vrot.lane.b32.xlu0 %v1761_v5, %s1670_s27  ;;  %347 = vrot.lane.b32.xlu2 %v1773_v11, %s1671_s28 }
  0x2b   : > { %412 = vrot.lane.b32.xlu1 %v1771_v10, %s1670_s27  ;;  %s1226_s27 = sshll.u32 %s1223_s24, 4  ;;  %s1227_s27 = int_to_ptr.hbm [resolvable:$true] %s1226_s27 }
  0x32   : > { %353 = vrot.lane.b32.xlu0 %v1757_v2, %s1671_s28  ;;  %402 = vrot.lane.b32.xlu2 %v1761_v5, %s1672_s29 }
  0x33   : > { %351 = vrot.lane.b32.xlu1 %v1771_v10, %s1671_s28 }
  0x3a   : > { %349 = vrot.lane.b32.xlu0 %v1761_v5, %s1671_s28  ;;  %862 = vrot.lane.b32.xlu2 %v1771_v10, %s1673_s30 }
  0x3b   : > { %400 = vrot.lane.b32.xlu1 %v1773_v11, %s1672_s29 }
  0x42   : > { %637 = vrot.lane.b32.xlu0 %v1757_v2, %s1674_s3  ;;  %631 = vrot.lane.b32.xlu2 %v1773_v11, %s1674_s3 }
  0x43   : > { %404 = vrot.lane.b32.xlu1 %v1771_v10, %s1672_s29 }
  0x4a   : > { %623 = vrot.lane.b32.xlu2 %v1773_v11, %s1675_s4 }
  0x4b   : > { %864 = vrot.lane.b32.xlu1 %v1757_v2, %s1673_s30 }
  0x53   : > { %635 = vrot.lane.b32.xlu1 %v1771_v10, %s1674_s3 }
  0x5b   : > { %406 = vrot.lane.b32.xlu1 %v1757_v2, %s1672_s29  ;;  %s1209_s29 = scalar_lea.sflag [#allocation3], %s142_s6 }
  0x63   : > { %633 = vrot.lane.b32.xlu1 %v1761_v5, %s1674_s3 }
  0x6b   : > { %860 = vrot.lane.b32.xlu1 %v1761_v5, %s1673_s30 }
  0x73   : > { %858 = vrot.lane.b32.xlu1 %v1773_v11, %s1673_s30  ;;  %s1619_s30 = sshra.s32 %s1227_s27, 4  ;;  %s1620_s30 = int_to_ptr.hbm [resolvable:$true] %s1619_s30 }
  0x74   : > { %v415_v20 = vpop.permute.xlu2 %414  ;;  %s1621_s3 = scalar_lea.hbm %s1620_s30, 256  ;;  %p1626_p0 = scmp.lt.s32.totalorder %s1620_s30, %s2427_s2 }
  0x75   : > { %v438_v21 = vsel %vm192_vm0, %v415_v20, 0  ;;  %p1622_p11 = scmp.ne.s32.totalorder %s1620_s30, %s1621_s3 }
  0x76   : > { %444 = vmatpush.bf16.xpose.msra.mxu2 %v438_v21 }
  0x77   : > { %p1623_p12 = pnand %p1622_p11, %p1733_p5 }
  0x79   : > { %p1624_p13 = pneg %p1623_p12 }
  0x7c   : > { %v409_v27 = vpop.permute.xlu2 %408 }
  0x7d   : > { %v429_v29 = vsel %vm192_vm0, %v409_v27, 0 }
  0x84   : > { %v348_v33 = vpop.permute.xlu2 %347 }
  0x8c   : > { %v191_v12 = vpop.permute.xlu0 %190  ;;  %v403_v38 = vpop.permute.xlu2 %402 }
  0x8d   : > { %v215_v13 = vsel %vm192_vm0, %v191_v12, 0  ;;  %v187_v16 = vpop.permute.xlu1 %186 }
  0x8e   : > { %221 = vmatpush.bf16.xpose.msra.mxu0 %v215_v13  ;;  %v209_v17 = vsel %vm192_vm0, %v187_v16, 0 }
  0x94   : > { %v189_v14 = vpop.permute.xlu0 %188  ;;  %v863_v48 = vpop.permute.xlu2 %862 }
  0x95   : > { %v212_v15 = vsel %vm192_vm0, %v189_v14, 0  ;;  %v185_v18 = vpop.permute.xlu1 %184  ;;  %v885_v50 = vsel %vm192_vm0, %v863_v48, 0 }
  0x96   : > { %222 = vmatpush.bf16.xpose.msra.mxu0 %v212_v15  ;;  %v206_v19 = vsel %vm192_vm0, %v185_v18, 0 }
  0x9c   : > { %v411_v24 = vpop.permute.xlu0 %410  ;;  %v632_v54 = vpop.permute.xlu2 %631 }
  0x9d   : > { %v413_v22 = vpop.permute.xlu1 %412  ;;  %v432_v26 = vsel %vm192_vm0, %v411_v24, 0  ;;  %v652_v55 = vsel %vm192_vm0, %v632_v54, 0 }
  0x9e   : > { %223 = vmatpush.bf16.xpose.msra.mxu0 %v209_v17  ;;  %v435_v23 = vsel %vm192_vm0, %v413_v22, 0 }
  0x9f   : > { %445 = vmatpush.bf16.xpose.msra.mxu2 %v435_v23 }
  0xa4   : > { %v354_v30 = vpop.permute.xlu0 %353  ;;  %v1845_v0 = vpop.permute.xlu2 %623 }
  0xa5   : > { %v352_v25 = vpop.permute.xlu1 %351  ;;  %375 = vmatpush.bf16.msra.mxu1 %v354_v30 }
  0xa6   : > { %224 = vmatpush.bf16.xpose.msra.mxu0 %v206_v19 }
  0xa7   : > { %446 = vmatpush.bf16.xpose.msra.mxu2 %v432_v26 }
  0xa9   : > { %376 = vmatpush.bf16.msra.mxu1 %v352_v25 }
  0xac   : > { %v350_v32 = vpop.permute.xlu0 %349 }
  0xad   : > { %1339 = vmatmul.msk.bf16.vlgmr.msra.gmra.mxu0 %vm192_vm0, %v1773_v11  ;;  %v401_v28 = vpop.permute.xlu1 %400  ;;  %377 = vmatpush.bf16.msra.mxu1 %v350_v32 }
  0xaf   : > { %447 = vmatpush.bf16.xpose.msra.mxu2 %v429_v29 }
  0xb1   : > { %378 = vmatpush.bf16.msra.mxu1 %v348_v33 }
  0xb4   : > { %v638_v37 = vpop.permute.xlu0 %637 }
  0xb5   : > { %v405_v31 = vpop.permute.xlu1 %404  ;;  %v661_v40 = vsel %vm192_vm0, %v638_v37, 0 }
  0xb6   : > { %1347 = vmatmul.msk.bf16.vlgmr.msra.gmra.mxu2 %vm192_vm0, %v401_v28  ;;  %667 = vmatpush.bf16.xpose.msrb.mxu1 %v661_v40 }
  0xbd   : > { %1340 = vmatmul.msk.bf16.gmra.mxu0 %vm192_vm0, %v1761_v5  ;;  %v865_v34 = vpop.permute.xlu1 %864 }
  0xbe   : > { %v888_v44 = vsel %vm192_vm0, %v865_v34, 0 }
  0xbf   : > { %894 = vmatpush.bf16.xpose.msrb.mxu0 %v888_v44 }
  0xc5   : > { %v636_v39 = vpop.permute.xlu1 %635 }
  0xc6   : > { %1348 = vmatmul.msk.bf16.gmra.mxu2 %vm192_vm0, %v403_v38  ;;  %v658_v43 = vsel %vm192_vm0, %v636_v39, 0 }
  0xc7   : > { %668 = vmatpush.bf16.xpose.msrb.mxu1 %v658_v43  ;;  %895 = vmatpush.bf16.xpose.msrb.mxu0 %v885_v50 }
  0xcd   : > { %1341 = vmatmul.msk.bf16.gmra.mxu0 %vm192_vm0, %v1771_v10  ;;  %v407_v45 = vpop.permute.xlu1 %406 }
  0xd5   : > { %v634_v49 = vpop.permute.xlu1 %633 }
  0xd6   : > { %1349 = vmatmul.msk.bf16.gmra.mxu2 %vm192_vm0, %v405_v31  ;;  %v655_v51 = vsel %vm192_vm0, %v634_v49, 0 }
  0xd7   : > { %669 = vmatpush.bf16.xpose.msrb.mxu1 %v655_v51 }
  0xdd   : > { %1342 = vmatmul.msk.bf16.gmra.mxu0 %vm192_vm0, %v1757_v2  ;;  %v861_v6 = vpop.permute.xlu1 %860 }
  0xde   : > { %v882_v7 = vsel %vm192_vm0, %v861_v6, 0 }
  0xdf   : > { %670 = vmatpush.bf16.xpose.msrb.mxu1 %v652_v55  ;;  %896 = vmatpush.bf16.xpose.msrb.mxu0 %v882_v7 }
  0xe5   : > { %v859_v15 = vpop.permute.xlu1 %858 }
  0xe6   : > { %1350 = vmatmul.msk.bf16.gmra.mxu2 %vm192_vm0, %v407_v45  ;;  %v879_v16 = vsel %vm192_vm0, %v859_v15, 0 }
  0xe7   : > { %897 = vmatpush.bf16.xpose.msrb.mxu0 %v879_v16 }
 0x12a   : > { %v226_v35 = vpop.f32.mrf.mxu0 }
 0x12b   : > { %v247_v36 = vsel %vm246_vm1, %v226_v35, -inf }
 0x12c   : > { %248 = vmax.xlane.f32.xlu2 %v247_v36 }
 0x132   : > { %v228_v41 = vpop.f32.mrf.mxu0 }
 0x133   : > { %v250_v42 = vsel %vm246_vm1, %v228_v41, -inf }
 0x134   : > { %251 = vmax.xlane.f32.xlu2 %v250_v42 }
 0x139   : > { %v1881_v39 = vpop.f32.mrf.mxu2 }
 0x13a   : > { %v231_v46 = vpop.f32.mrf.mxu0  ;;  %v469_v15 = vsel %vm246_vm1, %v1881_v39, -inf }
 0x13b   : > { %v253_v47 = vsel %vm246_vm1, %v231_v46, -inf }
 0x13c   : > { %254 = vmax.xlane.f32.xlu0 %v253_v47 }
 0x141   : > { %v1885_v40 = vpop.f32.mrf.mxu2 }
 0x142   : > { %v233_v52 = vpop.f32.mrf.mxu0 }
 0x143   : > { %v256_v53 = vsel %vm246_vm1, %v233_v52, -inf }
 0x144   : > { %257 = vmax.xlane.f32.xlu1 %v256_v53 }
 0x149   : > { %v1888_v44 = vpop.f32.mrf.mxu2 }
 0x14a   : > { %v236_v56 = vpop.f32.mrf.mxu0  ;;  %v475_v54 = vsel %vm246_vm1, %v1888_v44, -inf }
 0x14b   : > { %v259_v57 = vsel %vm246_vm1, %v236_v56, -inf }
 0x14c   : > { %260 = vmax.xlane.f32.xlu2 %v259_v57 }
 0x151   : > { %v1891_v48 = vpop.f32.mrf.mxu2 }
 0x152   : > { %v238_v58 = vpop.f32.mrf.mxu0 }
 0x153   : > { %v262_v59 = vsel %vm246_vm1, %v238_v58, -inf }
 0x154   : > { %263 = vmax.xlane.f32.xlu0 %v262_v59 }
 0x15a   : > { %v1837_v60 = vpop.f32.mrf.mxu0 }
 0x15b   : > { %v265_v61 = vsel %vm246_vm1, %v1837_v60, -inf }
 0x15c   : > { %266 = vmax.xlane.f32.xlu2 %v265_v61 }
 0x162   : > { %v1841_v62 = vpop.f32.mrf.mxu0 }
 0x163   : > { %v268_v63 = vsel %vm246_vm1, %v1841_v62, -inf }
 0x164   : > { %269 = vmax.xlane.f32.xlu1 %v268_v63 }
 0x19f   : > { %v249_v1 = vpop.xlane.xlu2 %248 }
 0x1a0   : > { %v271_v3 = vsub.f32 %v226_v35, %v249_v1 }
 0x1a2   : > { %v279_v4 = vmul.f32 1.442695, %v271_v3 }
 0x1a4   : > { %1477 = vpow2.f32 %v279_v4 }
 0x1a7   : > { %v252_v8 = vpop.xlane.xlu2 %251 }
 0x1a8   : > { %v272_v9 = vsub.f32 %v228_v41, %v252_v8 }
 0x1aa   : > { %v1848_v12 = vpop.eup %1477  ;;  %v281_v13 = vmul.f32 1.442695, %v272_v9 }
 0x1ab   : > { %v295_v14 = vsel %vm246_vm1, %v1848_v12, 0.0 }
 0x1ac   : > { %1479 = vpow2.f32 %v281_v13  ;;  %296 = vadd.xlane.f32.xlu0 %v295_v14 }
 0x1af   : > { %v255_v17 = vpop.xlane.xlu0 %254 }
 0x1b0   : > { %v273_v18 = vsub.f32 %v231_v46, %v255_v17 }
 0x1b2   : > { %v1853_v19 = vpop.eup %1479  ;;  %v283_v20 = vmul.f32 1.442695, %v273_v18 }
 0x1b3   : > { %v298_v21 = vsel %vm246_vm1, %v1853_v19, 0.0 }
 0x1b4   : > { %1481 = vpow2.f32 %v283_v20  ;;  %299 = vadd.xlane.f32.xlu2 %v298_v21  ;;  %v478_v20 = vsel %vm246_vm1, %v1891_v48, -inf }
 0x1b7   : > { %v258_v22 = vpop.xlane.xlu1 %257 }
 0x1b8   : > { %v274_v23 = vsub.f32 %v233_v52, %v258_v22  ;;  %v1899_v52 = vpop.f32.mrf.mxu2 }
 0x1b9   : > { %v481_v21 = vsel %vm246_vm1, %v1899_v52, -inf }
 0x1ba   : > { %v1857_v24 = vpop.eup %1481  ;;  %v285_v25 = vmul.f32 1.442695, %v274_v23 }
 0x1bb   : > { %v301_v26 = vsel %vm246_vm1, %v1857_v24, 0.0 }
 0x1bc   : > { %1483 = vpow2.f32 %v285_v25  ;;  %302 = vadd.xlane.f32.xlu0 %v301_v26 }
 0x1bf   : > { %v261_v27 = vpop.xlane.xlu2 %260 }
 0x1c0   : > { %v275_v28 = vsub.f32 %v236_v56, %v261_v27  ;;  %v1905_v55 = vpop.f32.mrf.mxu2 }
 0x1c1   : > { %v484_v56 = vsel %vm246_vm1, %v1905_v55, -inf }
 0x1c2   : > { %v1861_v29 = vpop.eup %1483  ;;  %v287_v30 = vmul.f32 1.442695, %v275_v28 }
 0x1c3   : > { %v304_v31 = vsel %vm246_vm1, %v1861_v29, 0.0 }
 0x1c4   : > { %1485 = vpow2.f32 %v287_v30  ;;  %305 = vadd.xlane.f32.xlu1 %v304_v31 }
 0x1c7   : > { %v264_v32 = vpop.xlane.xlu0 %263 }
 0x1c8   : > { %v276_v33 = vsub.f32 %v238_v58, %v264_v32 }
 0x1ca   : > { %v1865_v34 = vpop.eup %1485  ;;  %v289_v35 = vmul.f32 1.442695, %v276_v33 }
 0x1cb   : > { %v307_v36 = vsel %vm246_vm1, %v1865_v34, 0.0 }
 0x1cc   : > { %1487 = vpow2.f32 %v289_v35  ;;  %308 = vadd.xlane.f32.xlu2 %v307_v36 }
 0x1cf   : > { %v267_v43 = vpop.xlane.xlu2 %266 }
 0x1d0   : > { %v277_v46 = vsub.f32 %v1837_v60, %v267_v43 }
 0x1d2   : > { %v1869_v37 = vpop.eup %1487  ;;  %v291_v47 = vmul.f32 1.442695, %v277_v46 }
 0x1d3   : > { %v310_v38 = vsel %vm246_vm1, %v1869_v37, 0.0 }
 0x1d4   : > { %311 = vadd.xlane.f32.xlu0 %v310_v38 }
 0x1d7   : > { %v270_v41 = vpop.xlane.xlu1 %269 }
 0x1d8   : > { %v278_v42 = vsub.f32 %v1841_v62, %v270_v41 }
 0x1da   : > { %v293_v45 = vmul.f32 1.442695, %v278_v42 }
 0x1dc   : > { %1489 = vpow2.f32 %v293_v45 }
 0x1dd   : > { %625 = vrot.lane.b32.xlu1 %v1761_v5, %s1675_s4  ;;  %1491 = vpow2.f32 %v291_v47 }
 0x1e2   : > { %v1893_v49 = vpop.eup %1489 }
 0x1e3   : > { %v316_v50 = vsel %vm246_vm1, %v1893_v49, 0.0  ;;  %v1897_v51 = vpop.eup %1491 }
 0x1e4   : > { %852 = vrot.lane.b32.xlu2 %v1761_v5, %s1676_s5  ;;  %v313_v53 = vsel %vm246_vm1, %v1897_v51, 0.0 }
 0x1e5   : > { %627 = vrot.lane.b32.xlu1 %v1771_v10, %s1675_s4 }
 0x1e8   : > { %850 = vrot.lane.b32.xlu0 %v1773_v11, %s1676_s5 }
 0x1ed   : > { %856 = vrot.lane.b32.xlu1 %v1757_v2, %s1676_s5 }
 0x20d   : > { %317 = vadd.xlane.f32.xlu2 %v316_v50 }
 0x212   : > { %314 = vadd.xlane.f32.xlu0 %v313_v53 }
 0x217   : > { %476 = vmax.xlane.f32.xlu1 %v475_v54 }
 0x21f   : > { %v297_v57 = vpop.xlane.xlu0 %296  ;;  %485 = vmax.xlane.f32.xlu1 %v484_v56 }
 0x220   : > { %1493 = vrcp.f32 %v297_v57 }
 0x225   : > { %854 = vrot.lane.b32.xlu2 %v1771_v10, %s1676_s5  ;;  %s1625_s5 = scalar_lea.hbm %s2427_s2, 512 }
 0x226   : > { %v1494_v58 = vpop.eup %1493  ;;  %629 = vrot.lane.b32.xlu0 %v1757_v2, %s1675_s4  ;;  %p1627_p1 = scmp.lt.s32.totalorder %s1625_s5, %s1621_s3 }
 0x227   : > { %v300_v59 = vpop.xlane.xlu2 %299  ;;  %v327_v60 = vmul.f32 %v1494_v58, %v1848_v12 }
 0x228   : > { %1495 = vrcp.f32 %v300_v59  ;;  %p1628_p2 = por %p1627_p1, %p1626_p0 }
 0x229   : > { %335 = vst.msk [vmem:[%s1917_s8] sm:$0xff] %vm246_vm1, %v327_v60 }
 0x22a   : > { %p1629_p3 = pnand %p1628_p2, %p1624_p13 }
 0x22e   : > { %v1496_v61 = vpop.eup %1495 }
 0x22f   : > { %v303_v62 = vpop.xlane.xlu0 %302  ;;  %v328_v63 = vmul.f32 %v1496_v61, %v1853_v19  ;;  %v1946_v19 = vpop.f32.mrf.mxu2 }
 0x230   : > { %1497 = vrcp.f32 %v303_v62 }
 0x231   : > { %336 = vst.msk [vmem:[%s1917_s8 + $0x8] sm:$0xff] %vm246_vm1, %v328_v63  ;;  %v343_v1 = vpack.c.bf16 %v328_v63, %v327_v60 }
 0x233   : > { %1343 = vmatmul.msk.bf16.vlgmr.msra.gmra.mxu1 %vm246_vm1, %v343_v1 }
 0x236   : > { %v1498_v3 = vpop.eup %1497 }
 0x237   : > { %v306_v4 = vpop.xlane.xlu1 %305  ;;  %v329_v6 = vmul.f32 %v1498_v3, %v1857_v24  ;;  %v1954_v23 = vpop.f32.mrf.mxu2  ;;  %v487_v24 = vsel %vm246_vm1, %v1946_v19, -inf }
 0x238   : > { %1499 = vrcp.f32 %v306_v4  ;;  %576 = vrot.lane.b32.xlu1 %v1757_v2, %s1677_s14  ;;  %v490_v25 = vsel %vm246_vm1, %v1954_v23, -inf }
 0x239   : > { %337 = vst.msk [vmem:[%s1917_s8 + $0x10] sm:$0xff] %vm246_vm1, %v329_v6 }
 0x23e   : > { %v1500_v7 = vpop.eup %1499 }
 0x23f   : > { %v309_v8 = vpop.xlane.xlu2 %308  ;;  %v330_v9 = vmul.f32 %v1500_v7, %v1861_v29 }
 0x240   : > { %1501 = vrcp.f32 %v309_v8  ;;  %570 = vrot.lane.b32.xlu1 %v1773_v11, %s1677_s14  ;;  %v472_v11 = vsel %vm246_vm1, %v1885_v40, -inf }
 0x241   : > { %338 = vst.msk [vmem:[%s1917_s8 + $0x18] sm:$0xff] %vm246_vm1, %v330_v9  ;;  %v344_v12 = vpack.c.bf16 %v330_v9, %v329_v6 }
 0x243   : > { %1344 = vmatmul.msk.bf16.gmra.mxu1 %vm246_vm1, %v344_v12 }
 0x246   : > { %v1502_v13 = vpop.eup %1501 }
 0x247   : > { %v312_v14 = vpop.xlane.xlu0 %311  ;;  %v331_v2 = vmul.f32 %v1502_v13, %v1865_v34  ;;  %v853_v26 = vpop.permute.xlu2 %852 }
 0x248   : > { %1503 = vrcp.f32 %v312_v14 }
 0x249   : > { %339 = vst.msk [vmem:[%s1917_s8 + $0x20] sm:$0xff] %vm246_vm1, %v331_v2 }
 0x24e   : > { %v1504_v16 = vpop.eup %1503  ;;  %470 = vmax.xlane.f32.xlu2 %v469_v15  ;;  %v1387_v15 = vld [vmem:[%s1753_s25 + $0x38] sm:$0xf0] }
 0x24f   : > { %v332_v17 = vmul.f32 %v1504_v16, %v1869_v37  ;;  %v626_v27 = vpop.permute.xlu1 %625 }
 0x250   : > { %473 = vmax.xlane.f32.xlu0 %v472_v11 }
 0x251   : > { %340 = vst.msk [vmem:[%s1917_s8 + $0x28] sm:$0xff] %vm246_vm1, %v332_v17  ;;  %v345_v18 = vpack.c.bf16 %v332_v17, %v331_v2  ;;  %v1424_v2 = vld [vmem:[%s1753_s25 + $0x34] sm:$0xf] }
 0x252   : > { %v2020_v11 = vor.u32 %v1424_v2, %v1387_v15 }
 0x253   : > { %1345 = vmatmul.msk.bf16.gmra.mxu1 %vm246_vm1, %v345_v18 }
 0x256   : > { %479 = vmax.xlane.f32.xlu2 %v478_v20 }
 0x257   : > { %v628_v28 = vpop.permute.xlu1 %627 }
 0x258   : > { %482 = vmax.xlane.f32.xlu0 %v481_v21 }
 0x25a   : > { %v851_v22 = vpop.permute.xlu0 %850 }
 0x25b   : > { %1395 = vmatmul.msk.bf16.vlgmr.msrb.gmra.mxu0 %vm192_vm0, %v851_v22 }
 0x25e   : > { %488 = vmax.xlane.f32.xlu2 %v487_v24 }
 0x25f   : > { %v857_v30 = vpop.permute.xlu1 %856 }
 0x260   : > { %491 = vmax.xlane.f32.xlu0 %v490_v25 }
 0x26b   : > { %1396 = vmatmul.msk.bf16.gmra.mxu0 %vm192_vm0, %v853_v26 }
 0x280   : > { %v318_v29 = vpop.xlane.xlu2 %317 }
 0x281   : > { %1505 = vrcp.f32 %v318_v29 }
 0x285   : > { %v315_v31 = vpop.xlane.xlu0 %314 }
 0x286   : > { %1507 = vrcp.f32 %v315_v31 }
 0x287   : > { %v1506_v32 = vpop.eup %1505 }
 0x288   : > { %v855_v33 = vpop.permute.xlu2 %854  ;;  %v334_v34 = vmul.f32 %v1506_v32, %v1893_v49 }
 0x289   : > { %1397 = vmatmul.msk.bf16.gmra.mxu0 %vm192_vm0, %v855_v33 }
 0x28a   : > { %v477_v35 = vpop.xlane.xlu1 %476  ;;  %342 = vst.msk [vmem:[%s1917_s8 + $0x38] sm:$0xff] %vm246_vm1, %v334_v34 }
 0x28b   : > { %v495_v36 = vsub.f32 %v1888_v44, %v477_v35 }
 0x28c   : > { %v1508_v37 = vpop.eup %1507 }
 0x28d   : > { %v505_v38 = vmul.f32 1.442695, %v495_v36  ;;  %v333_v41 = vmul.f32 %v1508_v37, %v1897_v51 }
 0x28f   : > { %1509 = vpow2.f32 %v505_v38  ;;  %341 = vst.msk [vmem:[%s1917_s8 + $0x30] sm:$0xff] %vm246_vm1, %v333_v41  ;;  %v346_v42 = vpack.c.bf16 %v334_v34, %v333_v41 }
 0x291   : > { %1346 = vmatmul.msk.bf16.gmra.mxu1 %vm246_vm1, %v346_v42 }
 0x295   : > { %v1970_v43 = vpop.eup %1509 }
 0x296   : > { %v523_v45 = vsel %vm246_vm1, %v1970_v43, 0.0 }
 0x297   : > { %524 = vadd.xlane.f32.xlu1 %v523_v45 }
 0x298   : > { %v630_v44 = vpop.permute.xlu0 %629 }
 0x299   : > { %1398 = vmatmul.msk.bf16.gmra.mxu0 %vm192_vm0, %v857_v30 }
 0x2a1   : > { %1363 = vmatmul.msk.bf16.vlgmr.msrb.gmra.mxu1 %vm192_vm0, %v1845_v0 }
 0x2b0   : > { %v1992_v63 = vpop.f32.mrf.mxu1 }
 0x2b1   : > { %1364 = vmatmul.msk.bf16.gmra.mxu1 %vm192_vm0, %v626_v27 }
 0x2b8   : > { %v2000_v7 = vpop.f32.mrf.mxu1 }
 0x2c0   : > { %v2010_v12 = vpop.f32.mrf.mxu1 }
 0x2c1   : > { %v471_v46 = vpop.xlane.xlu2 %470  ;;  %1365 = vmatmul.msk.bf16.gmra.mxu1 %vm192_vm0, %v628_v28 }
 0x2c2   : > { %v493_v47 = vsub.f32 %v1881_v39, %v471_v46 }
 0x2c3   : > { %v474_v49 = vpop.xlane.xlu0 %473 }
 0x2c4   : > { %v501_v50 = vmul.f32 1.442695, %v493_v47  ;;  %v494_v51 = vsub.f32 %v1885_v40, %v474_v49  ;;  %v486_v40 = vpop.xlane.xlu1 %485 }
 0x2c5   : > { %v498_v30 = vsub.f32 %v1905_v55, %v486_v40 }
 0x2c6   : > { %1511 = vpow2.f32 %v501_v50  ;;  %v503_v53 = vmul.f32 1.442695, %v494_v51 }
 0x2c7   : > { %v511_v35 = vmul.f32 1.442695, %v498_v30 }
 0x2c8   : > { %1513 = vpow2.f32 %v503_v53  ;;  %v2014_v14 = vpop.f32.mrf.mxu1 }
 0x2c9   : > { %v480_v54 = vpop.xlane.xlu2 %479 }
 0x2ca   : > { %v496_v18 = vsub.f32 %v1891_v48, %v480_v54 }
 0x2cb   : > { %v483_v56 = vpop.xlane.xlu0 %482 }
 0x2cc   : > { %v1981_v57 = vpop.eup %1511  ;;  %v497_v0 = vsub.f32 %v1899_v52, %v483_v56  ;;  %v577_v4 = vpop.permute.xlu1 %576  ;;  %v507_v21 = vmul.f32 1.442695, %v496_v18 }
 0x2cd   : > { %v517_v58 = vsel %vm246_vm1, %v1981_v57, 0.0  ;;  %598 = vmatpush.bf16.msra.mxu3 %v577_v4 }
 0x2ce   : > { %v1986_v59 = vpop.eup %1513  ;;  %v509_v60 = vmul.f32 1.442695, %v497_v0  ;;  %518 = vadd.xlane.f32.xlu2 %v517_v58 }
 0x2cf   : > { %v520_v39 = vsel %vm246_vm1, %v1986_v59, 0.0 }
 0x2d0   : > { %1515 = vpow2.f32 %v509_v60  ;;  %521 = vadd.xlane.f32.xlu0 %v520_v39  ;;  %v2024_v17 = vpop.f32.mrf.mxu1 }
 0x2d1   : > { %v489_v61 = vpop.xlane.xlu2 %488  ;;  %1366 = vmatmul.msk.bf16.gmra.mxu1 %vm192_vm0, %v630_v44 }
 0x2d2   : > { %v499_v62 = vsub.f32 %v1946_v19, %v489_v61 }
 0x2d3   : > { %v492_v46 = vpop.xlane.xlu0 %491 }
 0x2d4   : > { %v513_v52 = vmul.f32 1.442695, %v499_v62  ;;  %v500_v47 = vsub.f32 %v1954_v23, %v492_v46 }
 0x2d6   : > { %v1994_v1 = vpop.eup %1515  ;;  %1517 = vpow2.f32 %v513_v52  ;;  %v515_v51 = vmul.f32 1.442695, %v500_v47  ;;  %v1422_v47 = vld [vmem:[%s1753_s25 + $0x24] sm:$0xf] }
 0x2d7   : > { %v529_v3 = vsel %vm246_vm1, %v1994_v1, 0.0 }
 0x2d8   : > { %530 = vadd.xlane.f32.xlu1 %v529_v3  ;;  %v2004_v9 = vpop.f32.mrf.mxu0  ;;  %v2031_v19 = vpop.f32.mrf.mxu1 }
 0x2d9   : > { %v919_v24 = vsel %vm246_vm1, %v2004_v9, -inf }
 0x2dc   : > { %v1998_v6 = vpop.eup %1517 }
 0x2dd   : > { %v535_v8 = vsel %vm246_vm1, %v1998_v6, 0.0 }
 0x2e0   : > { %536 = vadd.xlane.f32.xlu1 %v535_v8  ;;  %v2012_v13 = vpop.f32.mrf.mxu0 }
 0x2e1   : > { %v922_v26 = vsel %vm246_vm1, %v2012_v13, -inf }
 0x2e4   : > { %572 = vrot.lane.b32.xlu0 %v1761_v5, %s1677_s14 }
 0x2e6   : > { %574 = vrot.lane.b32.xlu2 %v1771_v10, %s1677_s14  ;;  %v2028_v10 = vpop.permute.xlu1 %570 }
 0x2e8   : > { %v2018_v16 = vpop.f32.mrf.mxu0 }
 0x2e9   : > { %v925_v55 = vsel %vm246_vm1, %v2018_v16, -inf }
 0x2f0   : > { %v2026_v5 = vpop.f32.mrf.mxu0 }
 0x2f1   : > { %v928_v33 = vsel %vm246_vm1, %v2026_v5, -inf }
 0x2f9   : > { %1026 = vrot.lane.b32.xlu1 %v2020_v11, %s1669_s26 }
 0x306   : > { %v2033_v20 = vpop.f32.mrf.mxu0 }
 0x307   : > { %v931_v49 = vsel %vm246_vm1, %v2033_v20, -inf }
 0x30a   : > { %v525_v22 = vpop.xlane.xlu1 %524 }
 0x30b   : > { %1519 = vrcp.f32 %v525_v22 }
 0x30c   : > { %1521 = vpow2.f32 %v507_v21 }
 0x30d   : > { %1523 = vpow2.f32 %v511_v35 }
 0x30e   : > { %920 = vmax.xlane.f32.xlu0 %v919_v24  ;;  %v2037_v25 = vpop.f32.mrf.mxu1  ;;  %v2041_v27 = vpop.f32.mrf.mxu0  ;;  %1525 = vpow2.f32 %v515_v51 }
 0x30f   : > { %923 = vmax.xlane.f32.xlu2 %v922_v26  ;;  %v934_v37 = vsel %vm246_vm1, %v2041_v27, -inf }
 0x311   : > { %v1520_v48 = vpop.eup %1519 }
 0x312   : > { %v2043_v28 = vpop.eup %1521  ;;  %v2046_v29 = vmul.f32 %v1520_v48, %v1970_v43 }
 0x313   : > { %v526_v31 = vsel %vm246_vm1, %v2043_v28, 0.0  ;;  %v2068_v41 = vpop.eup %1523 }
 0x314   : > { %1353 = vst.msk [vmem:[%s1917_s8 + $0x50] sm:$0xff] %vm246_vm1, %v2046_v29  ;;  %v532_v45 = vsel %vm246_vm1, %v2068_v41, 0.0  ;;  %v2089_v0 = vpop.eup %1525 }
 0x315   : > { %v538_v23 = vsel %vm246_vm1, %v2089_v0, 0.0 }
 0x316   : > { %527 = vadd.xlane.f32.xlu0 %v526_v31  ;;  %v2054_v32 = vpop.f32.mrf.mxu1  ;;  %v2058_v34 = vpop.f32.mrf.mxu0 }
 0x317   : > { %929 = vmax.xlane.f32.xlu2 %v928_v33  ;;  %v937_v53 = vsel %vm246_vm1, %v2058_v34, -inf }
 0x31e   : > { %926 = vmax.xlane.f32.xlu0 %v925_v55  ;;  %v2062_v36 = vpop.f32.mrf.mxu1  ;;  %v2066_v38 = vpop.f32.mrf.mxu0 }
 0x31f   : > { %935 = vmax.xlane.f32.xlu2 %v934_v37  ;;  %v692_v42 = vsel %vm246_vm1, %v2062_v36, -inf  ;;  %v940_v43 = vsel %vm246_vm1, %v2066_v38, -inf }
 0x323   : > { %693 = vmax.xlane.f32.xlu1 %v692_v42 }
 0x326   : > { %v2076_v44 = vpop.f32.mrf.mxu1  ;;  %533 = vadd.xlane.f32.xlu0 %v532_v45 }
 0x327   : > { %941 = vmax.xlane.f32.xlu2 %v940_v43 }
 0x32e   : > { %v2081_v50 = vpop.f32.mrf.mxu1  ;;  %932 = vmax.xlane.f32.xlu0 %v931_v49  ;;  %v1383_v49 = vld [vmem:[%s1753_s25 + $0x28] sm:$0xf0] }
 0x336   : > { %v2085_v54 = vpop.f32.mrf.mxu1  ;;  %938 = vmax.xlane.f32.xlu0 %v937_v53  ;;  %v1386_v53 = vor.u32 %v1422_v47, %v1383_v49 }
 0x337   : > { %v701_v56 = vsel %vm246_vm1, %v2085_v54, -inf }
 0x338   : > { %702 = vmax.xlane.f32.xlu1 %v701_v56 }
 0x33e   : > { %v2093_v58 = vpop.f32.mrf.mxu1  ;;  %539 = vadd.xlane.f32.xlu0 %v538_v23  ;;  %v695_v23 = vsel %vm246_vm1, %v2076_v44, -inf }
 0x341   : > { %v519_v60 = vpop.xlane.xlu2 %518 }
 0x342   : > { %1527 = vrcp.f32 %v519_v60 }
 0x343   : > { %v522_v39 = vpop.xlane.xlu0 %521 }
 0x344   : > { %1529 = vrcp.f32 %v522_v39 }
 0x346   : > { %v2095_v40 = vpop.f32.mrf.mxu1 }
 0x347   : > { %v707_v61 = vsel %vm246_vm1, %v2095_v40, -inf }
 0x348   : > { %v1528_v62 = vpop.eup %1527  ;;  %708 = vmax.xlane.f32.xlu1 %v707_v61  ;;  %v698_v61 = vsel %vm246_vm1, %v2081_v50, -inf }
 0x349   : > { %v575_v52 = vpop.permute.xlu2 %574  ;;  %v549_v3 = vmul.f32 %v1528_v62, %v1981_v57 }
 0x34a   : > { %v1530_v4 = vpop.eup %1529  ;;  %599 = vmatpush.bf16.msra.mxu3 %v575_v52 }
 0x34b   : > { %v531_v8 = vpop.xlane.xlu1 %530  ;;  %v550_v2 = vmul.f32 %v1530_v4, %v1986_v59  ;;  %1351 = vst.msk [vmem:[%s1917_s8 + $0x40] sm:$0xff] %vm246_vm1, %v549_v3 }
 0x34c   : > { %1531 = vrcp.f32 %v531_v8  ;;  %v704_v8 = vsel %vm246_vm1, %v2093_v58, -inf }
 0x34d   : > { %1352 = vst.msk [vmem:[%s1917_s8 + $0x48] sm:$0xff] %vm246_vm1, %v550_v2  ;;  %v566_v30 = vpack.c.bf16 %v550_v2, %v549_v3 }
 0x34e   : > { %v2105_v15 = vpop.f32.mrf.mxu1 }
 0x352   : > { %v1532_v18 = vpop.eup %1531 }
 0x353   : > { %v537_v21 = vpop.xlane.xlu1 %536  ;;  %v553_v22 = vmul.f32 %v1532_v18, %v1994_v1 }
 0x354   : > { %1533 = vrcp.f32 %v537_v21 }
 0x355   : > { %1355 = vst.msk [vmem:[%s1917_s8 + $0x60] sm:$0xff] %vm246_vm1, %v553_v22 }
 0x356   : > { %v573_v57 = vpop.permute.xlu0 %572  ;;  %v2110_v24 = vpop.f32.mrf.mxu1 }
 0x357   : > { %600 = vmatpush.bf16.msra.mxu3 %v573_v57  ;;  %v713_v59 = vsel %vm246_vm1, %v2110_v24, -inf }
 0x358   : > { %714 = vmax.xlane.f32.xlu1 %v713_v59  ;;  %v1418_v59 = vld [vmem:[%s1753_s25 + $0x4] sm:$0xf] }
 0x35a   : > { %v1534_v26 = vpop.eup %1533 }
 0x35b   : > { %601 = vmatpush.bf16.msra.mxu3 %v2028_v10  ;;  %v2116_v48 = vmul.f32 %v1534_v26, %v1998_v6  ;;  %v1375_v26 = vld [vmem:[%s1753_s25 + $0x8] sm:$0xf0] }
 0x35d   : > { %1357 = vst.msk [vmem:[%s1917_s8 + $0x70] sm:$0xff] %vm246_vm1, %v2116_v48 }
 0x35e   : > { %1359 = vmatmul.msk.bf16.vlgmr.msra.gmra.mxu3 %vm246_vm1, %v566_v30  ;;  %v1378_v30 = vor.u32 %v1418_v59, %v1375_v26 }
 0x35f   : > { %825 = vmatpush.bf16.msrb.mxu3 %v2020_v11 }
 0x363   : > { %826 = vmatpush.bf16.msrb.mxu3 %v1386_v53 }
 0x36b   : > { %v1027_v1 = vpop.permute.xlu1 %1026 }
 0x36c   : > { %1048 = vmatpush.bf16.msrb.mxu2 %v1027_v1 }
 0x371   : > { %1020 = vrot.lane.b32.xlu1 %v1378_v30, %s1669_s26 }
 0x381   : > { %v921_v31 = vpop.xlane.xlu0 %920 }
 0x382   : > { %v943_v33 = vsub.f32 %v2004_v9, %v921_v31  ;;  %v924_v35 = vpop.xlane.xlu2 %923 }
 0x383   : > { %v944_v55 = vsub.f32 %v2012_v13, %v924_v35 }
 0x384   : > { %v951_v10 = vmul.f32 1.442695, %v943_v33 }
 0x385   : > { %v953_v6 = vmul.f32 1.442695, %v944_v55 }
 0x386   : > { %1535 = vpow2.f32 %v951_v10 }
 0x387   : > { %1537 = vpow2.f32 %v953_v6 }
 0x389   : > { %v528_v11 = vpop.xlane.xlu0 %527 }
 0x38a   : > { %1539 = vrcp.f32 %v528_v11 }
 0x38c   : > { %v2125_v37 = vpop.eup %1535 }
 0x38d   : > { %v2127_v42 = vpop.eup %1537  ;;  %v967_v43 = vsel %vm246_vm1, %v2125_v37, 0.0 }
 0x38e   : > { %968 = vadd.xlane.f32.xlu0 %v967_v43  ;;  %v970_v9 = vsel %vm246_vm1, %v2127_v42, 0.0  ;;  %v1420_v43 = vld [vmem:[%s1753_s25 + $0x14] sm:$0xf] }
 0x38f   : > { %971 = vadd.xlane.f32.xlu2 %v970_v9  ;;  %v1379_v9 = vld [vmem:[%s1753_s25 + $0x18] sm:$0xf0]  ;;  %s1224_s25 = sshll.u32 %s1917_s8, 4  ;;  %s1225_s25 = int_to_ptr.vmem [resolvable:$true] %s1224_s25 }
 0x390   : > { %v1540_v13 = vpop.eup %1539  ;;  %v1382_v47 = vor.u32 %v1420_v43, %v1379_v9 }
 0x391   : > { %v2133_v45 = vpop.xlane.xlu0 %926  ;;  %v552_v46 = vmul.f32 %v1540_v13, %v2043_v28 }
 0x392   : > { %827 = vmatpush.bf16.msrb.mxu3 %v1382_v47 }
 0x393   : > { %1354 = vst.msk [vmem:[%s1917_s8 + $0x58] sm:$0xff] %vm246_vm1, %v552_v46  ;;  %v567_v51 = vpack.c.bf16 %v552_v46, %v2046_v29 }
 0x395   : > { %1360 = vmatmul.msk.bf16.gmra.mxu3 %vm246_vm1, %v567_v51 }
 0x396   : > { %v694_v56 = vpop.xlane.xlu1 %693  ;;  %828 = vmatpush.bf16.msrb.mxu3 %v1378_v30 }
 0x397   : > { %v716_v60 = vsub.f32 %v2062_v36, %v694_v56  ;;  %696 = vmax.xlane.f32.xlu2 %v695_v23 }
 0x399   : > { %v724_v39 = vmul.f32 1.442695, %v716_v60  ;;  %v534_v28 = vpop.xlane.xlu0 %533 }
 0x39a   : > { %1541 = vrcp.f32 %v534_v28 }
 0x39b   : > { %1543 = vpow2.f32 %v724_v39 }
 0x39f   : > { %699 = vmax.xlane.f32.xlu2 %v698_v61 }
 0x3a0   : > { %v1542_v29 = vpop.eup %1541 }
 0x3a1   : > { %v2147_v62 = vpop.eup %1543  ;;  %v2149_v52 = vpop.xlane.xlu0 %932  ;;  %v554_v3 = vmul.f32 %v1542_v29, %v2068_v41  ;;  %v710_v41 = vsel %vm246_vm1, %v2105_v15, -inf }
 0x3a2   : > { %v740_v36 = vsel %vm246_vm1, %v2147_v62, 0.0 }
 0x3a3   : > { %741 = vadd.xlane.f32.xlu0 %v740_v36  ;;  %1356 = vst.msk [vmem:[%s1917_s8 + $0x68] sm:$0xff] %vm246_vm1, %v554_v3  ;;  %v568_v4 = vpack.c.bf16 %v554_v3, %v553_v22 }
 0x3a5   : > { %1361 = vmatmul.msk.bf16.gmra.mxu3 %vm246_vm1, %v568_v4 }
 0x3a7   : > { %705 = vmax.xlane.f32.xlu2 %v704_v8 }
 0x3a9   : > { %v2159_v2 = vpop.xlane.xlu0 %938 }
 0x3ab   : > { %v703_v1 = vpop.xlane.xlu1 %702 }
 0x3ac   : > { %v719_v31 = vsub.f32 %v2085_v54, %v703_v1 }
 0x3ae   : > { %v730_v33 = vmul.f32 1.442695, %v719_v31 }
 0x3af   : > { %711 = vmax.xlane.f32.xlu2 %v710_v41 }
 0x3b1   : > { %v540_v18 = vpop.xlane.xlu0 %539 }
 0x3b2   : > { %1545 = vrcp.f32 %v540_v18 }
 0x3b3   : > { %1547 = vpow2.f32 %v730_v33 }
 0x3b7   : > { %1024 = vrot.lane.b32.xlu0 %v1386_v53, %s1669_s26 }
 0x3b8   : > { %v1546_v21 = vpop.eup %1545 }
 0x3b9   : > { %v556_v22 = vmul.f32 %v1546_v21, %v2089_v0  ;;  %v2173_v35 = vpop.eup %1547 }
 0x3ba   : > { %v749_v0 = vsel %vm246_vm1, %v2173_v35, 0.0 }
 0x3bb   : > { %1358 = vst.msk [vmem:[%s1917_s8 + $0x78] sm:$0xff] %vm246_vm1, %v556_v22  ;;  %v569_v57 = vpack.c.bf16 %v556_v22, %v2116_v48  ;;  %v930_v48 = vpop.xlane.xlu2 %929  ;;  %v709_v3 = vpop.xlane.xlu1 %708 }
 0x3bc   : > { %v946_v39 = vsub.f32 %v2026_v5, %v930_v48  ;;  %v947_v5 = vsub.f32 %v2033_v20, %v2149_v52  ;;  %v721_v18 = vsub.f32 %v2095_v40, %v709_v3 }
 0x3bd   : > { %1362 = vmatmul.msk.bf16.gmra.mxu3 %vm246_vm1, %v569_v57 }
 0x3be   : > { %v957_v29 = vmul.f32 1.442695, %v946_v39  ;;  %v959_v57 = vmul.f32 1.442695, %v947_v5 }
 0x3c3   : > { %v2177_v55 = vpop.xlane.xlu2 %935 }
 0x3cb   : > { %v2179_v10 = vpop.xlane.xlu2 %941  ;;  %v715_v59 = vpop.xlane.xlu1 %714 }
 0x3cc   : > { %v723_v40 = vsub.f32 %v2110_v24, %v715_v59 }
 0x3ce   : > { %v738_v33 = vmul.f32 1.442695, %v723_v40 }
 0x3e1   : > { %750 = vadd.xlane.f32.xlu0 %v749_v0  ;;  %v603_v31 = vpop.f32.mrf.mxu3 }
 0x3e9   : > { %v605_v9 = vpop.f32.mrf.mxu3 }
 0x401   : > { %v969_v6 = vpop.xlane.xlu0 %968 }
 0x402   : > { %1549 = vrcp.f32 %v969_v6  ;;  %v972_v11 = vpop.xlane.xlu2 %971 }
 0x403   : > { %1551 = vrcp.f32 %v972_v11 }
 0x408   : > { %v1550_v54 = vpop.eup %1549 }
 0x409   : > { %v1552_v13 = vpop.eup %1551  ;;  %v2184_v46 = vmul.f32 %v1550_v54, %v2125_v37 }
 0x40a   : > { %v2187_v49 = vmul.f32 %v1552_v13, %v2127_v42  ;;  %v697_v51 = vpop.xlane.xlu2 %696 }
 0x40b   : > { %1399 = vst.msk [vmem:[%s1917_s8 + $0xc0] sm:$0xff] %vm246_vm1, %v2184_v46  ;;  %v717_v53 = vsub.f32 %v2076_v44, %v697_v51 }
 0x40c   : > { %1400 = vst.msk [vmem:[%s1917_s8 + $0xc8] sm:$0xff] %vm246_vm1, %v2187_v49  ;;  %v1016_v56 = vpack.c.bf16 %v2187_v49, %v2184_v46 }
 0x40d   : > { %v726_v23 = vmul.f32 1.442695, %v717_v53 }
 0x40f   : > { %1553 = vpow2.f32 %v726_v23 }
 0x412   : > { %v700_v37 = vpop.xlane.xlu2 %699 }
 0x413   : > { %v718_v42 = vsub.f32 %v2081_v50, %v700_v37 }
 0x415   : > { %v2199_v60 = vpop.eup %1553  ;;  %v728_v28 = vmul.f32 1.442695, %v718_v42  ;;  %v945_v42 = vsub.f32 %v2018_v16, %v2133_v45  ;;  %v949_v16 = vsub.f32 %v2058_v34, %v2159_v2 }
 0x416   : > { %v742_v61 = vpop.xlane.xlu0 %741  ;;  %v743_v44 = vsel %vm246_vm1, %v2199_v60, 0.0 }
 0x417   : > { %1555 = vpow2.f32 %v728_v28  ;;  %744 = vadd.xlane.f32.xlu2 %v743_v44  ;;  %v955_v39 = vmul.f32 1.442695, %v945_v42  ;;  %v948_v28 = vsub.f32 %v2041_v27, %v2177_v55  ;;  %v963_v27 = vmul.f32 1.442695, %v949_v16 }
 0x418   : > { %1557 = vrcp.f32 %v742_v61 }
 0x419   : > { %1559 = vpow2.f32 %v957_v29  ;;  %v961_v44 = vmul.f32 1.442695, %v948_v28 }
 0x41a   : > { %v706_v36 = vpop.xlane.xlu2 %705 }
 0x41b   : > { %v720_v4 = vsub.f32 %v2093_v58, %v706_v36  ;;  %v734_v58 = vmul.f32 1.442695, %v721_v18 }
 0x41d   : > { %v2205_v8 = vpop.eup %1555  ;;  %v732_v50 = vmul.f32 1.442695, %v720_v4 }
 0x41e   : > { %v1558_v41 = vpop.eup %1557  ;;  %v746_v21 = vsel %vm246_vm1, %v2205_v8, 0.0 }
 0x41f   : > { %v2213_v22 = vmul.f32 %v1558_v41, %v2147_v62  ;;  %1561 = vpow2.f32 %v732_v50  ;;  %747 = vadd.xlane.f32.xlu1 %v746_v21  ;;  %v2218_v26 = vpop.eup %1559 }
 0x420   : > { %1563 = vpow2.f32 %v959_v57  ;;  %v976_v1 = vsel %vm246_vm1, %v2218_v26, 0.0 }
 0x421   : > { %1367 = vst.msk [vmem:[%s1917_s8 + $0x80] sm:$0xff] %vm246_vm1, %v2213_v22  ;;  %1565 = vpow2.f32 %v734_v58 }
 0x422   : > { %v712_v20 = vpop.xlane.xlu2 %711  ;;  %1567 = vpow2.f32 %v738_v33 }
 0x423   : > { %v722_v62 = vsub.f32 %v2105_v15, %v712_v20  ;;  %v950_v15 = vsub.f32 %v2066_v38, %v2179_v10 }
 0x425   : > { %v2220_v52 = vpop.eup %1561  ;;  %v736_v0 = vmul.f32 1.442695, %v722_v62  ;;  %v965_v43 = vmul.f32 1.442695, %v950_v15 }
 0x426   : > { %v752_v30 = vsel %vm246_vm1, %v2220_v52, 0.0  ;;  %v2228_v48 = vpop.eup %1563 }
 0x427   : > { %753 = vadd.xlane.f32.xlu0 %v752_v30  ;;  %977 = vadd.xlane.f32.xlu1 %v976_v1  ;;  %v2230_v11 = vpop.eup %1565  ;;  %1569 = vpow2.f32 %v736_v0  ;;  %v979_v24 = vsel %vm246_vm1, %v2228_v48, 0.0 }
 0x428   : > { %v755_v54 = vsel %vm246_vm1, %v2230_v11, 0.0  ;;  %v2239_v13 = vpop.eup %1567  ;;  %1571 = vpow2.f32 %v965_v43 }
 0x429   : > { %v1025_v6 = vpop.permute.xlu0 %1024  ;;  %v761_v38 = vsel %vm246_vm1, %v2239_v13, 0.0  ;;  %1573 = vpow2.f32 %v955_v39 }
 0x42a   : > { %1049 = vmatpush.bf16.msrb.mxu2 %v1025_v6 }
 0x42d   : > { %v2241_v51 = vpop.eup %1569 }
 0x42e   : > { %v758_v10 = vsel %vm246_vm1, %v2241_v51, 0.0  ;;  %v2247_v53 = vpop.eup %1571 }
 0x42f   : > { %1022 = vrot.lane.b32.xlu2 %v1382_v47, %s1669_s26  ;;  %980 = vadd.xlane.f32.xlu0 %v979_v24  ;;  %v608_v47 = vpop.f32.mrf.mxu3  ;;  %v988_v23 = vsel %vm246_vm1, %v2247_v53, 0.0  ;;  %v2257_v29 = vpop.eup %1573 }
 0x430   : > { %756 = vadd.xlane.f32.xlu1 %v755_v54  ;;  %v973_v45 = vsel %vm246_vm1, %v2257_v29, 0.0 }
 0x437   : > { %762 = vadd.xlane.f32.xlu0 %v761_v38  ;;  %v610_v37 = vpop.f32.mrf.mxu3 }
 0x438   : > { %759 = vadd.xlane.f32.xlu1 %v758_v10 }
 0x43f   : > { %v613_v61 = vpop.f32.mrf.mxu3 }
 0x440   : > { %989 = vadd.xlane.f32.xlu1 %v988_v23 }
 0x447   : > { %v615_v36 = vpop.f32.mrf.mxu3 }
 0x44b   : > { %1081 = vrot.lane.b32.xlu0 %v603_v31, %s1677_s14 }
 0x44f   : > { %v618_v2 = vpop.f32.mrf.mxu3 }
 0x453   : > { %1087 = vrot.lane.b32.xlu0 %v610_v37, %s1677_s14 }
 0x454   : > { %v751_v3 = vpop.xlane.xlu0 %750 }
 0x455   : > { %1575 = vrcp.f32 %v751_v3 }
 0x456   : > { %1577 = vpow2.f32 %v961_v44 }
 0x457   : > { %1579 = vpow2.f32 %v963_v27  ;;  %v620_v21 = vpop.f32.mrf.mxu3 }
 0x458   : > { %974 = vadd.xlane.f32.xlu2 %v973_v45 }
 0x459   : > { %1085 = vrot.lane.b32.xlu1 %v608_v47, %s1677_s14 }
 0x45b   : > { %v1576_v55 = vpop.eup %1575  ;;  %1091 = vrot.lane.b32.xlu0 %v615_v36, %s1677_s14 }
 0x45c   : > { %v2265_v4 = vpop.eup %1577  ;;  %v775_v5 = vmul.f32 %v1576_v55, %v2173_v35  ;;  %v1021_v35 = vpop.permute.xlu1 %1020 }
 0x45d   : > { %v982_v34 = vsel %vm246_vm1, %v2265_v4, 0.0  ;;  %v2273_v50 = vpop.eup %1579 }
 0x45e   : > { %1370 = vst.msk [vmem:[%s1917_s8 + $0x98] sm:$0xff] %vm246_vm1, %v775_v5  ;;  %v985_v41 = vsel %vm246_vm1, %v2273_v50, 0.0 }
 0x460   : > { %983 = vadd.xlane.f32.xlu2 %v982_v34 }
 0x461   : > { %1093 = vrot.lane.b32.xlu1 %v618_v2, %s1677_s14 }
 0x468   : > { %986 = vadd.xlane.f32.xlu2 %v985_v41 }
 0x480   : > { %1083 = vrot.lane.b32.xlu2 %v605_v9, %s1677_s14 }
 0x488   : > { %1089 = vrot.lane.b32.xlu2 %v613_v61, %s1677_s14 }
 0x48a   : > { %v745_v18 = vpop.xlane.xlu2 %744 }
 0x48b   : > { %1581 = vrcp.f32 %v745_v18 }
 0x490   : > { %1095 = vrot.lane.b32.xlu2 %v620_v21, %s1677_s14 }
 0x491   : > { %v1582_v57 = vpop.eup %1581 }
 0x492   : > { %v773_v58 = vmul.f32 %v1582_v57, %v2199_v60  ;;  %v1023_v59 = vpop.permute.xlu2 %1022  ;;  %v748_v20 = vpop.xlane.xlu1 %747 }
 0x493   : > { %1583 = vrcp.f32 %v748_v20  ;;  %1050 = vmatpush.bf16.msrb.mxu2 %v1023_v59 }
 0x494   : > { %1368 = vst.msk [vmem:[%s1917_s8 + $0x88] sm:$0xff] %vm246_vm1, %v773_v58  ;;  %v789_v40 = vpack.c.bf16 %v773_v58, %v2213_v22 }
 0x496   : > { %1391 = vmatmul.msk.bf16.vlgmr.msrb.gmra.mxu3 %vm246_vm1, %v789_v40 }
 0x497   : > { %1051 = vmatpush.bf16.msrb.mxu2 %v1021_v35 }
 0x499   : > { %v1584_v62 = vpop.eup %1583 }
 0x49a   : > { %v754_v30 = vpop.xlane.xlu0 %753  ;;  %1407 = vmatmul.msk.bf16.vlgmr.msrb.gmra.mxu2 %vm246_vm1, %v1016_v56  ;;  %v978_v60 = vpop.xlane.xlu1 %977  ;;  %v774_v1 = vmul.f32 %v1584_v62, %v2205_v8 }
 0x49b   : > { %1585 = vrcp.f32 %v754_v30 }
 0x49c   : > { %1587 = vrcp.f32 %v978_v60  ;;  %1369 = vst.msk [vmem:[%s1917_s8 + $0x90] sm:$0xff] %vm246_vm1, %v774_v1  ;;  %v790_v49 = vpack.c.bf16 %v775_v5, %v774_v1 }
 0x4a1   : > { %v1586_v22 = vpop.eup %1585 }
 0x4a2   : > { %v1588_v31 = vpop.eup %1587  ;;  %v981_v33 = vpop.xlane.xlu0 %980  ;;  %v776_v0 = vmul.f32 %v1586_v22, %v2220_v52 }
 0x4a3   : > { %1589 = vrcp.f32 %v981_v33  ;;  %v757_v6 = vpop.xlane.xlu1 %756  ;;  %v1002_v46 = vmul.f32 %v1588_v31, %v2218_v26 }
 0x4a4   : > { %1591 = vrcp.f32 %v757_v6  ;;  %1371 = vst.msk [vmem:[%s1917_s8 + $0xa0] sm:$0xff] %vm246_vm1, %v776_v0 }
 0x4a5   : > { %1402 = vst.msk [vmem:[%s1917_s8 + $0xd8] sm:$0xff] %vm246_vm1, %v1002_v46 }
 0x4a6   : > { %1392 = vmatmul.msk.bf16.gmra.mxu3 %vm246_vm1, %v790_v49 }
 0x4a9   : > { %v1590_v56 = vpop.eup %1589 }
 0x4aa   : > { %v1592_v8 = vpop.eup %1591  ;;  %v763_v15 = vpop.xlane.xlu0 %762  ;;  %v1003_v52 = vmul.f32 %v1590_v56, %v2228_v48 }
 0x4ab   : > { %1593 = vrcp.f32 %v763_v15  ;;  %v760_v24 = vpop.xlane.xlu1 %759  ;;  %v777_v54 = vmul.f32 %v1592_v8, %v2230_v11 }
 0x4ac   : > { %1595 = vrcp.f32 %v760_v24  ;;  %1403 = vst.msk [vmem:[%s1917_s8 + $0xe0] sm:$0xff] %vm246_vm1, %v1003_v52 }
 0x4ad   : > { %1372 = vst.msk [vmem:[%s1917_s8 + $0xa8] sm:$0xff] %vm246_vm1, %v777_v54  ;;  %v791_v48 = vpack.c.bf16 %v777_v54, %v776_v0 }
 0x4b1   : > { %v1594_v26 = vpop.eup %1593 }
 0x4b2   : > { %v1596_v43 = vpop.eup %1595  ;;  %v779_v9 = vmul.f32 %v1594_v26, %v2239_v13 }
 0x4b3   : > { %v990_v38 = vpop.xlane.xlu1 %989  ;;  %v778_v10 = vmul.f32 %v1596_v43, %v2241_v51 }
 0x4b4   : > { %1597 = vrcp.f32 %v990_v38  ;;  %1374 = vst.msk [vmem:[%s1917_s8 + $0xb8] sm:$0xff] %vm246_vm1, %v779_v9 }
 0x4b5   : > { %1373 = vst.msk [vmem:[%s1917_s8 + $0xb0] sm:$0xff] %vm246_vm1, %v778_v10  ;;  %v792_v23 = vpack.c.bf16 %v779_v9, %v778_v10 }
 0x4b6   : > { %1393 = vmatmul.msk.bf16.gmra.mxu3 %vm246_vm1, %v791_v48 }
 0x4ba   : > { %v1598_v11 = vpop.eup %1597 }
 0x4bb   : > { %v1006_v47 = vmul.f32 %v1598_v11, %v2247_v53 }
 0x4bd   : > { %1406 = vst.msk [vmem:[%s1917_s8 + $0xf8] sm:$0xff] %vm246_vm1, %v1006_v47 }
 0x4c6   : > { %1394 = vmatmul.msk.bf16.gmra.mxu3 %vm246_vm1, %v792_v23 }
 0x4cb   : > { %v975_v13 = vpop.xlane.xlu2 %974 }
 0x4cc   : > { %1599 = vrcp.f32 %v975_v13 }
 0x4d2   : > { %v1600_v51 = vpop.eup %1599 }
 0x4d3   : > { %v984_v37 = vpop.xlane.xlu2 %983  ;;  %v1001_v42 = vmul.f32 %v1600_v51, %v2257_v29 }
 0x4d4   : > { %1601 = vrcp.f32 %v984_v37 }
 0x4d5   : > { %1401 = vst.msk [vmem:[%s1917_s8 + $0xd0] sm:$0xff] %vm246_vm1, %v1001_v42  ;;  %v1017_v39 = vpack.c.bf16 %v1002_v46, %v1001_v42 }
 0x4d7   : > { %1408 = vmatmul.msk.bf16.gmra.mxu2 %vm246_vm1, %v1017_v39 }
 0x4da   : > { %v1602_v53 = vpop.eup %1601 }
 0x4db   : > { %v987_v28 = vpop.xlane.xlu2 %986  ;;  %v1004_v61 = vmul.f32 %v1602_v53, %v2265_v4 }
 0x4dc   : > { %1603 = vrcp.f32 %v987_v28 }
 0x4dd   : > { %1404 = vst.msk [vmem:[%s1917_s8 + $0xe8] sm:$0xff] %vm246_vm1, %v1004_v61  ;;  %v1018_v16 = vpack.c.bf16 %v1004_v61, %v1003_v52 }
 0x4e2   : > { %v1604_v44 = vpop.eup %1603 }
 0x4e3   : > { %v1005_v3 = vmul.f32 %v1604_v44, %v2273_v50 }
 0x4e5   : > { %1405 = vst.msk [vmem:[%s1917_s8 + $0xf0] sm:$0xff] %vm246_vm1, %v1005_v3  ;;  %v1019_v29 = vpack.c.bf16 %v1006_v47, %v1005_v3 }
 0x4e7   : > { %1409 = vmatmul.msk.bf16.gmra.mxu2 %vm246_vm1, %v1018_v16 }
 0x4f7   : > { %1410 = vmatmul.msk.bf16.gmra.mxu2 %vm246_vm1, %v1019_v29 }
 0x519   : > { %v830_v27 = vpop.f32.mrf.mxu3 }
 0x51d   : > { %v1053_v45 = vpop.f32.mrf.mxu2 }
 0x51e   : > { %1145 = vrot.lane.b32.xlu2 %v1053_v45, %s1669_s26 }
 0x521   : > { %v832_v55 = vpop.f32.mrf.mxu3 }
 0x525   : > { %v1055_v36 = vpop.f32.mrf.mxu2 }
 0x526   : > { %1147 = vrot.lane.b32.xlu0 %v1055_v36, %s1669_s26 }
 0x529   : > { %v835_v4 = vpop.f32.mrf.mxu3 }
 0x531   : > { %v837_v5 = vpop.f32.mrf.mxu3 }
 0x539   : > { %v840_v34 = vpop.f32.mrf.mxu3 }
 0x541   : > { %v842_v50 = vpop.f32.mrf.mxu3 }
 0x549   : > { %v845_v35 = vpop.f32.mrf.mxu3 }
 0x551   : > { %v847_v57 = vpop.f32.mrf.mxu3 }
 0x55a   : > { %v1058_v2 = vpop.f32.mrf.mxu2 }
 0x55b   : > { %1149 = vrot.lane.b32.xlu1 %v1058_v2, %s1669_s26 }
 0x562   : > { %v1060_v41 = vpop.f32.mrf.mxu2 }
 0x563   : > { %1151 = vrot.lane.b32.xlu2 %v1060_v41, %s1669_s26  ;;  %1115 = vrot.lane.b32.xlu1 %v832_v55, %s1671_s28 }
 0x56a   : > { %v1063_v18 = vpop.f32.mrf.mxu2 }
 0x56b   : > { %1153 = vrot.lane.b32.xlu0 %v1063_v18, %s1669_s26  ;;  %1117 = vrot.lane.b32.xlu2 %v835_v4, %s1671_s28 }
 0x56c   : > { %1121 = vrot.lane.b32.xlu1 %v840_v34, %s1671_s28 }
 0x572   : > { %v1065_v21 = vpop.f32.mrf.mxu2 }
 0x573   : > { %1113 = vrot.lane.b32.xlu0 %v830_v27, %s1671_s28  ;;  %1123 = vrot.lane.b32.xlu2 %v842_v50, %s1671_s28 }
 0x574   : > { %1127 = vrot.lane.b32.xlu1 %v847_v57, %s1671_s28 }
 0x57a   : > { %v1068_v58 = vpop.f32.mrf.mxu2 }
 0x57b   : > { %1119 = vrot.lane.b32.xlu0 %v837_v5, %s1671_s28  ;;  %1157 = vrot.lane.b32.xlu2 %v1068_v58, %s1669_s26 }
 0x57c   : > { %1155 = vrot.lane.b32.xlu1 %v1065_v21, %s1669_s26 }
 0x583   : > { %1125 = vrot.lane.b32.xlu0 %v845_v35, %s1671_s28 }
 0x584   : > { %1632 = shalt.err (!%p1629_p3)
}
 0x585   : > { %s1678_s28 = smov 128   ;;  %s1679_s6 = smov 8   ;;  %v1070_v59 = vpop.f32.mrf.mxu2  ;;  %v1084_v20 = vpop.permute.xlu2 %1083  ;;  %vm1169_vm2 = vcmask 261120   ;;  %vm1186_vm3 = vcmask 785408  }
 0x586   : > { %1427 = dma.vmem_to_hbm [thread:$0]  (%p1733_p5), %s1225_s25, 4096, %s1227_s27, %s1209_s29, %s1678_s28, %s1678_s28, %s1679_s6   ;;  %v1082_v60 = vpop.permute.xlu0 %1081  ;;  %v1086_v1 = vpop.permute.xlu1 %1085  ;;  %v1171_v15 = vsel %vm1169_vm2, %v2000_v7, %v1084_v20 }
 0x587   : > { %v1172_v6 = vsel %vm1169_vm2, %v2010_v12, %v1086_v1  ;;  %v1170_v7 = vsel %vm1169_vm2, %v1992_v63, %v1082_v60 }
 0x58b   : > { %1159 = vrot.lane.b32.xlu0 %v1070_v59, %s1669_s26  ;;  %s2368_s26 = scalar_lea.vmem %s2426_s1, %s1416_s22 }
 0x58d   : > { %v1090_v40 = vpop.permute.xlu2 %1089 }
 0x58e   : > { %v1088_v31 = vpop.permute.xlu0 %1087  ;;  %v1094_v33 = vpop.permute.xlu1 %1093  ;;  %v1174_v43 = vsel %vm1169_vm2, %v2024_v17, %v1090_v40 }
 0x58f   : > { %v1173_v17 = vsel %vm1169_vm2, %v2014_v14, %v1088_v31  ;;  %v1176_v61 = vsel %vm1169_vm2, %v2037_v25, %v1094_v33 }
 0x595   : > { %v1096_v62 = vpop.permute.xlu2 %1095 }
 0x596   : > { %v1092_v46 = vpop.permute.xlu0 %1091  ;;  %v1177_v16 = vsel %vm1169_vm2, %v2054_v32, %v1096_v62 }
 0x597   : > { %v1175_v51 = vsel %vm1169_vm2, %v2031_v19, %v1092_v46 }
 0x59d   : > { %v1146_v30 = vpop.permute.xlu2 %1145 }
 0x59e   : > { %v1148_v12 = vpop.permute.xlu0 %1147 }
 0x5bd   : > { %v1152_v22 = vpop.permute.xlu2 %1151 }
 0x5c5   : > { %v1118_v0 = vpop.permute.xlu2 %1117 }
 0x5c6   : > { %v1180_v49 = vsel %vm246_vm1, %v1172_v6, %v1118_v0 }
 0x5cd   : > { %v1150_v56 = vpop.permute.xlu1 %1149  ;;  %v1124_v13 = vpop.permute.xlu2 %1123 }
 0x5ce   : > { %v1189_v8 = vsel %vm1186_vm3, %v1180_v49, %v1150_v56  ;;  %v1183_v42 = vsel %vm246_vm1, %v1175_v51, %v1124_v13 }
 0x5cf   : > { %1197 = vst [vmem:[%s2368_s26 + $0x10] sm:$0xff] %v1189_v8 }
 0x5d5   : > { %v1116_v52 = vpop.permute.xlu1 %1115  ;;  %v1158_v44 = vpop.permute.xlu2 %1157 }
 0x5d6   : > { %v1179_v24 = vsel %vm246_vm1, %v1171_v15, %v1116_v52 }
 0x5d7   : > { %v1188_v54 = vsel %vm1186_vm3, %v1179_v24, %v1148_v12 }
 0x5d8   : > { %1196 = vst [vmem:[%s2368_s26 + $0x8] sm:$0xff] %v1188_v54 }
 0x5dd   : > { %v1154_v26 = vpop.permute.xlu0 %1153 }
 0x5de   : > { %v1122_v9 = vpop.permute.xlu1 %1121 }
 0x5df   : > { %v1182_v38 = vsel %vm246_vm1, %v1174_v43, %v1122_v9 }
 0x5e0   : > { %v1191_v10 = vsel %vm1186_vm3, %v1182_v38, %v1154_v26 }
 0x5e1   : > { %1199 = vst [vmem:[%s2368_s26 + $0x20] sm:$0xff] %v1191_v10 }
 0x5e5   : > { %v1114_v48 = vpop.permute.xlu0 %1113 }
 0x5e6   : > { %v1178_v11 = vsel %vm246_vm1, %v1170_v7, %v1114_v48  ;;  %v1128_v47 = vpop.permute.xlu1 %1127 }
 0x5e7   : > { %v1187_v23 = vsel %vm1186_vm3, %v1178_v11, %v1146_v30  ;;  %v1185_v29 = vsel %vm246_vm1, %v1177_v16, %v1128_v47 }
 0x5e8   : > { %1195 = vst [vmem:[%s2368_s26] sm:$0xff] %v1187_v23 }
 0x5ed   : > { %v1120_v37 = vpop.permute.xlu0 %1119 }
 0x5ee   : > { %v1181_v63 = vsel %vm246_vm1, %v1173_v17, %v1120_v37  ;;  %v1156_v39 = vpop.permute.xlu1 %1155 }
 0x5ef   : > { %v1190_v53 = vsel %vm1186_vm3, %v1181_v63, %v1152_v22  ;;  %v1192_v28 = vsel %vm1186_vm3, %v1183_v42, %v1156_v39 }
 0x5f0   : > { %1198 = vst [vmem:[%s2368_s26 + $0x18] sm:$0xff] %v1190_v53 }
 0x5f1   : > { %1200 = vst [vmem:[%s2368_s26 + $0x28] sm:$0xff] %v1192_v28 }
 0x5f5   : > { %v1126_v14 = vpop.permute.xlu0 %1125 }
 0x5f6   : > { %v1184_v19 = vsel %vm246_vm1, %v1176_v61, %v1126_v14 }
 0x5f7   : > { %v1193_v3 = vsel %vm1186_vm3, %v1184_v19, %v1158_v44 }
 0x5f8   : > { %1201 = vst [vmem:[%s2368_s26 + $0x30] sm:$0xff] %v1193_v3 }
 0x5fd   : > { %v1160_v45 = vpop.permute.xlu0 %1159 }
 0x5fe   : > { %v1194_v36 = vsel %vm1186_vm3, %v1185_v29, %v1160_v45 }
 0x5ff   : > { %1202 = vst [vmem:[%s2368_s26 + $0x38] sm:$0xff] %v1194_v36 }
 0x600 PF: > { %p1433_p4 = scmp.ge.s32.totalorder %s1667_s12, 2  ;;  %s1249_s21 = sand.u32 1, %s1655_s9  }
 0x601   : > { %s1250_s22 = scalar_lea.sflag [#allocation3], %s1249_s21 }
 0x602   : > { %p1430_p5 = pnand %p1433_p4, %p1737_p6 }
 0x604   : > { %p1431_p7 = pneg %p1430_p5 }
 0x606   : > { %1650 = dma.done.wait (%p1431_p7), %s1250_s22, 4096  }
 0x607   : > { %1652 = vsyncadd (%p1431_p7), %s1250_s22, 4294963200  ;;  %p13_p8 = scmp.ge.s32.totalorder %s1720_s15, 4   ;;  %s2430_s9 = smov %s1659_s10 }
 0x608   : > { %s2431_s10 = smov %s1663_s11  ;;  %s2432_s11 = smov %s1731_s18 }
 0x609   : > { %s2433_s12 = smov %s1720_s15  ;;  %15 = sbr.rel (!%p13_p8) target bundleno = 3 (0x3), region = 74 }
 0x60e   :  { %1256 = vsyncpa [#allocation3], 1 }
 0x60f   :  { %1258 = vsyncpa [#allocation3 + $0x1], 1 }

// kernel: encoder_layer_forward.5
= control target key start
LH: loop header
LB: loop body
LE: loop exit
PB: predicated region body
PF: predicated region fallthrough
CT: control target
= control target key end

     0   :  { %s1726_s12 = smov 0   ;;  %s2424_s0 = inlined_call_operand.vmem [shape: f32[2,10,10,32], index: 0, kind: input, shape index: {}]   ;;  %s2425_s1 = inlined_call_operand.vmem [shape: bf16[9,32,256], index: 1, kind: input, shape index: {}]   ;;  %s2426_s2 = inlined_call_operand.vmem [shape: f32[1,256], index: 2, kind: input, shape index: {}]   ;;  %s2427_s3 = inlined_call_operand.vmem [shape: bf16[2,64,256], index: 3, kind: output, shape index: {}]  }
   0x1 LB: > { %s1342_s13 = sadd.s32 4294967295, %s1704_s12   ;;  %p1346_p0 = scmp.ge.s32.totalorder %s1704_s12, 1  ;;  %s1704_s12 = sphi %s1726_s12, %s13_s12  }
   0x2   : > { %p137_p1 = scmp.lt.s32.totalorder %s1704_s12, 3 }
   0x4   : > { %p138_p2 = pnand %p1346_p0, %p137_p1 }
   0x5   : > { %p161_p3 = scmp.lt.s32.totalorder (!%p138_p2), %s1342_s13, 1 }
   0x6   : > { %141 = sbr.rel (%p138_p2) target bundleno = 446 (0x1be), region = 32 }
   0xb   : > { %v1364_v0 = vld [vmem:[%s2425_s1 + $0x30] sm:$0xf]  ;;  %v1656_v1 = vld [vmem:[%s2425_s1 + $0x34] sm:$0xf0]  ;;  %v1655_v2 = vld [vmem:[%s2425_s1 + $0x34] sm:$0xf] }
   0xc   : > { %v1365_v3 = vor.u32 %v1656_v1, %v1364_v0  ;;  %v1366_v4 = vld [vmem:[%s2425_s1 + $0x38] sm:$0xf0]  ;;  %v1356_v5 = vld [vmem:[%s2425_s1 + $0x20] sm:$0xf]  ;;  %v1654_v6 = vld [vmem:[%s2425_s1 + $0x24] sm:$0xf0] }
   0xd   : > { %v1369_v7 = vor.u32 %v1655_v2, %v1366_v4  ;;  %v1653_v8 = vld [vmem:[%s2425_s1 + $0x24] sm:$0xf]  ;;  %v1358_v9 = vld [vmem:[%s2425_s1 + $0x28] sm:$0xf0]  ;;  %v1357_v10 = vor.u32 %v1654_v6, %v1356_v5  ;;  %v1388_v11 = vld [vmem:[%s2425_s1 + $0x10] sm:$0xf] }
   0xe   : > { %244 = vmatpush.bf16.msra.mxu0 %v1365_v3  ;;  %1685 = vmatpush.bf16.msra.mxu2 %v1365_v3  ;;  %v1652_v12 = vld [vmem:[%s2425_s1 + $0x14] sm:$0xf0]  ;;  %v1651_v13 = vld [vmem:[%s2425_s1 + $0x14] sm:$0xf]  ;;  %v1361_v14 = vor.u32 %v1653_v8, %v1358_v9  ;;  %s2429_s13 = smov (!%p161_p3, %s1342_s13), 1  ;;  %vm225_vm0 = vcmask 261120  }
   0xf   : > { %273 = vmatpush.bf16.msra.mxu1 %v1369_v7  ;;  %1687 = vmatpush.bf16.msra.mxu3 %v1369_v7  ;;  %v1390_v15 = vld [vmem:[%s2425_s1 + $0x18] sm:$0xf0]  ;;  %v1416_v16 = vld [vmem:[%s2425_s1 + $0x50] sm:$0xf]  ;;  %v1389_v17 = vor.u32 %v1652_v12, %v1388_v11  ;;  %v1660_v19 = vld [vmem:[%s2425_s1 + $0x54] sm:$0xf0] }
  0x10   : > { %v1393_v18 = vor.u32 %v1651_v13, %v1390_v15  ;;  %v1659_v20 = vld [vmem:[%s2425_s1 + $0x54] sm:$0xf]  ;;  %v1418_v21 = vld [vmem:[%s2425_s1 + $0x58] sm:$0xf0]  ;;  %s1689_s21 = smul.u32 160, %s2429_s13  ;;  %v1417_v22 = vor.u32 %v1660_v19, %v1416_v16  ;;  %s1648_s17 = sshll.u32 %s2429_s13, 6 }
  0x11   : > { %v1421_v23 = vor.u32 %v1659_v20, %v1418_v21  ;;  %v1380_v24 = vld [vmem:[%s2425_s1] sm:$0xf]  ;;  %v1650_v25 = vld [vmem:[%s2425_s1 + $0x4] sm:$0xf0]  ;;  %v1649_v26 = vld [vmem:[%s2425_s1 + $0x4] sm:$0xf]  ;;  %s2363_s20 = scalar_lea.vmem %s2427_s3, %s1648_s17 }
  0x12   : > { %245 = vmatpush.bf16.msra.mxu0 %v1357_v10  ;;  %1686 = vmatpush.bf16.msra.mxu2 %v1357_v10  ;;  %v1382_v27 = vld [vmem:[%s2425_s1 + $0x8] sm:$0xf0]  ;;  %v1408_v28 = vld [vmem:[%s2425_s1 + $0x40] sm:$0xf]  ;;  %s1803_s7 = scalar_lea.vmem %s2424_s0, %s1689_s21  ;;  %v1658_v29 = vld [vmem:[%s2425_s1 + $0x44] sm:$0xf0]  ;;  %v1381_v37 = vor.u32 %v1650_v25, %v1380_v24 }
  0x13   : > { %274 = vmatpush.bf16.msra.mxu1 %v1361_v14  ;;  %1688 = vmatpush.bf16.msra.mxu3 %v1361_v14  ;;  %v1657_v30 = vld [vmem:[%s2425_s1 + $0x44] sm:$0xf]  ;;  %v1410_v31 = vld [vmem:[%s2425_s1 + $0x48] sm:$0xf0]  ;;  %v1816_v33 = vld [vmem:[%s1803_s7 + $0x11] sm:$0xff]  ;;  %v1385_v38 = vor.u32 %v1649_v26, %v1382_v27  ;;  %v1409_v40 = vor.u32 %v1658_v29, %v1408_v28 }
  0x14   : > { %v188_v32 = vld [vmem:[%s1803_s7 + $0x1] sm:$0xff]  ;;  %v1823_v36 = vld [vmem:[%s1803_s7 + $0x51] sm:$0xff]  ;;  %v1413_v41 = vor.u32 %v1657_v30, %v1410_v31  ;;  %v1454_v46 = vld [vmem:[%s2425_s1 + $0x78] sm:$0xf0] }
  0x15   : > { %v1819_v34 = vld [vmem:[%s1803_s7 + $0x41] sm:$0xff]  ;;  %v196_v35 = vpack.c.bf16 %v1816_v33, %v188_v32  ;;  %v1452_v42 = vld [vmem:[%s2425_s1 + $0x70] sm:$0xf]  ;;  %v1664_v43 = vld [vmem:[%s2425_s1 + $0x74] sm:$0xf0] }
  0x16   : > { %334 = vmatpush.bf16.msrb.mxu2 %v1389_v17  ;;  %441 = vmatpush.bf16.msrb.mxu0 %v1417_v22  ;;  %v1827_v39 = vpack.c.bf16 %v1823_v36, %v1819_v34  ;;  %v1663_v44 = vld [vmem:[%s2425_s1 + $0x74] sm:$0xf]  ;;  %v1453_v45 = vor.u32 %v1664_v43, %v1452_v42  ;;  %v1488_v47 = vld [vmem:[%s2425_s1 + $0x90] sm:$0xf]  ;;  %v1668_v48 = vld [vmem:[%s2425_s1 + $0x94] sm:$0xf0] }
  0x17   : > { %363 = vmatpush.bf16.msrb.mxu3 %v1393_v18  ;;  %470 = vmatpush.bf16.msrb.mxu1 %v1421_v23  ;;  %v1457_v49 = vor.u32 %v1663_v44, %v1454_v46  ;;  %v1489_v50 = vor.u32 %v1668_v48, %v1488_v47  ;;  %v1667_v51 = vld [vmem:[%s2425_s1 + $0x94] sm:$0xf]  ;;  %v1490_v52 = vld [vmem:[%s2425_s1 + $0x98] sm:$0xf0]  ;;  %v1860_v54 = vld [vmem:[%s1803_s7 + $0x21] sm:$0xff] }
  0x18   : > { %1370 = vmatmul.msk.bf16.vlgmr.msra.gmra.mxu0 %vm225_vm0, %v196_v35  ;;  %1374 = vmatmul.msk.bf16.vlgmr.msra.gmra.mxu1 %vm225_vm0, %v196_v35  ;;  %v1493_v53 = vor.u32 %v1667_v51, %v1490_v52  ;;  %v1863_v55 = vld [vmem:[%s1803_s7 + $0x31] sm:$0xff]  ;;  %v1866_v56 = vld [vmem:[%s1803_s7 + $0x61] sm:$0xff]  ;;  %v1446_v6 = vld [vmem:[%s2425_s1 + $0x68] sm:$0xf0]  ;;  %v641_v48 = vpack.c.bf16 %v1860_v54, %v1816_v33 }
  0x19   : > { %1372 = vmatmul.msk.bf16.vlgmr.msra.gmra.mxu2 %vm225_vm0, %v1827_v39  ;;  %1376 = vmatmul.msk.bf16.vlgmr.msra.gmra.mxu3 %vm225_vm0, %v1827_v39  ;;  %v1869_v57 = vld [vmem:[%s1803_s7 + $0x71] sm:$0xff]  ;;  %v1873_v58 = vpack.c.bf16 %v1863_v55, %v1860_v54  ;;  %v386_v60 = vld [vmem:[%s1803_s7 + $0x2] sm:$0xff]  ;;  %v1482_v12 = vld [vmem:[%s2425_s1 + $0x88] sm:$0xf0] }
  0x1a   : > { %335 = vmatpush.bf16.msrb.mxu2 %v1381_v37  ;;  %442 = vmatpush.bf16.msrb.mxu0 %v1409_v40  ;;  %v1877_v59 = vpack.c.bf16 %v1869_v57, %v1866_v56  ;;  %v1889_v61 = vld [vmem:[%s1803_s7 + $0x12] sm:$0xff]  ;;  %v172_v62 = vld [vmem:[%s1803_s7] sm:$0xff]  ;;  %v1662_v3 = vld [vmem:[%s2425_s1 + $0x64] sm:$0xf0] }
  0x1b   : > { %364 = vmatpush.bf16.msrb.mxu3 %v1385_v38  ;;  %471 = vmatpush.bf16.msrb.mxu1 %v1413_v41  ;;  %v1893_v63 = vld [vmem:[%s1803_s7 + $0x10] sm:$0xff]  ;;  %v394_v0 = vpack.c.bf16 %v1889_v61, %v386_v60  ;;  %v1444_v2 = vld [vmem:[%s2425_s1 + $0x60] sm:$0xf]  ;;  %v1661_v4 = vld [vmem:[%s2425_s1 + $0x64] sm:$0xf] }
  0x1c   : > { %v180_v1 = vpack.c.bf16 %v1893_v63, %v172_v62  ;;  %v1445_v5 = vor.u32 %v1662_v3, %v1444_v2  ;;  %v1480_v7 = vld [vmem:[%s2425_s1 + $0x80] sm:$0xf]  ;;  %v1666_v8 = vld [vmem:[%s2425_s1 + $0x84] sm:$0xf0]  ;;  %v1449_v9 = vor.u32 %v1661_v4, %v1446_v6  ;;  %v1665_v11 = vld [vmem:[%s2425_s1 + $0x84] sm:$0xf]  ;;  %v642_v3 = vpack.c.bf16 %v1819_v34, %v1863_v55 }
  0x1d   : > { %v1481_v10 = vor.u32 %v1666_v8, %v1480_v7  ;;  %v1485_v13 = vor.u32 %v1665_v11, %v1482_v12  ;;  %v1926_v14 = vld [vmem:[%s1803_s7 + $0x22] sm:$0xff]  ;;  %v1929_v15 = vld [vmem:[%s1803_s7 + $0x32] sm:$0xff]  ;;  %v1526_v30 = vld [vmem:[%s2425_s1 + $0xb8] sm:$0xf0] }
  0x1e   : > { %565 = vmatpush.bf16.msra.mxu2 %v1453_v45  ;;  %688 = vmatpush.bf16.msra.mxu0 %v1489_v50  ;;  %v174_v16 = vld [vmem:[%s1803_s7 + $0x20] sm:$0xff]  ;;  %v1933_v17 = vld [vmem:[%s1803_s7 + $0x30] sm:$0xff]  ;;  %v1937_v18 = vpack.c.bf16 %v1929_v15, %v1926_v14  ;;  %v1672_v27 = vld [vmem:[%s2425_s1 + $0xb4] sm:$0xf0] }
  0x1f   : > { %594 = vmatpush.bf16.msra.mxu3 %v1457_v49  ;;  %717 = vmatpush.bf16.msra.mxu1 %v1493_v53  ;;  %v1940_v19 = vpack.c.bf16 %v1933_v17, %v174_v16  ;;  %v1951_v20 = vld [vmem:[%s1803_s7 + $0x42] sm:$0xff]  ;;  %v1954_v21 = vld [vmem:[%s1803_s7 + $0x52] sm:$0xff]  ;;  %v1562_v40 = vld [vmem:[%s2425_s1 + $0xd8] sm:$0xf0]  ;;  %v518_v49 = vpack.c.bf16 %v174_v16, %v1893_v63 }
  0x20   : > { %v176_v22 = vld [vmem:[%s1803_s7 + $0x40] sm:$0xff]  ;;  %v1958_v23 = vld [vmem:[%s1803_s7 + $0x50] sm:$0xff]  ;;  %v1962_v24 = vpack.c.bf16 %v1954_v21, %v1951_v20  ;;  %v1676_v32 = vld [vmem:[%s2425_s1 + $0xd4] sm:$0xf0] }
  0x21   : > { %v1965_v25 = vpack.c.bf16 %v1958_v23, %v176_v22  ;;  %v1524_v26 = vld [vmem:[%s2425_s1 + $0xb0] sm:$0xf]  ;;  %v1671_v28 = vld [vmem:[%s2425_s1 + $0xb4] sm:$0xf]  ;;  %v2000_v42 = vld [vmem:[%s1803_s7 + $0x62] sm:$0xff]  ;;  %v519_v4 = vpack.c.bf16 %v176_v22, %v1933_v17 }
  0x22   : > { %566 = vmatpush.bf16.msra.mxu2 %v1445_v5  ;;  %689 = vmatpush.bf16.msra.mxu0 %v1481_v10  ;;  %v1525_v29 = vor.u32 %v1672_v27, %v1524_v26  ;;  %v1560_v31 = vld [vmem:[%s2425_s1 + $0xd0] sm:$0xf]  ;;  %v1529_v35 = vor.u32 %v1671_v28, %v1526_v30  ;;  %v1675_v38 = vld [vmem:[%s2425_s1 + $0xd4] sm:$0xf]  ;;  %v178_v44 = vld [vmem:[%s1803_s7 + $0x60] sm:$0xff]  ;;  %v643_v5 = vpack.c.bf16 %v1866_v56, %v1823_v36 }
  0x23   : > { %595 = vmatpush.bf16.msra.mxu3 %v1449_v9  ;;  %718 = vmatpush.bf16.msra.mxu1 %v1485_v13  ;;  %v1561_v37 = vor.u32 %v1676_v32, %v1560_v31  ;;  %v1565_v41 = vor.u32 %v1675_v38, %v1562_v40  ;;  %v2003_v43 = vld [vmem:[%s1803_s7 + $0x72] sm:$0xff]  ;;  %v1516_v50 = vld [vmem:[%s2425_s1 + $0xa0] sm:$0xf]  ;;  %v1670_v51 = vld [vmem:[%s2425_s1 + $0xa4] sm:$0xf0]  ;;  %v520_v8 = vpack.c.bf16 %v178_v44, %v1958_v23 }
  0x24   : > { %v2007_v45 = vld [vmem:[%s1803_s7 + $0x70] sm:$0xff]  ;;  %v2011_v46 = vpack.c.bf16 %v2003_v43, %v2000_v42  ;;  %v1669_v33 = vld [vmem:[%s2425_s1 + $0xa4] sm:$0xf]  ;;  %v1517_v52 = vor.u32 %v1670_v51, %v1516_v50  ;;  %v1518_v53 = vld [vmem:[%s2425_s1 + $0xa8] sm:$0xf0] }
  0x25   : > { %v2014_v47 = vpack.c.bf16 %v2007_v45, %v178_v44  ;;  %v1521_v54 = vor.u32 %v1669_v33, %v1518_v53  ;;  %v1552_v60 = vld [vmem:[%s2425_s1 + $0xc0] sm:$0xf]  ;;  %v1674_v62 = vld [vmem:[%s2425_s1 + $0xc4] sm:$0xf0]  ;;  %v1673_v63 = vld [vmem:[%s2425_s1 + $0xc4] sm:$0xf]  ;;  %v764_v33 = vpack.c.bf16 %v1926_v14, %v1889_v61 }
  0x26   : > { %v1596_v34 = vld [vmem:[%s2425_s1 + $0xf0] sm:$0xf]  ;;  %v1680_v36 = vld [vmem:[%s2425_s1 + $0xf4] sm:$0xf0]  ;;  %v1679_v55 = vld [vmem:[%s2425_s1 + $0xf4] sm:$0xf] }
  0x27   : > { %v1597_v56 = vor.u32 %v1680_v36, %v1596_v34  ;;  %v1598_v9 = vld [vmem:[%s2425_s1 + $0xf8] sm:$0xf0]  ;;  %v1632_v17 = vld [vmem:[%s2425_s1 + $0x110] sm:$0xf]  ;;  %v1684_v22 = vld [vmem:[%s2425_s1 + $0x114] sm:$0xf0] }
  0x28   : > { %1371 = vmatmul.msk.bf16.gmra.mxu0 %vm225_vm0, %v1873_v58  ;;  %1375 = vmatmul.msk.bf16.gmra.mxu1 %vm225_vm0, %v1873_v58  ;;  %v1601_v10 = vor.u32 %v1679_v55, %v1598_v9  ;;  %v1683_v23 = vld [vmem:[%s2425_s1 + $0x114] sm:$0xf]  ;;  %v1633_v26 = vor.u32 %v1684_v22, %v1632_v17  ;;  %v1634_v27 = vld [vmem:[%s2425_s1 + $0x118] sm:$0xf0]  ;;  %v2101_v30 = vld [vmem:[%s1803_s7 + $0x80] sm:$0xff] }
  0x29   : > { %1373 = vmatmul.msk.bf16.gmra.mxu2 %vm225_vm0, %v1877_v59  ;;  %1377 = vmatmul.msk.bf16.gmra.mxu3 %vm225_vm0, %v1877_v59  ;;  %v1637_v28 = vor.u32 %v1683_v23, %v1634_v27  ;;  %v521_v40 = vpack.c.bf16 %v2101_v30, %v2007_v45  ;;  %v1678_v53 = vld [vmem:[%s2425_s1 + $0xe4] sm:$0xf0]  ;;  %v1677_v61 = vld [vmem:[%s2425_s1 + $0xe4] sm:$0xf]  ;;  %v765_v23 = vpack.c.bf16 %v1951_v20, %v1929_v15 }
  0x38   : > { %1422 = vmatmul.msk.bf16.vlgmr.msrb.gmra.mxu0 %vm225_vm0, %v394_v0  ;;  %1426 = vmatmul.msk.bf16.vlgmr.msrb.gmra.mxu1 %vm225_vm0, %v394_v0  ;;  %v1553_v0 = vor.u32 %v1674_v62, %v1552_v60 }
  0x39   : > { %1394 = vmatmul.msk.bf16.vlgmr.msrb.gmra.mxu2 %vm225_vm0, %v180_v1  ;;  %1398 = vmatmul.msk.bf16.vlgmr.msrb.gmra.mxu3 %vm225_vm0, %v180_v1  ;;  %v1554_v1 = vld [vmem:[%s2425_s1 + $0xc8] sm:$0xf0] }
  0x3a   : > { %811 = vmatpush.bf16.msrb.mxu2 %v1525_v29  ;;  %840 = vmatpush.bf16.msrb.mxu3 %v1529_v35  ;;  %v1557_v2 = vor.u32 %v1673_v63, %v1554_v1  ;;  %v2098_v29 = vld [vmem:[%s1803_s7 + $0x81] sm:$0xff] }
  0x3b   : > { %935 = vmatpush.bf16.msrb.mxu0 %v1561_v37  ;;  %964 = vmatpush.bf16.msrb.mxu1 %v1565_v41  ;;  %v644_v35 = vpack.c.bf16 %v2098_v29, %v1869_v57 }
  0x3e   : > { %812 = vmatpush.bf16.msrb.mxu2 %v1517_v52  ;;  %841 = vmatpush.bf16.msrb.mxu3 %v1521_v54  ;;  %v1588_v52 = vld [vmem:[%s2425_s1 + $0xe0] sm:$0xf] }
  0x3f   : > { %936 = vmatpush.bf16.msrb.mxu0 %v1553_v0  ;;  %965 = vmatpush.bf16.msrb.mxu1 %v1557_v2  ;;  %v1589_v14 = vor.u32 %v1678_v53, %v1588_v52 }
  0x48   : > { %1423 = vmatmul.msk.bf16.gmra.mxu0 %vm225_vm0, %v1937_v18  ;;  %1427 = vmatmul.msk.bf16.gmra.mxu1 %vm225_vm0, %v1937_v18 }
  0x49   : > { %1395 = vmatmul.msk.bf16.gmra.mxu2 %vm225_vm0, %v1940_v19  ;;  %1399 = vmatmul.msk.bf16.gmra.mxu3 %vm225_vm0, %v1940_v19 }
  0x58   : > { %1424 = vmatmul.msk.bf16.gmra.mxu0 %vm225_vm0, %v1962_v24  ;;  %1428 = vmatmul.msk.bf16.gmra.mxu1 %vm225_vm0, %v1962_v24 }
  0x59   : > { %1396 = vmatmul.msk.bf16.gmra.mxu2 %vm225_vm0, %v1965_v25  ;;  %1400 = vmatmul.msk.bf16.gmra.mxu3 %vm225_vm0, %v1965_v25 }
  0x68   : > { %1425 = vmatmul.msk.bf16.gmra.mxu0 %vm225_vm0, %v2011_v46  ;;  %1429 = vmatmul.msk.bf16.gmra.mxu1 %vm225_vm0, %v2011_v46 }
  0x69   : > { %1397 = vmatmul.msk.bf16.gmra.mxu2 %vm225_vm0, %v2014_v47  ;;  %1401 = vmatmul.msk.bf16.gmra.mxu3 %vm225_vm0, %v2014_v47 }
  0x78   : > { %1494 = vmatmul.msk.bf16.vlgmr.msra.gmra.mxu0 %vm225_vm0, %v641_v48  ;;  %1498 = vmatmul.msk.bf16.vlgmr.msra.gmra.mxu1 %vm225_vm0, %v641_v48 }
  0x79   : > { %1458 = vmatmul.msk.bf16.vlgmr.msra.gmra.mxu2 %vm225_vm0, %v518_v49  ;;  %1462 = vmatmul.msk.bf16.vlgmr.msra.gmra.mxu3 %vm225_vm0, %v518_v49 }
  0x7a   : > { %1058 = vmatpush.bf16.msra.mxu2 %v1597_v56  ;;  %1087 = vmatpush.bf16.msra.mxu3 %v1601_v10 }
  0x7b   : > { %1181 = vmatpush.bf16.msra.mxu0 %v1633_v26  ;;  %1210 = vmatpush.bf16.msra.mxu1 %v1637_v28 }
  0x7e   : > { %1059 = vmatpush.bf16.msra.mxu2 %v1589_v14  ;;  %v766_v14 = vpack.c.bf16 %v2000_v42, %v1954_v21 }
  0x88   : > { %1495 = vmatmul.msk.bf16.gmra.mxu0 %vm225_vm0, %v642_v3  ;;  %1499 = vmatmul.msk.bf16.gmra.mxu1 %vm225_vm0, %v642_v3  ;;  %v1624_v3 = vld [vmem:[%s2425_s1 + $0x100] sm:$0xf] }
  0x89   : > { %1459 = vmatmul.msk.bf16.gmra.mxu2 %vm225_vm0, %v519_v4  ;;  %1463 = vmatmul.msk.bf16.gmra.mxu3 %vm225_vm0, %v519_v4  ;;  %v1682_v4 = vld [vmem:[%s2425_s1 + $0x104] sm:$0xf0] }
  0x95   : > { %v247_v6 = vpop.f32.mrf.mxu0  ;;  %v276_v7 = vpop.f32.mrf.mxu1 }
  0x98   : > { %1496 = vmatmul.msk.bf16.gmra.mxu0 %vm225_vm0, %v643_v5  ;;  %1500 = vmatmul.msk.bf16.gmra.mxu1 %vm225_vm0, %v643_v5  ;;  %v1681_v5 = vld [vmem:[%s2425_s1 + $0x104] sm:$0xf] }
  0x99   : > { %1460 = vmatmul.msk.bf16.gmra.mxu2 %vm225_vm0, %v520_v8  ;;  %1464 = vmatmul.msk.bf16.gmra.mxu3 %vm225_vm0, %v520_v8  ;;  %v1625_v8 = vor.u32 %v1682_v4, %v1624_v3 }
  0x9b   : > { %1182 = vmatpush.bf16.msra.mxu0 %v1625_v8 }
  0x9c   : > { %v2081_v11 = vpop.f32.mrf.mxu2  ;;  %v2083_v12 = vpop.f32.mrf.mxu3 }
  0x9d   : > { %v249_v13 = vpop.f32.mrf.mxu0  ;;  %v278_v16 = vpop.f32.mrf.mxu1 }
  0xa4   : > { %v2103_v31 = vpop.f32.mrf.mxu2  ;;  %v2105_v32 = vpop.f32.mrf.mxu3 }
  0xa5   : > { %v252_v37 = vpop.f32.mrf.mxu0  ;;  %v281_v38 = vpop.f32.mrf.mxu1 }
  0xa8   : > { %1497 = vmatmul.msk.bf16.gmra.mxu0 %vm225_vm0, %v644_v35  ;;  %1501 = vmatmul.msk.bf16.gmra.mxu1 %vm225_vm0, %v644_v35 }
  0xa9   : > { %1461 = vmatmul.msk.bf16.gmra.mxu2 %vm225_vm0, %v521_v40  ;;  %1465 = vmatmul.msk.bf16.gmra.mxu3 %vm225_vm0, %v521_v40 }
  0xac   : > { %v2115_v41 = vpop.f32.mrf.mxu2  ;;  %v2117_v44 = vpop.f32.mrf.mxu3 }
  0xad   : > { %v254_v48 = vpop.f32.mrf.mxu0  ;;  %v283_v49 = vpop.f32.mrf.mxu1 }
  0xb4   : > { %v2119_v57 = vpop.f32.mrf.mxu2  ;;  %v2121_v50 = vpop.f32.mrf.mxu3 }
  0xb5   : > { %v444_v51 = vpop.f32.mrf.mxu0  ;;  %v473_v45 = vpop.f32.mrf.mxu1 }
  0xb8   : > { %1566 = vmatmul.msk.bf16.vlgmr.msrb.gmra.mxu0 %vm225_vm0, %v1940_v19  ;;  %1570 = vmatmul.msk.bf16.vlgmr.msrb.gmra.mxu1 %vm225_vm0, %v1940_v19  ;;  %v1590_v19 = vld [vmem:[%s2425_s1 + $0xe8] sm:$0xf0] }
  0xb9   : > { %1530 = vmatmul.msk.bf16.vlgmr.msrb.gmra.mxu2 %vm225_vm0, %v764_v33  ;;  %1534 = vmatmul.msk.bf16.vlgmr.msrb.gmra.mxu3 %vm225_vm0, %v764_v33  ;;  %v1593_v54 = vor.u32 %v1677_v61, %v1590_v19 }
  0xbb   : > { %1088 = vmatpush.bf16.msra.mxu3 %v1593_v54 }
  0xbc   : > { %v337_v60 = vpop.f32.mrf.mxu2  ;;  %v366_v62 = vpop.f32.mrf.mxu3 }
  0xbd   : > { %v338_v63 = vadd.f32 %v337_v60, %v247_v6  ;;  %v367_v0 = vadd.f32 %v366_v62, %v276_v7  ;;  %v446_v1 = vpop.f32.mrf.mxu0  ;;  %v475_v2 = vpop.f32.mrf.mxu1  ;;  %v1626_v6 = vld [vmem:[%s2425_s1 + $0x108] sm:$0xf0] }
  0xbe   : > { %v1629_v7 = vor.u32 %v1681_v5, %v1626_v6 }
  0xbf   : > { %v2155_v34 = vadd.f32 %v444_v51, %v338_v63  ;;  %v2157_v36 = vadd.f32 %v473_v45, %v367_v0  ;;  %v1545_v63 = vld [vmem:[%s1803_s7 + $0x90] sm:$0xff]  ;;  %v2195_v0 = vld [vmem:[%s1803_s7 + $0x82] sm:$0xff] }
  0xc0   : > { %1211 = vmatpush.bf16.msra.mxu1 %v1629_v7 }
  0xc4   : > { %v339_v55 = vpop.f32.mrf.mxu2  ;;  %v368_v56 = vpop.f32.mrf.mxu3 }
  0xc5   : > { %v340_v9 = vadd.f32 %v339_v55, %v249_v13  ;;  %v369_v10 = vadd.f32 %v368_v56, %v278_v16  ;;  %v449_v17 = vpop.f32.mrf.mxu0  ;;  %v478_v22 = vpop.f32.mrf.mxu1 }
  0xc7   : > { %v2161_v26 = vadd.f32 %v446_v1, %v340_v9  ;;  %v2163_v27 = vadd.f32 %v475_v2, %v369_v10  ;;  %v891_v2 = vpack.c.bf16 %v1545_v63, %v2101_v30 }
  0xc8   : > { %1567 = vmatmul.msk.bf16.gmra.mxu0 %vm225_vm0, %v1965_v25  ;;  %1571 = vmatmul.msk.bf16.gmra.mxu1 %vm225_vm0, %v1965_v25 }
  0xc9   : > { %1531 = vmatmul.msk.bf16.gmra.mxu2 %vm225_vm0, %v765_v23  ;;  %1535 = vmatmul.msk.bf16.gmra.mxu3 %vm225_vm0, %v765_v23 }
  0xcc   : > { %v342_v13 = vpop.f32.mrf.mxu2  ;;  %v371_v16 = vpop.f32.mrf.mxu3 }
  0xcd   : > { %v343_v28 = vadd.f32 %v342_v13, %v252_v37  ;;  %v372_v35 = vadd.f32 %v371_v16, %v281_v38  ;;  %v451_v40 = vpop.f32.mrf.mxu0  ;;  %v480_v15 = vpop.f32.mrf.mxu1 }
  0xcf   : > { %v2171_v20 = vadd.f32 %v449_v17, %v343_v28  ;;  %v2173_v51 = vadd.f32 %v478_v22, %v372_v35 }
  0xd4   : > { %v344_v45 = vpop.f32.mrf.mxu2  ;;  %v373_v33 = vpop.f32.mrf.mxu3 }
  0xd5   : > { %v345_v52 = vadd.f32 %v344_v45, %v254_v48  ;;  %v374_v53 = vadd.f32 %v373_v33, %v283_v49  ;;  %v454_v61 = vpop.f32.mrf.mxu0  ;;  %v483_v25 = vpop.f32.mrf.mxu1 }
  0xd7   : > { %v2177_v19 = vadd.f32 %v451_v40, %v345_v52  ;;  %v2179_v37 = vadd.f32 %v480_v15, %v374_v53 }
  0xd8   : > { %1568 = vmatmul.msk.bf16.gmra.mxu0 %vm225_vm0, %v2014_v47  ;;  %1572 = vmatmul.msk.bf16.gmra.mxu1 %vm225_vm0, %v2014_v47 }
  0xd9   : > { %1532 = vmatmul.msk.bf16.gmra.mxu2 %vm225_vm0, %v766_v14  ;;  %1536 = vmatmul.msk.bf16.gmra.mxu3 %vm225_vm0, %v766_v14 }
  0xdc   : > { %v347_v38 = vpop.f32.mrf.mxu2  ;;  %v376_v48 = vpop.f32.mrf.mxu3 }
  0xdd   : > { %v348_v49 = vadd.f32 %v347_v38, %v2081_v11  ;;  %v377_v21 = vadd.f32 %v376_v48, %v2083_v12  ;;  %v456_v42 = vpop.f32.mrf.mxu0  ;;  %v485_v54 = vpop.f32.mrf.mxu1  ;;  %v767_v12 = vpack.c.bf16 %v2195_v0, %v2003_v43 }
  0xdf   : > { %v2189_v60 = vadd.f32 %v454_v61, %v348_v49  ;;  %v2191_v62 = vadd.f32 %v483_v25, %v377_v21 }
  0xe4   : > { %v349_v47 = vpop.f32.mrf.mxu2  ;;  %v378_v1 = vpop.f32.mrf.mxu3 }
  0xe5   : > { %v350_v3 = vadd.f32 %v349_v47, %v2103_v31  ;;  %v379_v4 = vadd.f32 %v378_v1, %v2105_v32  ;;  %v459_v11 = vpop.f32.mrf.mxu0  ;;  %v488_v5 = vpop.f32.mrf.mxu1 }
  0xe7   : > { %v2202_v8 = vadd.f32 %v456_v42, %v350_v3  ;;  %v2204_v6 = vadd.f32 %v485_v54, %v379_v4 }
  0xe8   : > { %1569 = vmatmul.msk.bf16.gmra.mxu0 %vm225_vm0, %v891_v2  ;;  %1573 = vmatmul.msk.bf16.gmra.mxu1 %vm225_vm0, %v891_v2 }
  0xe9   : > { %1533 = vmatmul.msk.bf16.gmra.mxu2 %vm225_vm0, %v767_v12  ;;  %1537 = vmatmul.msk.bf16.gmra.mxu3 %vm225_vm0, %v767_v12 }
  0xec   : > { %v352_v30 = vpop.f32.mrf.mxu2  ;;  %v381_v31 = vpop.f32.mrf.mxu3 }
  0xed   : > { %v353_v32 = vadd.f32 %v352_v30, %v2115_v41  ;;  %v382_v7 = vadd.f32 %v381_v31, %v2117_v44  ;;  %v461_v55 = vpop.f32.mrf.mxu0  ;;  %v490_v43 = vpop.f32.mrf.mxu1  ;;  %v1617_v30 = vld [vmem:[%s1803_s7 + $0x92] sm:$0xff] }
  0xef   : > { %v2212_v56 = vadd.f32 %v459_v11, %v353_v32  ;;  %v2214_v9 = vadd.f32 %v488_v5, %v382_v7  ;;  %v1137_v7 = vpack.c.bf16 %v1617_v30, %v2195_v0 }
  0xf4   : > { %v354_v10 = vpop.f32.mrf.mxu2  ;;  %v383_v17 = vpop.f32.mrf.mxu3 }
  0xf5   : > { %v355_v22 = vadd.f32 %v354_v10, %v2119_v57  ;;  %v384_v23 = vadd.f32 %v383_v17, %v2121_v50  ;;  %v691_v13 = vpop.f32.mrf.mxu0  ;;  %v720_v16 = vpop.f32.mrf.mxu1 }
  0xf7   : > { %v2218_v28 = vadd.f32 %v461_v55, %v355_v22  ;;  %v2220_v35 = vadd.f32 %v490_v43, %v384_v23 }
  0xf8   : > { %1638 = vmatmul.msk.bf16.vlgmr.msra.gmra.mxu0 %vm225_vm0, %v1937_v18  ;;  %1642 = vmatmul.msk.bf16.vlgmr.msra.gmra.mxu1 %vm225_vm0, %v1937_v18 }
  0xf9   : > { %1602 = vmatmul.msk.bf16.vlgmr.msra.gmra.mxu2 %vm225_vm0, %v1873_v58  ;;  %1606 = vmatmul.msk.bf16.vlgmr.msra.gmra.mxu3 %vm225_vm0, %v1873_v58 }
  0xfc   : > { %v568_v41 = vpop.f32.mrf.mxu2  ;;  %v597_v44 = vpop.f32.mrf.mxu3 }
  0xfd   : > { %v617_v57 = vadd.f32 %v568_v41, %v2155_v34  ;;  %v618_v50 = vadd.f32 %v597_v44, %v2157_v36  ;;  %v693_v40 = vpop.f32.mrf.mxu0  ;;  %v722_v15 = vpop.f32.mrf.mxu1 }
  0xff   : > { %v2232_v45 = vadd.f32 %v691_v13, %v617_v57  ;;  %v2234_v33 = vadd.f32 %v720_v16, %v618_v50 }
 0x104   : > { %v570_v52 = vpop.f32.mrf.mxu2  ;;  %v599_v18 = vpop.f32.mrf.mxu3 }
 0x105   : > { %v619_v53 = vadd.f32 %v570_v52, %v2161_v26  ;;  %v620_v61 = vadd.f32 %v599_v18, %v2163_v27  ;;  %v696_v25 = vpop.f32.mrf.mxu0  ;;  %v725_v58 = vpop.f32.mrf.mxu1 }
 0x107   : > { %v2238_v14 = vadd.f32 %v693_v40, %v619_v53  ;;  %v2240_v38 = vadd.f32 %v722_v15, %v620_v61 }
 0x108   : > { %1639 = vmatmul.msk.bf16.gmra.mxu0 %vm225_vm0, %v1962_v24  ;;  %1643 = vmatmul.msk.bf16.gmra.mxu1 %vm225_vm0, %v1962_v24 }
 0x109   : > { %1603 = vmatmul.msk.bf16.gmra.mxu2 %vm225_vm0, %v1827_v39  ;;  %1607 = vmatmul.msk.bf16.gmra.mxu3 %vm225_vm0, %v1827_v39 }
 0x10c   : > { %v573_v34 = vpop.f32.mrf.mxu2  ;;  %v602_v36 = vpop.f32.mrf.mxu3 }
 0x10d   : > { %v621_v26 = vadd.f32 %v573_v34, %v2171_v20  ;;  %v622_v27 = vadd.f32 %v602_v36, %v2173_v51  ;;  %v698_v48 = vpop.f32.mrf.mxu0  ;;  %v727_v49 = vpop.f32.mrf.mxu1 }
 0x10f   : > { %v2252_v21 = vadd.f32 %v696_v25, %v621_v26  ;;  %v2254_v42 = vadd.f32 %v725_v58, %v622_v27 }
 0x114   : > { %v575_v54 = vpop.f32.mrf.mxu2  ;;  %v604_v24 = vpop.f32.mrf.mxu3 }
 0x115   : > { %v623_v63 = vadd.f32 %v575_v54, %v2177_v19  ;;  %v624_v47 = vadd.f32 %v604_v24, %v2179_v37  ;;  %v701_v1 = vpop.f32.mrf.mxu0  ;;  %v730_v39 = vpop.f32.mrf.mxu1 }
 0x117   : > { %v2258_v2 = vadd.f32 %v698_v48, %v623_v63  ;;  %v2260_v20 = vadd.f32 %v727_v49, %v624_v47 }
 0x118   : > { %1640 = vmatmul.msk.bf16.gmra.mxu0 %vm225_vm0, %v2011_v46  ;;  %1644 = vmatmul.msk.bf16.gmra.mxu1 %vm225_vm0, %v2011_v46  ;;  %v1581_v46 = vld [vmem:[%s1803_s7 + $0x91] sm:$0xff] }
 0x119   : > { %1604 = vmatmul.msk.bf16.gmra.mxu2 %vm225_vm0, %v1877_v59  ;;  %1608 = vmatmul.msk.bf16.gmra.mxu3 %vm225_vm0, %v1877_v59 }
 0x11c   : > { %v578_v51 = vpop.f32.mrf.mxu2  ;;  %v607_v19 = vpop.f32.mrf.mxu3 }
 0x11d   : > { %v625_v37 = vadd.f32 %v578_v51, %v2189_v60  ;;  %v626_v3 = vadd.f32 %v607_v19, %v2191_v62  ;;  %v703_v4 = vpop.f32.mrf.mxu0  ;;  %v732_v11 = vpop.f32.mrf.mxu1  ;;  %v1014_v62 = vpack.c.bf16 %v1581_v46, %v2098_v29 }
 0x11f   : > { %v2272_v5 = vadd.f32 %v701_v1, %v625_v37  ;;  %v2274_v12 = vadd.f32 %v730_v39, %v626_v3 }
 0x124   : > { %v580_v31 = vpop.f32.mrf.mxu2  ;;  %v609_v32 = vpop.f32.mrf.mxu3 }
 0x125   : > { %v627_v59 = vadd.f32 %v580_v31, %v2202_v8  ;;  %v628_v55 = vadd.f32 %v609_v32, %v2204_v6  ;;  %v706_v43 = vpop.f32.mrf.mxu0  ;;  %v735_v60 = vpop.f32.mrf.mxu1 }
 0x127   : > { %v2282_v10 = vadd.f32 %v703_v4, %v627_v59  ;;  %v2284_v17 = vadd.f32 %v732_v11, %v628_v55 }
 0x128   : > { %1641 = vmatmul.msk.bf16.gmra.mxu0 %vm225_vm0, %v1137_v7  ;;  %1645 = vmatmul.msk.bf16.gmra.mxu1 %vm225_vm0, %v1137_v7 }
 0x129   : > { %1605 = vmatmul.msk.bf16.gmra.mxu2 %vm225_vm0, %v1014_v62  ;;  %1609 = vmatmul.msk.bf16.gmra.mxu3 %vm225_vm0, %v1014_v62 }
 0x12c   : > { %v583_v0 = vpop.f32.mrf.mxu2  ;;  %v612_v8 = vpop.f32.mrf.mxu3 }
 0x12d   : > { %v629_v6 = vadd.f32 %v583_v0, %v2212_v56  ;;  %v630_v22 = vadd.f32 %v612_v8, %v2214_v9  ;;  %v708_v23 = vpop.f32.mrf.mxu0  ;;  %v737_v29 = vpop.f32.mrf.mxu1 }
 0x12f   : > { %v2292_v13 = vadd.f32 %v706_v43, %v629_v6  ;;  %v2294_v16 = vadd.f32 %v735_v60, %v630_v22  ;;  %v1249_v60 = vld [vmem:[%s2426_s2] sm:$0x3] }
 0x134   : > { %v585_v41 = vpop.f32.mrf.mxu2  ;;  %v614_v44 = vpop.f32.mrf.mxu3 }
 0x135   : > { %v631_v57 = vadd.f32 %v585_v41, %v2218_v28  ;;  %v632_v50 = vadd.f32 %v614_v44, %v2220_v35  ;;  %v938_v40 = vpop.f32.mrf.mxu0  ;;  %v967_v15 = vpop.f32.mrf.mxu1  ;;  %v2353_v41 = vperm.slane %v1249_v60, 1 }
 0x137   : > { %v2298_v52 = vadd.f32 %v708_v23, %v631_v57  ;;  %v2300_v18 = vadd.f32 %v737_v29, %v632_v50  ;;  %v2351_v23 = vperm.slane %v1249_v60, 0 }
 0x13c   : > { %v814_v56 = vpop.f32.mrf.mxu2  ;;  %v843_v9 = vpop.f32.mrf.mxu3 }
 0x13d   : > { %v940_v53 = vpop.f32.mrf.mxu0  ;;  %v969_v61 = vpop.f32.mrf.mxu1  ;;  %v863_v55 = vadd.f32 %v814_v56, %v2232_v45  ;;  %v864_v43 = vadd.f32 %v843_v9, %v2234_v33 }
 0x13f   : > { %v987_v62 = vadd.f32 %v938_v40, %v863_v55  ;;  %v988_v0 = vadd.f32 %v967_v15, %v864_v43 }
 0x144   : > { %v816_v25 = vpop.f32.mrf.mxu2  ;;  %v845_v58 = vpop.f32.mrf.mxu3 }
 0x145   : > { %v2302_v34 = vpop.f32.mrf.mxu0  ;;  %v2304_v36 = vpop.f32.mrf.mxu1  ;;  %v865_v45 = vadd.f32 %v816_v25, %v2238_v14  ;;  %v866_v33 = vadd.f32 %v845_v58, %v2240_v38 }
 0x147   : > { %v989_v55 = vadd.f32 %v940_v53, %v865_v45  ;;  %v990_v43 = vadd.f32 %v969_v61, %v866_v33 }
 0x14c   : > { %v819_v26 = vpop.f32.mrf.mxu2  ;;  %v848_v28 = vpop.f32.mrf.mxu3 }
 0x14d   : > { %v2306_v27 = vpop.f32.mrf.mxu0  ;;  %v2308_v35 = vpop.f32.mrf.mxu1 }
 0x154   : > { %v2310_v48 = vpop.f32.mrf.mxu2  ;;  %v2312_v49 = vpop.f32.mrf.mxu3 }
 0x155   : > { %v2314_v54 = vpop.f32.mrf.mxu0  ;;  %v2316_v24 = vpop.f32.mrf.mxu1 }
 0x15c   : > { %v2318_v63 = vpop.f32.mrf.mxu2  ;;  %v2320_v47 = vpop.f32.mrf.mxu3 }
 0x15d   : > { %v2322_v1 = vpop.f32.mrf.mxu0  ;;  %v2324_v39 = vpop.f32.mrf.mxu1 }
 0x164   : > { %v2326_v51 = vpop.f32.mrf.mxu2  ;;  %v2328_v19 = vpop.f32.mrf.mxu3 }
 0x165   : > { %v2330_v37 = vpop.f32.mrf.mxu0  ;;  %v2332_v3 = vpop.f32.mrf.mxu1 }
 0x16c   : > { %v2334_v4 = vpop.f32.mrf.mxu2  ;;  %v2336_v11 = vpop.f32.mrf.mxu3 }
 0x16d   : > { %v2338_v30 = vpop.f32.mrf.mxu0  ;;  %v2340_v46 = vpop.f32.mrf.mxu1 }
 0x174   : > { %v2342_v31 = vpop.f32.mrf.mxu2  ;;  %v2344_v32 = vpop.f32.mrf.mxu3 }
 0x175   : > { %v1184_v7 = vpop.f32.mrf.mxu0  ;;  %v1213_v59 = vpop.f32.mrf.mxu1 }
 0x17c   : > { %v1061_v8 = vpop.f32.mrf.mxu2  ;;  %v1090_v6 = vpop.f32.mrf.mxu3 }
 0x17d   : > { %v1110_v22 = vadd.f32 %v1061_v8, %v987_v62  ;;  %v1111_v29 = vadd.f32 %v1090_v6, %v988_v0  ;;  %v1186_v44 = vpop.f32.mrf.mxu0  ;;  %v1215_v57 = vpop.f32.mrf.mxu1  ;;  %v868_v62 = vadd.f32 %v848_v28, %v2254_v42  ;;  %v869_v42 = vadd.f32 %v2310_v48, %v2258_v2 }
 0x17e   : > { %v870_v28 = vadd.f32 %v2312_v49, %v2260_v20  ;;  %v871_v20 = vadd.f32 %v2318_v63, %v2272_v5  ;;  %v872_v48 = vadd.f32 %v2320_v47, %v2274_v12  ;;  %v873_v12 = vadd.f32 %v2326_v51, %v2282_v10 }
 0x17f   : > { %v1233_v50 = vadd.f32 %v1184_v7, %v1110_v22  ;;  %v1234_v56 = vadd.f32 %v1213_v59, %v1111_v29  ;;  %v867_v59 = vadd.f32 %v819_v26, %v2252_v21  ;;  %v992_v29 = vadd.f32 %v2304_v36, %v868_v62 }
 0x180   : > { %v874_v47 = vadd.f32 %v2328_v19, %v2284_v17  ;;  %v875_v17 = vadd.f32 %v2334_v4, %v2292_v13  ;;  %v876_v19 = vadd.f32 %v2336_v11, %v2294_v16  ;;  %v877_v16 = vadd.f32 %v2342_v31, %v2298_v52 }
 0x181   : > { %v1255_v40 = vadd.f32 %v2351_v23, %v1233_v50  ;;  %v1256_v15 = vadd.f32 %v2353_v41, %v1234_v56  ;;  %v991_v61 = vadd.f32 %v2302_v34, %v867_v59  ;;  %v996_v59 = vadd.f32 %v2316_v24, %v872_v48 }
 0x182   : > { %v878_v11 = vadd.f32 %v2344_v32, %v2300_v18 }
 0x183   : > { %v1271_v9 = vpack.c.bf16 %v1256_v15, %v1255_v40  ;;  %v993_v15 = vadd.f32 %v2306_v27, %v869_v42 }
 0x184   : > { %v1063_v60 = vpop.f32.mrf.mxu2  ;;  %v1092_v14 = vpop.f32.mrf.mxu3 }
 0x185   : > { %1279 = vst [vmem:[%s2363_s20] sm:$0xff] %v1271_v9  ;;  %v1112_v38 = vadd.f32 %v1063_v60, %v989_v55  ;;  %v1113_v25 = vadd.f32 %v1092_v14, %v990_v43  ;;  %v1189_v58 = vpop.f32.mrf.mxu0  ;;  %v1218_v7 = vpop.f32.mrf.mxu1  ;;  %v994_v9 = vadd.f32 %v2308_v35, %v870_v28 }
 0x187   : > { %v1235_v0 = vadd.f32 %v1186_v44, %v1112_v38  ;;  %v1236_v8 = vadd.f32 %v1215_v57, %v1113_v25 }
 0x189   : > { %v1257_v6 = vadd.f32 %v2351_v23, %v1235_v0  ;;  %v1258_v22 = vadd.f32 %v2353_v41, %v1236_v8 }
 0x18b   : > { %v1272_v53 = vpack.c.bf16 %v1258_v22, %v1257_v6 }
 0x18c   : > { %v1066_v45 = vpop.f32.mrf.mxu2  ;;  %v1095_v33 = vpop.f32.mrf.mxu3 }
 0x18d   : > { %1280 = vst [vmem:[%s2363_s20 + $0x8] sm:$0xff] %v1272_v53  ;;  %v1114_v50 = vadd.f32 %v1066_v45, %v991_v61  ;;  %v1115_v56 = vadd.f32 %v1095_v33, %v992_v29  ;;  %v1191_v21 = vpop.f32.mrf.mxu0  ;;  %v1220_v26 = vpop.f32.mrf.mxu1  ;;  %v997_v29 = vadd.f32 %v2322_v1, %v873_v12  ;;  %v998_v45 = vadd.f32 %v2324_v39, %v874_v47 }
 0x18f   : > { %v1237_v44 = vadd.f32 %v1189_v58, %v1114_v50  ;;  %v1238_v57 = vadd.f32 %v1218_v7, %v1115_v56  ;;  %v995_v7 = vadd.f32 %v2314_v54, %v871_v20 }
 0x191   : > { %v1259_v34 = vadd.f32 %v2351_v23, %v1237_v44  ;;  %v1260_v36 = vadd.f32 %v2353_v41, %v1238_v57  ;;  %v999_v44 = vadd.f32 %v2330_v37, %v875_v17  ;;  %v1000_v57 = vadd.f32 %v2332_v3, %v876_v19 }
 0x193   : > { %v1273_v40 = vpack.c.bf16 %v1260_v36, %v1259_v34 }
 0x194   : > { %v1068_v55 = vpop.f32.mrf.mxu2  ;;  %v1097_v43 = vpop.f32.mrf.mxu3 }
 0x195   : > { %1281 = vst [vmem:[%s2363_s20 + $0x10] sm:$0xff] %v1273_v40  ;;  %v1116_v60 = vadd.f32 %v1068_v55, %v993_v15  ;;  %v1117_v2 = vadd.f32 %v1097_v43, %v994_v9  ;;  %v1194_v38 = vpop.f32.mrf.mxu0  ;;  %v1223_v25 = vpop.f32.mrf.mxu1  ;;  %v1001_v55 = vadd.f32 %v2338_v30, %v877_v16  ;;  %v1002_v43 = vadd.f32 %v2340_v46, %v878_v11 }
 0x197   : > { %v1239_v49 = vadd.f32 %v1191_v21, %v1116_v60  ;;  %v1240_v14 = vadd.f32 %v1220_v26, %v1117_v2 }
 0x199   : > { %v1261_v27 = vadd.f32 %v2351_v23, %v1239_v49  ;;  %v1262_v35 = vadd.f32 %v2353_v41, %v1240_v14 }
 0x19b   : > { %v1274_v58 = vpack.c.bf16 %v1262_v35, %v1261_v27 }
 0x19c   : > { %v1071_v62 = vpop.f32.mrf.mxu2  ;;  %v1100_v0 = vpop.f32.mrf.mxu3 }
 0x19d   : > { %1282 = vst [vmem:[%s2363_s20 + $0x18] sm:$0xff] %v1274_v58  ;;  %v1118_v5 = vadd.f32 %v1071_v62, %v995_v7  ;;  %v1119_v63 = vadd.f32 %v1100_v0, %v996_v59  ;;  %v1196_v53 = vpop.f32.mrf.mxu0  ;;  %v1225_v24 = vpop.f32.mrf.mxu1 }
 0x19f   : > { %v1241_v8 = vadd.f32 %v1194_v38, %v1118_v5  ;;  %v1242_v6 = vadd.f32 %v1223_v25, %v1119_v63 }
 0x1a1   : > { %v1263_v22 = vadd.f32 %v2351_v23, %v1241_v8  ;;  %v1264_v54 = vadd.f32 %v2353_v41, %v1242_v6 }
 0x1a3   : > { %v1275_v61 = vpack.c.bf16 %v1264_v54, %v1263_v22 }
 0x1a4   : > { %v1073_v33 = vpop.f32.mrf.mxu2  ;;  %v1102_v50 = vpop.f32.mrf.mxu3 }
 0x1a5   : > { %1283 = vst [vmem:[%s2363_s20 + $0x20] sm:$0xff] %v1275_v61  ;;  %v1120_v10 = vadd.f32 %v1073_v33, %v997_v29  ;;  %v1121_v51 = vadd.f32 %v1102_v50, %v998_v45  ;;  %v1199_v39 = vpop.f32.mrf.mxu0  ;;  %v1228_v28 = vpop.f32.mrf.mxu1 }
 0x1a7   : > { %v1243_v56 = vadd.f32 %v1196_v53, %v1120_v10  ;;  %v1244_v21 = vadd.f32 %v1225_v24, %v1121_v51 }
 0x1a9   : > { %v1265_v26 = vadd.f32 %v2351_v23, %v1243_v56  ;;  %v1266_v1 = vadd.f32 %v2353_v41, %v1244_v21 }
 0x1ab   : > { %v1276_v42 = vpack.c.bf16 %v1266_v1, %v1265_v26 }
 0x1ac   : > { %v1076_v34 = vpop.f32.mrf.mxu2  ;;  %v1105_v36 = vpop.f32.mrf.mxu3 }
 0x1ad   : > { %1284 = vst [vmem:[%s2363_s20 + $0x28] sm:$0xff] %v1276_v42  ;;  %v1122_v13 = vadd.f32 %v1076_v34, %v999_v44  ;;  %v1123_v4 = vadd.f32 %v1105_v36, %v1000_v57  ;;  %v1201_v31 = vpop.f32.mrf.mxu0  ;;  %v1230_v48 = vpop.f32.mrf.mxu1 }
 0x1af   : > { %v1245_v40 = vadd.f32 %v1199_v39, %v1122_v13  ;;  %v1246_v15 = vadd.f32 %v1228_v28, %v1123_v4 }
 0x1b1   : > { %v1267_v9 = vadd.f32 %v2351_v23, %v1245_v40  ;;  %v1268_v37 = vadd.f32 %v2353_v41, %v1246_v15 }
 0x1b3   : > { %v1277_v3 = vpack.c.bf16 %v1268_v37, %v1267_v9 }
 0x1b4   : > { %v1078_v60 = vpop.f32.mrf.mxu2  ;;  %v1107_v2 = vpop.f32.mrf.mxu3 }
 0x1b5   : > { %1285 = vst [vmem:[%s2363_s20 + $0x30] sm:$0xff] %v1277_v3  ;;  %v1124_v20 = vadd.f32 %v1078_v60, %v1001_v55  ;;  %v1125_v52 = vadd.f32 %v1107_v2, %v1002_v43 }
 0x1b7   : > { %v1247_v18 = vadd.f32 %v1201_v31, %v1124_v20  ;;  %v1248_v32 = vadd.f32 %v1230_v48, %v1125_v52 }
 0x1b9   : > { %v1269_v49 = vadd.f32 %v2351_v23, %v1247_v18  ;;  %v1270_v14 = vadd.f32 %v2353_v41, %v1248_v32 }
 0x1bb   : > { %v1278_v38 = vpack.c.bf16 %v1270_v14, %v1269_v49 }
 0x1bd   : > { %1286 = vst [vmem:[%s2363_s20 + $0x38] sm:$0xff] %v1278_v38 }
 0x1be PF: > { %s13_s12 = sadd.s32 1, %s1704_s12  }
 0x1bf   : > { %p10_p4 = scmp.ge.s32.totalorder %s13_s12, 4  }
 0x1c1   :  { %12 = sbr.rel (!%p10_p4) target bundleno = 1 (0x1), region = 72 }

// kernel: encoder_layer_forward.8
= control target key start
LH: loop header
LB: loop body
LE: loop exit
PB: predicated region body
PF: predicated region fallthrough
CT: control target
= control target key end

     0   :  { %s1204_s12 = smov 0   ;;  %s1473_s0 = inlined_call_operand.vmem [shape: f32[2,10,10,32], index: 0, kind: input, shape index: {}]   ;;  %s1474_s1 = inlined_call_operand.vmem [shape: bf16[9,32,32], index: 1, kind: input, shape index: {}]   ;;  %s1475_s2 = inlined_call_operand.vmem [shape: f32[1,32], index: 2, kind: input, shape index: {}]   ;;  %s1476_s3 = inlined_call_operand.vmem [shape: f32[2,64,32], index: 3, kind: output, shape index: {}]  }
   0x1 LB: > { %s943_s13 = sadd.s32 4294967295, %s1182_s12   ;;  %p947_p0 = scmp.ge.s32.totalorder %s1182_s12, 1  ;;  %s1182_s12 = sphi %s1204_s12, %s13_s12  }
   0x2   : > { %p137_p1 = scmp.lt.s32.totalorder %s1182_s12, 3 }
   0x4   : > { %p138_p2 = pnand %p947_p0, %p137_p1 }
   0x5   : > { %p161_p3 = scmp.lt.s32.totalorder (!%p138_p2), %s943_s13, 1 }
   0x6   : > { %141 = sbr.rel (%p138_p2) target bundleno = 299 (0x12b), region = 32 }
   0xb   : > { %v1145_v0 = vld [vmem:[%s1474_s1 + $0x18] sm:$0xff]  ;;  %v1144_v1 = vld [vmem:[%s1474_s1 + $0x10] sm:$0xff]  ;;  %s1478_s13 = smov (!%p161_p3, %s943_s13), 1  ;;  %v1147_v2 = vld [vmem:[%s1474_s1 + $0x28] sm:$0xff]  ;;  %vm217_vm0 = vcmask 261120  }
   0xc   : > { %1160 = vmatpush.bf16.msra.mxu1 %v1145_v0  ;;  %1161 = vmatpush.bf16.msra.mxu2 %v1145_v0  ;;  %s1166_s18 = smul.u32 160, %s1478_s13  ;;  %v1149_v3 = vld [vmem:[%s1474_s1 + $0x38] sm:$0xff]  ;;  %v1143_v4 = vld [vmem:[%s1474_s1 + $0x8] sm:$0xff]  ;;  %v1146_v6 = vld [vmem:[%s1474_s1 + $0x20] sm:$0xff]  ;;  %s1141_s4 = sshll.u32 %s1478_s13, 6 }
   0xd   : > { %1162 = vmatpush.bf16.msra.mxu3 %v1145_v0  ;;  %236 = vmatpush.bf16.msra.mxu0 %v1145_v0  ;;  %v1151_v5 = vld [vmem:[%s1474_s1 + $0x48] sm:$0xff]  ;;  %v1148_v10 = vld [vmem:[%s1474_s1 + $0x30] sm:$0xff]  ;;  %v1142_v19 = vld [vmem:[%s1474_s1] sm:$0xff]  ;;  %s1424_s7 = scalar_lea.vmem %s1476_s3, %s1141_s4 }
   0xe   : > { %s1236_s29 = scalar_lea.vmem %s1473_s0, %s1166_s18  ;;  %v1150_v21 = vld [vmem:[%s1474_s1 + $0x40] sm:$0xff]  ;;  %v1155_v22 = vld [vmem:[%s1474_s1 + $0x68] sm:$0xff]  ;;  %v1157_v23 = vld [vmem:[%s1474_s1 + $0x78] sm:$0xff] }
   0xf   : > { %v190_v7 = vld [vmem:[%s1236_s29 + $0x21] sm:$0xff]  ;;  %v1243_v8 = vld [vmem:[%s1236_s29 + $0x31] sm:$0xff] }
  0x10   : > { %1163 = vmatpush.bf16.msra.mxu1 %v1144_v1  ;;  %1164 = vmatpush.bf16.msra.mxu2 %v1144_v1  ;;  %v1246_v9 = vld [vmem:[%s1236_s29 + $0x41] sm:$0xff]  ;;  %v1252_v11 = vpack.c.bf16 %v1243_v8, %v190_v7  ;;  %v1255_v12 = vld [vmem:[%s1236_s29 + $0x51] sm:$0xff] }
  0x11   : > { %1165 = vmatpush.bf16.msra.mxu3 %v1144_v1  ;;  %237 = vmatpush.bf16.msra.mxu0 %v1144_v1  ;;  %v1258_v13 = vld [vmem:[%s1236_s29 + $0x61] sm:$0xff]  ;;  %v1261_v14 = vld [vmem:[%s1236_s29 + $0x71] sm:$0xff]  ;;  %v1265_v15 = vpack.c.bf16 %v1255_v12, %v1246_v9  ;;  %v478_v46 = vpack.c.bf16 %v1246_v9, %v1243_v8 }
  0x12   : > { %v1269_v16 = vpack.c.bf16 %v1261_v14, %v1258_v13  ;;  %v188_v17 = vld [vmem:[%s1236_s29 + $0x1] sm:$0xff]  ;;  %v189_v18 = vld [vmem:[%s1236_s29 + $0x11] sm:$0xff]  ;;  %v479_v54 = vpack.c.bf16 %v1258_v13, %v1255_v12 }
  0x13   : > { %964 = vmatmul.msk.bf16.vlgmr.msra.gmra.mxu1 %vm217_vm0, %v1252_v11  ;;  %v196_v20 = vpack.c.bf16 %v189_v18, %v188_v17  ;;  %965 = vmatmul.msk.bf16.vlgmr.msra.gmra.mxu2 %vm217_vm0, %v1265_v15  ;;  %v1153_v24 = vld [vmem:[%s1474_s1 + $0x58] sm:$0xff]  ;;  %v1159_v25 = vld [vmem:[%s1474_s1 + $0x88] sm:$0xff]  ;;  %v172_v26 = vld [vmem:[%s1236_s29] sm:$0xff]  ;;  %v477_v34 = vpack.c.bf16 %v190_v7, %v189_v18 }
  0x14   : > { %359 = vmatpush.bf16.msrb.mxu2 %v1147_v2  ;;  %289 = vmatpush.bf16.msrb.mxu1 %v1143_v4  ;;  %v173_v27 = vld [vmem:[%s1236_s29 + $0x10] sm:$0xff]  ;;  %v312_v28 = vld [vmem:[%s1236_s29 + $0x2] sm:$0xff] }
  0x15   : > { %438 = vmatpush.bf16.msrb.mxu3 %v1149_v3  ;;  %516 = vmatpush.bf16.msrb.mxu0 %v1151_v5  ;;  %v313_v29 = vld [vmem:[%s1236_s29 + $0x12] sm:$0xff]  ;;  %v996_v30 = vld [vmem:[%s1236_s29 + $0x20] sm:$0xff]  ;;  %v180_v31 = vpack.c.bf16 %v173_v27, %v172_v26 }
  0x16   : > { %966 = vmatmul.msk.bf16.vlgmr.msra.gmra.mxu3 %vm217_vm0, %v1269_v16  ;;  %963 = vmatmul.msk.bf16.vlgmr.msra.gmra.mxu0 %vm217_vm0, %v196_v20  ;;  %v320_v32 = vpack.c.bf16 %v313_v29, %v312_v28  ;;  %v399_v33 = vpack.c.bf16 %v996_v30, %v173_v27  ;;  %v1154_v35 = vld [vmem:[%s1474_s1 + $0x60] sm:$0xff]  ;;  %v1156_v36 = vld [vmem:[%s1474_s1 + $0x70] sm:$0xff] }
  0x17   : > { %v1152_v37 = vld [vmem:[%s1474_s1 + $0x50] sm:$0xff]  ;;  %v1158_v38 = vld [vmem:[%s1474_s1 + $0x80] sm:$0xff] }
  0x18   : > { %360 = vmatpush.bf16.msrb.mxu2 %v1146_v6  ;;  %290 = vmatpush.bf16.msrb.mxu1 %v1142_v19  ;;  %v175_v39 = vld [vmem:[%s1236_s29 + $0x30] sm:$0xff]  ;;  %v314_v40 = vld [vmem:[%s1236_s29 + $0x22] sm:$0xff] }
  0x19   : > { %439 = vmatpush.bf16.msrb.mxu3 %v1148_v10  ;;  %517 = vmatpush.bf16.msrb.mxu0 %v1150_v21  ;;  %v315_v41 = vld [vmem:[%s1236_s29 + $0x32] sm:$0xff]  ;;  %v998_v42 = vld [vmem:[%s1236_s29 + $0x40] sm:$0xff]  ;;  %v181_v43 = vpack.c.bf16 %v175_v39, %v996_v30  ;;  %v555_v0 = vpack.c.bf16 %v314_v40, %v313_v29 }
  0x1a   : > { %v321_v44 = vpack.c.bf16 %v315_v41, %v314_v40  ;;  %v400_v45 = vpack.c.bf16 %v998_v42, %v175_v39  ;;  %v177_v47 = vld [vmem:[%s1236_s29 + $0x50] sm:$0xff]  ;;  %v316_v48 = vld [vmem:[%s1236_s29 + $0x42] sm:$0xff] }
  0x1b   : > { %v317_v49 = vld [vmem:[%s1236_s29 + $0x52] sm:$0xff]  ;;  %v1000_v50 = vld [vmem:[%s1236_s29 + $0x60] sm:$0xff]  ;;  %v182_v51 = vpack.c.bf16 %v177_v47, %v998_v42  ;;  %v556_v1 = vpack.c.bf16 %v316_v48, %v315_v41 }
  0x1c   : > { %673 = vmatpush.bf16.msra.mxu2 %v1155_v22  ;;  %594 = vmatpush.bf16.msra.mxu1 %v1153_v24  ;;  %v322_v52 = vpack.c.bf16 %v317_v49, %v316_v48  ;;  %v401_v53 = vpack.c.bf16 %v1000_v50, %v177_v47  ;;  %v179_v55 = vld [vmem:[%s1236_s29 + $0x70] sm:$0xff]  ;;  %v318_v56 = vld [vmem:[%s1236_s29 + $0x62] sm:$0xff] }
  0x1d   : > { %751 = vmatpush.bf16.msra.mxu3 %v1157_v23  ;;  %829 = vmatpush.bf16.msra.mxu0 %v1159_v25  ;;  %v319_v57 = vld [vmem:[%s1236_s29 + $0x72] sm:$0xff]  ;;  %v1002_v58 = vld [vmem:[%s1236_s29 + $0x80] sm:$0xff]  ;;  %v183_v60 = vpack.c.bf16 %v179_v55, %v1000_v50  ;;  %v557_v2 = vpack.c.bf16 %v318_v56, %v317_v49 }
  0x1e   : > { %v1026_v59 = vld [vmem:[%s1236_s29 + $0x81] sm:$0xff]  ;;  %v323_v61 = vpack.c.bf16 %v319_v57, %v318_v56  ;;  %v402_v62 = vpack.c.bf16 %v1002_v58, %v179_v55  ;;  %v1074_v4 = vld [vmem:[%s1236_s29 + $0x90] sm:$0xff] }
  0x1f   : > { %v480_v63 = vpack.c.bf16 %v1026_v59, %v1261_v14  ;;  %v1050_v3 = vld [vmem:[%s1236_s29 + $0x82] sm:$0xff]  ;;  %v1098_v5 = vld [vmem:[%s1236_s29 + $0x91] sm:$0xff]  ;;  %v637_v9 = vpack.c.bf16 %v1074_v4, %v1002_v58 }
  0x20   : > { %674 = vmatpush.bf16.msra.mxu2 %v1154_v35  ;;  %595 = vmatpush.bf16.msra.mxu1 %v1152_v37  ;;  %v1122_v6 = vld [vmem:[%s1236_s29 + $0x92] sm:$0xff]  ;;  %v558_v7 = vpack.c.bf16 %v1050_v3, %v319_v57  ;;  %v715_v10 = vpack.c.bf16 %v1098_v5, %v1026_v59 }
  0x21   : > { %752 = vmatpush.bf16.msra.mxu3 %v1156_v36  ;;  %830 = vmatpush.bf16.msra.mxu0 %v1158_v38 }
  0x23   : > { %975 = vmatmul.msk.bf16.vlgmr.msrb.gmra.mxu1 %vm217_vm0, %v180_v31  ;;  %991 = vmatmul.msk.bf16.vlgmr.msrb.gmra.mxu2 %vm217_vm0, %v320_v32 }
  0x26   : > { %1015 = vmatmul.msk.bf16.vlgmr.msrb.gmra.mxu3 %vm217_vm0, %v399_v33  ;;  %1039 = vmatmul.msk.bf16.vlgmr.msrb.gmra.mxu0 %vm217_vm0, %v477_v34 }
  0x33   : > { %976 = vmatmul.msk.bf16.gmra.mxu1 %vm217_vm0, %v181_v43  ;;  %992 = vmatmul.msk.bf16.gmra.mxu2 %vm217_vm0, %v321_v44 }
  0x36   : > { %1016 = vmatmul.msk.bf16.gmra.mxu3 %vm217_vm0, %v400_v45  ;;  %1040 = vmatmul.msk.bf16.gmra.mxu0 %vm217_vm0, %v478_v46 }
  0x43   : > { %977 = vmatmul.msk.bf16.gmra.mxu1 %vm217_vm0, %v182_v51  ;;  %993 = vmatmul.msk.bf16.gmra.mxu2 %vm217_vm0, %v322_v52 }
  0x46   : > { %1017 = vmatmul.msk.bf16.gmra.mxu3 %vm217_vm0, %v401_v53  ;;  %1041 = vmatmul.msk.bf16.gmra.mxu0 %vm217_vm0, %v479_v54 }
  0x53   : > { %978 = vmatmul.msk.bf16.gmra.mxu1 %vm217_vm0, %v183_v60  ;;  %994 = vmatmul.msk.bf16.gmra.mxu2 %vm217_vm0, %v323_v61 }
  0x56   : > { %1018 = vmatmul.msk.bf16.gmra.mxu3 %vm217_vm0, %v402_v62  ;;  %1042 = vmatmul.msk.bf16.gmra.mxu0 %vm217_vm0, %v480_v63 }
  0x63   : > { %1063 = vmatmul.msk.bf16.vlgmr.msra.gmra.mxu1 %vm217_vm0, %v555_v0  ;;  %1087 = vmatmul.msk.bf16.vlgmr.msra.gmra.mxu2 %vm217_vm0, %v181_v43 }
  0x66   : > { %1111 = vmatmul.msk.bf16.vlgmr.msra.gmra.mxu3 %vm217_vm0, %v1252_v11  ;;  %1135 = vmatmul.msk.bf16.vlgmr.msra.gmra.mxu0 %vm217_vm0, %v321_v44  ;;  %v793_v11 = vpack.c.bf16 %v1122_v6, %v1050_v3  ;;  %v1417_v3 = vld [vmem:[%s1475_s2] ss:$0 sm:$0xff] }
  0x73   : > { %1064 = vmatmul.msk.bf16.gmra.mxu1 %vm217_vm0, %v556_v1  ;;  %1088 = vmatmul.msk.bf16.gmra.mxu2 %vm217_vm0, %v182_v51 }
  0x76   : > { %1112 = vmatmul.msk.bf16.gmra.mxu3 %vm217_vm0, %v1265_v15  ;;  %1136 = vmatmul.msk.bf16.gmra.mxu0 %vm217_vm0, %v322_v52 }
  0x83   : > { %1065 = vmatmul.msk.bf16.gmra.mxu1 %vm217_vm0, %v557_v2  ;;  %1089 = vmatmul.msk.bf16.gmra.mxu2 %vm217_vm0, %v183_v60 }
  0x86   : > { %1113 = vmatmul.msk.bf16.gmra.mxu3 %vm217_vm0, %v1269_v16  ;;  %1137 = vmatmul.msk.bf16.gmra.mxu0 %vm217_vm0, %v323_v61 }
  0x90   : > { %v244_v8 = vpop.f32.mrf.mxu1 }
  0x93   : > { %v239_v12 = vpop.f32.mrf.mxu0  ;;  %1066 = vmatmul.msk.bf16.gmra.mxu1 %vm217_vm0, %v558_v7  ;;  %1090 = vmatmul.msk.bf16.gmra.mxu2 %vm217_vm0, %v637_v9 }
  0x96   : > { %1114 = vmatmul.msk.bf16.gmra.mxu3 %vm217_vm0, %v715_v10  ;;  %1138 = vmatmul.msk.bf16.gmra.mxu0 %vm217_vm0, %v793_v11  ;;  %v1372_v13 = vpop.f32.mrf.mxu2 }
  0x98   : > { %v1376_v15 = vpop.f32.mrf.mxu1 }
  0x99   : > { %v1374_v14 = vpop.f32.mrf.mxu3 }
  0x9b   : > { %v241_v16 = vpop.f32.mrf.mxu0 }
  0x9e   : > { %v1378_v17 = vpop.f32.mrf.mxu2 }
  0xa0   : > { %v292_v19 = vpop.f32.mrf.mxu1 }
  0xa1   : > { %v1380_v18 = vpop.f32.mrf.mxu3  ;;  %v293_v48 = vadd.f32 %v292_v19, %v239_v12 }
  0xa3   : > { %v519_v20 = vpop.f32.mrf.mxu0 }
  0xa6   : > { %v362_v21 = vpop.f32.mrf.mxu2 }
  0xa7   : > { %v382_v50 = vadd.f32 %v362_v21, %v293_v48 }
  0xa8   : > { %v294_v23 = vpop.f32.mrf.mxu1 }
  0xa9   : > { %v441_v22 = vpop.f32.mrf.mxu3  ;;  %v295_v55 = vadd.f32 %v294_v23, %v241_v16 }
  0xaa   : > { %v461_v53 = vadd.f32 %v441_v22, %v382_v50 }
  0xab   : > { %v521_v24 = vpop.f32.mrf.mxu0 }
  0xac   : > { %v539_v58 = vadd.f32 %v519_v20, %v461_v53 }
  0xae   : > { %v364_v25 = vpop.f32.mrf.mxu2 }
  0xaf   : > { %v383_v57 = vadd.f32 %v364_v25, %v295_v55 }
  0xb0   : > { %v297_v27 = vpop.f32.mrf.mxu1 }
  0xb1   : > { %v443_v26 = vpop.f32.mrf.mxu3  ;;  %v298_v1 = vadd.f32 %v297_v27, %v244_v8 }
  0xb2   : > { %v462_v62 = vadd.f32 %v443_v26, %v383_v57 }
  0xb3   : > { %v524_v28 = vpop.f32.mrf.mxu0 }
  0xb4   : > { %v540_v7 = vadd.f32 %v521_v24, %v462_v62 }
  0xb6   : > { %v367_v29 = vpop.f32.mrf.mxu2 }
  0xb7   : > { %v384_v5 = vadd.f32 %v367_v29, %v298_v1 }
  0xb8   : > { %v299_v31 = vpop.f32.mrf.mxu1 }
  0xb9   : > { %v446_v30 = vpop.f32.mrf.mxu3  ;;  %v300_v21 = vadd.f32 %v299_v31, %v1376_v15 }
  0xba   : > { %v463_v12 = vadd.f32 %v446_v30, %v384_v5 }
  0xbb   : > { %v1382_v32 = vpop.f32.mrf.mxu0 }
  0xbc   : > { %v541_v26 = vadd.f32 %v524_v28, %v463_v12 }
  0xbe   : > { %v369_v33 = vpop.f32.mrf.mxu2 }
  0xbf   : > { %v385_v24 = vadd.f32 %v369_v33, %v300_v21 }
  0xc0   : > { %v302_v35 = vpop.f32.mrf.mxu1 }
  0xc1   : > { %v448_v34 = vpop.f32.mrf.mxu3 }
  0xc2   : > { %v464_v53 = vadd.f32 %v448_v34, %v385_v24 }
  0xc3   : > { %v1384_v36 = vpop.f32.mrf.mxu0 }
  0xc4   : > { %v542_v28 = vadd.f32 %v1382_v32, %v464_v53 }
  0xc6   : > { %v1386_v37 = vpop.f32.mrf.mxu2 }
  0xc8   : > { %v1390_v39 = vpop.f32.mrf.mxu1 }
  0xc9   : > { %v1388_v38 = vpop.f32.mrf.mxu3 }
  0xcb   : > { %v1392_v40 = vpop.f32.mrf.mxu0 }
  0xce   : > { %v1394_v41 = vpop.f32.mrf.mxu2 }
  0xd0   : > { %v1398_v43 = vpop.f32.mrf.mxu1 }
  0xd1   : > { %v1396_v42 = vpop.f32.mrf.mxu3 }
  0xd3   : > { %v1400_v44 = vpop.f32.mrf.mxu0 }
  0xd6   : > { %v1402_v45 = vpop.f32.mrf.mxu2 }
  0xd8   : > { %v1406_v47 = vpop.f32.mrf.mxu1 }
  0xd9   : > { %v1404_v46 = vpop.f32.mrf.mxu3 }
  0xdb   : > { %v1408_v49 = vpop.f32.mrf.mxu0 }
  0xde   : > { %v1410_v51 = vpop.f32.mrf.mxu2 }
  0xe0   : > { %v597_v54 = vpop.f32.mrf.mxu1 }
  0xe1   : > { %v1412_v52 = vpop.f32.mrf.mxu3  ;;  %v617_v59 = vadd.f32 %v597_v54, %v539_v58 }
  0xe3   : > { %v832_v56 = vpop.f32.mrf.mxu0 }
  0xe6   : > { %v676_v60 = vpop.f32.mrf.mxu2 }
  0xe7   : > { %v696_v63 = vadd.f32 %v676_v60, %v617_v59 }
  0xe8   : > { %v599_v0 = vpop.f32.mrf.mxu1 }
  0xe9   : > { %v754_v61 = vpop.f32.mrf.mxu3  ;;  %v618_v10 = vadd.f32 %v599_v0, %v540_v7 }
  0xea   : > { %v774_v2 = vadd.f32 %v754_v61, %v696_v63 }
  0xeb   : > { %v834_v4 = vpop.f32.mrf.mxu0 }
  0xec   : > { %v852_v6 = vadd.f32 %v832_v56, %v774_v2  ;;  %v303_v56 = vadd.f32 %v302_v35, %v1372_v13  ;;  %v305_v35 = vadd.f32 %v1390_v39, %v1378_v17  ;;  %v308_v39 = vadd.f32 %v1398_v43, %v1374_v14 }
  0xed   : > { %v310_v43 = vadd.f32 %v1406_v47, %v1380_v18 }
  0xee   : > { %v864_v9 = vadd.f32 %v1417_v3, %v852_v6  ;;  %v678_v8 = vpop.f32.mrf.mxu2  ;;  %v386_v33 = vadd.f32 %v1386_v37, %v303_v56  ;;  %v387_v0 = vadd.f32 %v1394_v41, %v305_v35 }
  0xef   : > { %v697_v19 = vadd.f32 %v678_v8, %v618_v10 }
  0xf0   : > { %v872_v16 = vmax.f32 %v864_v9, 0.0  ;;  %v602_v20 = vpop.f32.mrf.mxu1  ;;  %v465_v61 = vadd.f32 %v1388_v38, %v386_v33  ;;  %v466_v7 = vadd.f32 %v1396_v42, %v387_v0 }
  0xf1   : > { %v756_v11 = vpop.f32.mrf.mxu3  ;;  %v619_v29 = vadd.f32 %v602_v20, %v541_v26 }
  0xf2   : > { %880 = vst.msk [vmem:[%s1424_s7] sm:$0xff] %vm217_vm0, %v872_v16  ;;  %v775_v22 = vadd.f32 %v756_v11, %v697_v19  ;;  %v543_v1 = vadd.f32 %v1384_v36, %v465_v61  ;;  %v388_v36 = vadd.f32 %v1402_v45, %v308_v39  ;;  %v544_v11 = vadd.f32 %v1392_v40, %v466_v7 }
  0xf3   : > { %v837_v23 = vpop.f32.mrf.mxu0  ;;  %v389_v40 = vadd.f32 %v1410_v51, %v310_v43 }
  0xf4   : > { %v853_v25 = vadd.f32 %v834_v4, %v775_v22  ;;  %v467_v21 = vadd.f32 %v1404_v46, %v388_v36 }
  0xf6   : > { %v865_v27 = vadd.f32 %v1417_v3, %v853_v25  ;;  %v681_v48 = vpop.f32.mrf.mxu2  ;;  %v545_v25 = vadd.f32 %v1400_v44, %v467_v21 }
  0xf7   : > { %v698_v54 = vadd.f32 %v681_v48, %v619_v29  ;;  %v468_v48 = vadd.f32 %v1412_v52, %v389_v40 }
  0xf8   : > { %v873_v30 = vmax.f32 %v865_v27, 0.0  ;;  %v604_v55 = vpop.f32.mrf.mxu1 }
  0xf9   : > { %v759_v50 = vpop.f32.mrf.mxu3  ;;  %v620_v59 = vadd.f32 %v604_v55, %v542_v28 }
  0xfa   : > { %881 = vst.msk [vmem:[%s1424_s7 + $0x8] sm:$0xff] %vm217_vm0, %v873_v30  ;;  %v776_v15 = vadd.f32 %v759_v50, %v698_v54  ;;  %v546_v54 = vadd.f32 %v1408_v49, %v468_v48 }
  0xfb   : > { %v839_v31 = vpop.f32.mrf.mxu0 }
  0xfc   : > { %v854_v57 = vadd.f32 %v837_v23, %v776_v15 }
  0xfe   : > { %v866_v58 = vadd.f32 %v1417_v3, %v854_v57  ;;  %v683_v60 = vpop.f32.mrf.mxu2 }
  0xff   : > { %v699_v63 = vadd.f32 %v683_v60, %v620_v59 }
 0x100   : > { %v874_v62 = vmax.f32 %v866_v58, 0.0  ;;  %v607_v13 = vpop.f32.mrf.mxu1 }
 0x101   : > { %v761_v34 = vpop.f32.mrf.mxu3  ;;  %v621_v5 = vadd.f32 %v607_v13, %v543_v1 }
 0x102   : > { %882 = vst.msk [vmem:[%s1424_s7 + $0x10] sm:$0xff] %vm217_vm0, %v874_v62  ;;  %v777_v37 = vadd.f32 %v761_v34, %v699_v63 }
 0x103   : > { %v842_v2 = vpop.f32.mrf.mxu0 }
 0x104   : > { %v855_v32 = vadd.f32 %v839_v31, %v777_v37 }
 0x106   : > { %v867_v4 = vadd.f32 %v1417_v3, %v855_v32  ;;  %v686_v38 = vpop.f32.mrf.mxu2 }
 0x107   : > { %v700_v10 = vadd.f32 %v686_v38, %v621_v5 }
 0x108   : > { %v875_v9 = vmax.f32 %v867_v4, 0.0  ;;  %v609_v17 = vpop.f32.mrf.mxu1 }
 0x109   : > { %v764_v6 = vpop.f32.mrf.mxu3  ;;  %v622_v16 = vadd.f32 %v609_v17, %v544_v11 }
 0x10a   : > { %883 = vst.msk [vmem:[%s1424_s7 + $0x18] sm:$0xff] %vm217_vm0, %v875_v9  ;;  %v778_v41 = vadd.f32 %v764_v6, %v700_v10 }
 0x10b   : > { %v844_v19 = vpop.f32.mrf.mxu0 }
 0x10c   : > { %v856_v8 = vadd.f32 %v842_v2, %v778_v41 }
 0x10e   : > { %v868_v12 = vadd.f32 %v1417_v3, %v856_v8  ;;  %v688_v42 = vpop.f32.mrf.mxu2 }
 0x10f   : > { %v701_v23 = vadd.f32 %v688_v42, %v622_v16 }
 0x110   : > { %v876_v22 = vmax.f32 %v868_v12, 0.0  ;;  %v612_v14 = vpop.f32.mrf.mxu1 }
 0x111   : > { %v766_v20 = vpop.f32.mrf.mxu3  ;;  %v623_v27 = vadd.f32 %v612_v14, %v545_v25 }
 0x112   : > { %884 = vst.msk [vmem:[%s1424_s7 + $0x20] sm:$0xff] %vm217_vm0, %v876_v22  ;;  %v779_v45 = vadd.f32 %v766_v20, %v701_v23 }
 0x113   : > { %v847_v30 = vpop.f32.mrf.mxu0 }
 0x114   : > { %v857_v24 = vadd.f32 %v844_v19, %v779_v45 }
 0x116   : > { %v869_v26 = vadd.f32 %v1417_v3, %v857_v24  ;;  %v691_v29 = vpop.f32.mrf.mxu2 }
 0x117   : > { %v702_v53 = vadd.f32 %v691_v29, %v623_v27 }
 0x118   : > { %v877_v50 = vmax.f32 %v869_v26, 0.0  ;;  %v614_v47 = vpop.f32.mrf.mxu1 }
 0x119   : > { %v769_v46 = vpop.f32.mrf.mxu3  ;;  %v624_v55 = vadd.f32 %v614_v47, %v546_v54 }
 0x11a   : > { %885 = vst.msk [vmem:[%s1424_s7 + $0x28] sm:$0xff] %vm217_vm0, %v877_v50  ;;  %v780_v18 = vadd.f32 %v769_v46, %v702_v53 }
 0x11b   : > { %v849_v57 = vpop.f32.mrf.mxu0 }
 0x11c   : > { %v858_v51 = vadd.f32 %v847_v30, %v780_v18 }
 0x11e   : > { %v870_v44 = vadd.f32 %v1417_v3, %v858_v51  ;;  %v693_v56 = vpop.f32.mrf.mxu2 }
 0x11f   : > { %v703_v31 = vadd.f32 %v693_v56, %v624_v55 }
 0x120   : > { %v878_v15 = vmax.f32 %v870_v44, 0.0 }
 0x121   : > { %v771_v33 = vpop.f32.mrf.mxu3 }
 0x122   : > { %886 = vst.msk [vmem:[%s1424_s7 + $0x30] sm:$0xff] %vm217_vm0, %v878_v15  ;;  %v781_v52 = vadd.f32 %v771_v33, %v703_v31 }
 0x124   : > { %v859_v28 = vadd.f32 %v849_v57, %v781_v52 }
 0x126   : > { %v871_v58 = vadd.f32 %v1417_v3, %v859_v28 }
 0x128   : > { %v879_v59 = vmax.f32 %v871_v58, 0.0 }
 0x12a   : > { %887 = vst.msk [vmem:[%s1424_s7 + $0x38] sm:$0xff] %vm217_vm0, %v879_v59 }
 0x12b PF: > { %s13_s12 = sadd.s32 1, %s1182_s12  }
 0x12c   : > { %p10_p4 = scmp.ge.s32.totalorder %s13_s12, 4  }
 0x12e   :  { %12 = sbr.rel (!%p10_p4) target bundleno = 1 (0x1), region = 72 }

// kernel: encoder_layer_forward.9
= control target key start
LH: loop header
LB: loop body
LE: loop exit
PB: predicated region body
PF: predicated region fallthrough
CT: control target
= control target key end

     0   :  { %9 = vsyncpa [#allocation3], 0  ;;  %s1759_s0 = inlined_call_operand.vmem [shape: f32[2,10,10,32], index: 0, kind: input, shape index: {}]   ;;  %s1760_s1 = inlined_call_operand.vmem [shape: bf16[9,32,32], index: 1, kind: input, shape index: {}]   ;;  %s1761_s2 = inlined_call_operand.vmem [shape: f32[1,32], index: 2, kind: input, shape index: {}]   ;;  %s1762_s3 = inlined_call_operand.vmem [shape: f32[2,64,32], index: 3, kind: input, shape index: {}]   ;;  %s1763_s4 = inlined_call_operand.hbm [shape: f32[2,64,32], index: 4, kind: output, shape index: {}]  }
   0x1   :  { %11 = vsyncpa [#allocation3 + $0x1], 0  ;;  %s1392_s15 = smov 0   ;;  %s1394_s16 = smov 0  }
   0x2   :  { %s1396_s17 = smov 0   ;;  %s1398_s18 = smov 0  }
   0x3 LB: > { %s1413_s19 = sadd.s32 4294967295, %s1363_s18   ;;  %s1031_s20 = sadd.s32 4294967294, %s1363_s18   ;;  %s1363_s18 = sphi %s1398_s18, %s1769_s18   ;;  %s1359_s17 = sphi %s1396_s17, %s1768_s17   ;;  %s1355_s16 = sphi %s1394_s16, %s1767_s16   ;;  %s1351_s15 = sphi %s1392_s15, %s1766_s15  }
   0x4   : > { %s1417_s21 = sadd.s32 1, %s1363_s18   ;;  %s118_s22 = sadd.s32 1, %s1359_s17 }
   0x5   : > { %s115_s23 = ssub.s32 %s1363_s18, %s1417_s21  ;;  %p128_p0 = scmp.ne.s32.totalorder %s1359_s17, %s1355_s16 }
   0x6   : > { %p116_p1 = scmp.eq.s32.totalorder %s115_s23, 0  ;;  %p129_p2 = scmp.eq.s32.totalorder %s1413_s19, 1 }
   0x7   : > { %p134_p3 = scmp.ne.s32.totalorder %s1355_s16, %s1351_s15  ;;  %p135_p4 = scmp.eq.s32.totalorder %s1031_s20, 1 }
   0x8   : > { %s1428_s24 = scalar_select %p116_p1, %s1359_s17, %s118_s22  }
   0x9   : > { %p1430_p5 = por %p129_p2, %p128_p0  ;;  %p1434_p6 = por %p135_p4, %p134_p3 }
   0xa   : > { %p1034_p7 = scmp.ge.s32.totalorder %s1363_s18, 1  ;;  %p175_p8 = scmp.lt.s32.totalorder %s1363_s18, 3 }
   0xc   : > { %p176_p9 = pnand %p1034_p7, %p175_p8 }
   0xd   : > { %p206_p10 = scmp.lt.s32.totalorder (!%p176_p9), %s1413_s19, 1  ;;  %s203_s11 = sand.u32 (!%p176_p9), 1, %s1355_s16  }
   0xe   : > { %179 = sbr.rel (%p176_p9) target bundleno = 312 (0x138), region = 36  ;;  %s1251_s28 = sshll.u32 (!%p176_p9), %s1413_s19, 6 }
   0xf   : > { %s1321_s13 = scalar_lea.hbm (!%p176_p9), %s1763_s4, 128 }
  0x13   : > { %v1236_v0 = vld [vmem:[%s1760_s1 + $0x18] sm:$0xff]  ;;  %v1235_v1 = vld [vmem:[%s1760_s1 + $0x10] sm:$0xff]  ;;  %s1448_s5 = scalar_select %p206_p10, %s1413_s19, 1  ;;  %v1238_v2 = vld [vmem:[%s1760_s1 + $0x28] sm:$0xff]  ;;  %vm262_vm0 = vcmask 261120  }
  0x14   : > { %1252 = vmatpush.bf16.msra.mxu1 %v1236_v0  ;;  %1253 = vmatpush.bf16.msra.mxu2 %v1236_v0  ;;  %v1240_v3 = vld [vmem:[%s1760_s1 + $0x38] sm:$0xff]  ;;  %v1234_v4 = vld [vmem:[%s1760_s1 + $0x8] sm:$0xff]  ;;  %v1237_v6 = vld [vmem:[%s1760_s1 + $0x20] sm:$0xff]  ;;  %s942_s19 = scalar_lea.sflag [#allocation3], %s203_s11 }
  0x15   : > { %1254 = vmatpush.bf16.msra.mxu3 %v1236_v0  ;;  %281 = vmatpush.bf16.msra.mxu0 %v1236_v0  ;;  %s1258_s6 = smul.u32 160, %s1448_s5  ;;  %v1242_v5 = vld [vmem:[%s1760_s1 + $0x48] sm:$0xff]  ;;  %v1239_v10 = vld [vmem:[%s1760_s1 + $0x30] sm:$0xff]  ;;  %v1233_v19 = vld [vmem:[%s1760_s1] sm:$0xff] }
  0x16   : > { %v1241_v21 = vld [vmem:[%s1760_s1 + $0x40] sm:$0xff]  ;;  %v1246_v22 = vld [vmem:[%s1760_s1 + $0x68] sm:$0xff]  ;;  %v1248_v23 = vld [vmem:[%s1760_s1 + $0x78] sm:$0xff] }
  0x17   : > { %s1466_s23 = scalar_lea.vmem %s1759_s0, %s1258_s6  ;;  %v1244_v24 = vld [vmem:[%s1760_s1 + $0x58] sm:$0xff]  ;;  %v1250_v25 = vld [vmem:[%s1760_s1 + $0x88] sm:$0xff]  ;;  %v1245_v35 = vld [vmem:[%s1760_s1 + $0x60] sm:$0xff]  ;;  %s953_s6 = scalar_lea.hbm %s1763_s4, %s1251_s28 }
  0x18   : > { %1255 = vmatpush.bf16.msra.mxu1 %v1235_v1  ;;  %1256 = vmatpush.bf16.msra.mxu2 %v1235_v1  ;;  %v235_v7 = vld [vmem:[%s1466_s23 + $0x21] sm:$0xff]  ;;  %v1473_v8 = vld [vmem:[%s1466_s23 + $0x31] sm:$0xff]  ;;  %s956_s8 = sshll.u32 %s953_s6, 4  ;;  %s957_s8 = int_to_ptr.hbm [resolvable:$true] %s956_s8 }
  0x19   : > { %1257 = vmatpush.bf16.msra.mxu3 %v1235_v1  ;;  %282 = vmatpush.bf16.msra.mxu0 %v1235_v1  ;;  %v1476_v9 = vld [vmem:[%s1466_s23 + $0x41] sm:$0xff]  ;;  %v1482_v11 = vpack.c.bf16 %v1473_v8, %v235_v7  ;;  %v1485_v12 = vld [vmem:[%s1466_s23 + $0x51] sm:$0xff]  ;;  %s1315_s9 = sshra.s32 %s957_s8, 4  ;;  %s1316_s9 = int_to_ptr.hbm [resolvable:$true] %s1315_s9 }
  0x1a   : > { %v1488_v13 = vld [vmem:[%s1466_s23 + $0x61] sm:$0xff]  ;;  %v1491_v14 = vld [vmem:[%s1466_s23 + $0x71] sm:$0xff]  ;;  %v1495_v15 = vpack.c.bf16 %v1485_v12, %v1476_v9  ;;  %v523_v46 = vpack.c.bf16 %v1476_v9, %v1473_v8  ;;  %s1317_s10 = scalar_lea.hbm %s1316_s9, 64  ;;  %p1322_p0 = scmp.lt.s32.totalorder %s1316_s9, %s1763_s4 }
  0x1b   : > { %v1499_v16 = vpack.c.bf16 %v1491_v14, %v1488_v13  ;;  %v233_v17 = vld [vmem:[%s1466_s23 + $0x1] sm:$0xff]  ;;  %v234_v18 = vld [vmem:[%s1466_s23 + $0x11] sm:$0xff]  ;;  %1052 = vmatmul.msk.bf16.vlgmr.msra.gmra.mxu1 %vm262_vm0, %v1482_v11  ;;  %v524_v54 = vpack.c.bf16 %v1488_v13, %v1485_v12  ;;  %p1318_p11 = scmp.ne.s32.totalorder %s1316_s9, %s1317_s10  ;;  %p1323_p1 = scmp.lt.s32.totalorder %s1321_s13, %s1317_s10 }
  0x1c   : > { %404 = vmatpush.bf16.msrb.mxu2 %v1238_v2  ;;  %334 = vmatpush.bf16.msrb.mxu1 %v1234_v4  ;;  %v241_v20 = vpack.c.bf16 %v234_v18, %v233_v17  ;;  %v217_v26 = vld [vmem:[%s1466_s23] sm:$0xff]  ;;  %v218_v27 = vld [vmem:[%s1466_s23 + $0x10] sm:$0xff]  ;;  %v522_v34 = vpack.c.bf16 %v235_v7, %v234_v18 }
  0x1d   : > { %483 = vmatpush.bf16.msrb.mxu3 %v1240_v3  ;;  %561 = vmatpush.bf16.msrb.mxu0 %v1242_v5  ;;  %v357_v28 = vld [vmem:[%s1466_s23 + $0x2] sm:$0xff]  ;;  %v358_v29 = vld [vmem:[%s1466_s23 + $0x12] sm:$0xff]  ;;  %v225_v31 = vpack.c.bf16 %v218_v27, %v217_v26  ;;  %p1319_p12 = pnand %p1318_p11, %p1430_p5  ;;  %p1324_p2 = por %p1323_p1, %p1322_p0 }
  0x1e   : > { %1053 = vmatmul.msk.bf16.vlgmr.msra.gmra.mxu2 %vm262_vm0, %v1495_v15  ;;  %1054 = vmatmul.msk.bf16.vlgmr.msra.gmra.mxu3 %vm262_vm0, %v1499_v16  ;;  %v1084_v30 = vld [vmem:[%s1466_s23 + $0x20] sm:$0xff]  ;;  %v365_v32 = vpack.c.bf16 %v358_v29, %v357_v28  ;;  %v1247_v36 = vld [vmem:[%s1760_s1 + $0x70] sm:$0xff] }
  0x1f   : > { %1051 = vmatmul.msk.bf16.vlgmr.msra.gmra.mxu0 %vm262_vm0, %v241_v20  ;;  %v444_v33 = vpack.c.bf16 %v1084_v30, %v218_v27  ;;  %v1243_v37 = vld [vmem:[%s1760_s1 + $0x50] sm:$0xff]  ;;  %v1249_v38 = vld [vmem:[%s1760_s1 + $0x80] sm:$0xff]  ;;  %p1320_p13 = pneg %p1319_p12 }
  0x20   : > { %405 = vmatpush.bf16.msrb.mxu2 %v1237_v6  ;;  %335 = vmatpush.bf16.msrb.mxu1 %v1233_v19  ;;  %v220_v39 = vld [vmem:[%s1466_s23 + $0x30] sm:$0xff]  ;;  %v359_v40 = vld [vmem:[%s1466_s23 + $0x22] sm:$0xff] }
  0x21   : > { %484 = vmatpush.bf16.msrb.mxu3 %v1239_v10  ;;  %562 = vmatpush.bf16.msrb.mxu0 %v1241_v21  ;;  %v360_v41 = vld [vmem:[%s1466_s23 + $0x32] sm:$0xff]  ;;  %v1086_v42 = vld [vmem:[%s1466_s23 + $0x40] sm:$0xff]  ;;  %v226_v43 = vpack.c.bf16 %v220_v39, %v1084_v30  ;;  %v600_v0 = vpack.c.bf16 %v359_v40, %v358_v29  ;;  %p1325_p3 = pnand %p1324_p2, %p1320_p13 }
  0x22   : > { %v366_v44 = vpack.c.bf16 %v360_v41, %v359_v40  ;;  %v445_v45 = vpack.c.bf16 %v1086_v42, %v220_v39  ;;  %v222_v47 = vld [vmem:[%s1466_s23 + $0x50] sm:$0xff]  ;;  %v361_v48 = vld [vmem:[%s1466_s23 + $0x42] sm:$0xff] }
  0x23   : > { %v362_v49 = vld [vmem:[%s1466_s23 + $0x52] sm:$0xff]  ;;  %v1088_v50 = vld [vmem:[%s1466_s23 + $0x60] sm:$0xff]  ;;  %v227_v51 = vpack.c.bf16 %v222_v47, %v1086_v42  ;;  %v601_v1 = vpack.c.bf16 %v361_v48, %v360_v41 }
  0x24   : > { %718 = vmatpush.bf16.msra.mxu2 %v1246_v22  ;;  %639 = vmatpush.bf16.msra.mxu1 %v1244_v24  ;;  %v367_v52 = vpack.c.bf16 %v362_v49, %v361_v48  ;;  %v446_v53 = vpack.c.bf16 %v1088_v50, %v222_v47  ;;  %v224_v55 = vld [vmem:[%s1466_s23 + $0x70] sm:$0xff]  ;;  %v363_v56 = vld [vmem:[%s1466_s23 + $0x62] sm:$0xff] }
  0x25   : > { %796 = vmatpush.bf16.msra.mxu3 %v1248_v23  ;;  %874 = vmatpush.bf16.msra.mxu0 %v1250_v25  ;;  %v364_v57 = vld [vmem:[%s1466_s23 + $0x72] sm:$0xff]  ;;  %v1090_v58 = vld [vmem:[%s1466_s23 + $0x80] sm:$0xff]  ;;  %v228_v60 = vpack.c.bf16 %v224_v55, %v1088_v50  ;;  %v602_v2 = vpack.c.bf16 %v363_v56, %v362_v49 }
  0x26   : > { %v1114_v59 = vld [vmem:[%s1466_s23 + $0x81] sm:$0xff]  ;;  %v368_v61 = vpack.c.bf16 %v364_v57, %v363_v56  ;;  %v447_v62 = vpack.c.bf16 %v1090_v58, %v224_v55  ;;  %v1162_v4 = vld [vmem:[%s1466_s23 + $0x90] sm:$0xff] }
  0x27   : > { %v525_v63 = vpack.c.bf16 %v1114_v59, %v1491_v14  ;;  %v1138_v3 = vld [vmem:[%s1466_s23 + $0x82] sm:$0xff]  ;;  %v1186_v5 = vld [vmem:[%s1466_s23 + $0x91] sm:$0xff]  ;;  %v682_v9 = vpack.c.bf16 %v1162_v4, %v1090_v58 }
  0x28   : > { %719 = vmatpush.bf16.msra.mxu2 %v1245_v35  ;;  %640 = vmatpush.bf16.msra.mxu1 %v1243_v37  ;;  %v1210_v6 = vld [vmem:[%s1466_s23 + $0x92] sm:$0xff]  ;;  %v603_v7 = vpack.c.bf16 %v1138_v3, %v364_v57  ;;  %v760_v10 = vpack.c.bf16 %v1186_v5, %v1114_v59  ;;  %s1232_s23 = sshll.u32 %s1448_s5, 6  ;;  %s1035_s5 = sshll.u32 %s203_s11, 6 }
  0x29   : > { %797 = vmatpush.bf16.msra.mxu3 %v1247_v36  ;;  %875 = vmatpush.bf16.msra.mxu0 %v1249_v38  ;;  %s1658_s14 = scalar_lea.vmem %s1762_s3, %s1232_s23  ;;  %s1670_s27 = scalar_lea.vmem [#allocation2], %s1035_s5 }
  0x2a   : > { %s954_s7 = sshll.u32 %s1670_s27, 4  ;;  %s955_s7 = int_to_ptr.vmem [resolvable:$true] %s954_s7 }
  0x2b   : > { %1063 = vmatmul.msk.bf16.vlgmr.msrb.gmra.mxu1 %vm262_vm0, %v225_v31 }
  0x2e   : > { %1079 = vmatmul.msk.bf16.vlgmr.msrb.gmra.mxu2 %vm262_vm0, %v365_v32  ;;  %1103 = vmatmul.msk.bf16.vlgmr.msrb.gmra.mxu3 %vm262_vm0, %v444_v33 }
  0x2f   : > { %1127 = vmatmul.msk.bf16.vlgmr.msrb.gmra.mxu0 %vm262_vm0, %v522_v34 }
  0x3b   : > { %1064 = vmatmul.msk.bf16.gmra.mxu1 %vm262_vm0, %v226_v43 }
  0x3e   : > { %1080 = vmatmul.msk.bf16.gmra.mxu2 %vm262_vm0, %v366_v44  ;;  %1104 = vmatmul.msk.bf16.gmra.mxu3 %vm262_vm0, %v445_v45 }
  0x3f   : > { %1128 = vmatmul.msk.bf16.gmra.mxu0 %vm262_vm0, %v523_v46 }
  0x4b   : > { %1065 = vmatmul.msk.bf16.gmra.mxu1 %vm262_vm0, %v227_v51 }
  0x4e   : > { %1081 = vmatmul.msk.bf16.gmra.mxu2 %vm262_vm0, %v367_v52  ;;  %1105 = vmatmul.msk.bf16.gmra.mxu3 %vm262_vm0, %v446_v53 }
  0x4f   : > { %1129 = vmatmul.msk.bf16.gmra.mxu0 %vm262_vm0, %v524_v54 }
  0x5b   : > { %1066 = vmatmul.msk.bf16.gmra.mxu1 %vm262_vm0, %v228_v60 }
  0x5e   : > { %1082 = vmatmul.msk.bf16.gmra.mxu2 %vm262_vm0, %v368_v61  ;;  %1106 = vmatmul.msk.bf16.gmra.mxu3 %vm262_vm0, %v447_v62 }
  0x5f   : > { %1130 = vmatmul.msk.bf16.gmra.mxu0 %vm262_vm0, %v525_v63 }
  0x6b   : > { %1151 = vmatmul.msk.bf16.vlgmr.msra.gmra.mxu1 %vm262_vm0, %v600_v0 }
  0x6e   : > { %1175 = vmatmul.msk.bf16.vlgmr.msra.gmra.mxu2 %vm262_vm0, %v226_v43  ;;  %1199 = vmatmul.msk.bf16.vlgmr.msra.gmra.mxu3 %vm262_vm0, %v1482_v11  ;;  %v838_v11 = vpack.c.bf16 %v1210_v6, %v1138_v3  ;;  %v1663_v3 = vld [vmem:[%s1761_s2] ss:$0 sm:$0xff] }
  0x6f   : > { %1223 = vmatmul.msk.bf16.vlgmr.msra.gmra.mxu0 %vm262_vm0, %v366_v44 }
  0x7b   : > { %1152 = vmatmul.msk.bf16.gmra.mxu1 %vm262_vm0, %v601_v1 }
  0x7e   : > { %1176 = vmatmul.msk.bf16.gmra.mxu2 %vm262_vm0, %v227_v51  ;;  %1200 = vmatmul.msk.bf16.gmra.mxu3 %vm262_vm0, %v1495_v15 }
  0x7f   : > { %1224 = vmatmul.msk.bf16.gmra.mxu0 %vm262_vm0, %v367_v52 }
  0x8b   : > { %1153 = vmatmul.msk.bf16.gmra.mxu1 %vm262_vm0, %v602_v2 }
  0x8e   : > { %1177 = vmatmul.msk.bf16.gmra.mxu2 %vm262_vm0, %v228_v60  ;;  %1201 = vmatmul.msk.bf16.gmra.mxu3 %vm262_vm0, %v1499_v16 }
  0x8f   : > { %1225 = vmatmul.msk.bf16.gmra.mxu0 %vm262_vm0, %v368_v61 }
  0x98   : > { %v1598_v8 = vpop.f32.mrf.mxu1 }
  0x9b   : > { %1154 = vmatmul.msk.bf16.gmra.mxu1 %vm262_vm0, %v603_v7 }
  0x9c   : > { %v284_v12 = vpop.f32.mrf.mxu0 }
  0x9e   : > { %1178 = vmatmul.msk.bf16.gmra.mxu2 %vm262_vm0, %v682_v9  ;;  %1202 = vmatmul.msk.bf16.gmra.mxu3 %vm262_vm0, %v760_v10  ;;  %v917_v9 = vld [vmem:[%s1658_s14] sm:$0xff] }
  0x9f   : > { %1226 = vmatmul.msk.bf16.gmra.mxu0 %vm262_vm0, %v838_v11 }
  0xa0   : > { %v1608_v15 = vpop.f32.mrf.mxu1 }
  0xa1   : > { %v1604_v13 = vpop.f32.mrf.mxu2  ;;  %v1606_v14 = vpop.f32.mrf.mxu3 }
  0xa4   : > { %v286_v16 = vpop.f32.mrf.mxu0 }
  0xa8   : > { %v337_v19 = vpop.f32.mrf.mxu1 }
  0xa9   : > { %v1610_v17 = vpop.f32.mrf.mxu2  ;;  %v1612_v18 = vpop.f32.mrf.mxu3  ;;  %v338_v48 = vadd.f32 %v337_v19, %v284_v12 }
  0xac   : > { %v564_v20 = vpop.f32.mrf.mxu0 }
  0xb0   : > { %v339_v23 = vpop.f32.mrf.mxu1 }
  0xb1   : > { %v407_v21 = vpop.f32.mrf.mxu2  ;;  %v486_v22 = vpop.f32.mrf.mxu3  ;;  %v340_v55 = vadd.f32 %v339_v23, %v286_v16 }
  0xb2   : > { %v427_v50 = vadd.f32 %v407_v21, %v338_v48 }
  0xb4   : > { %v566_v24 = vpop.f32.mrf.mxu0  ;;  %v506_v53 = vadd.f32 %v486_v22, %v427_v50 }
  0xb6   : > { %v584_v58 = vadd.f32 %v564_v20, %v506_v53 }
  0xb8   : > { %v342_v27 = vpop.f32.mrf.mxu1 }
  0xb9   : > { %v409_v25 = vpop.f32.mrf.mxu2  ;;  %v488_v26 = vpop.f32.mrf.mxu3  ;;  %v343_v1 = vadd.f32 %v342_v27, %v1598_v8 }
  0xba   : > { %v428_v57 = vadd.f32 %v409_v25, %v340_v55 }
  0xbc   : > { %v1614_v28 = vpop.f32.mrf.mxu0  ;;  %v507_v62 = vadd.f32 %v488_v26, %v428_v57 }
  0xbe   : > { %v585_v7 = vadd.f32 %v566_v24, %v507_v62 }
  0xc0   : > { %v344_v31 = vpop.f32.mrf.mxu1 }
  0xc1   : > { %v412_v29 = vpop.f32.mrf.mxu2  ;;  %v491_v30 = vpop.f32.mrf.mxu3  ;;  %v345_v22 = vadd.f32 %v344_v31, %v1608_v15 }
  0xc2   : > { %v429_v5 = vadd.f32 %v412_v29, %v343_v1  ;;  %v918_v29 = vld [vmem:[%s1658_s14 + $0x8] sm:$0xff] }
  0xc4   : > { %v1616_v32 = vpop.f32.mrf.mxu0  ;;  %v508_v16 = vadd.f32 %v491_v30, %v429_v5 }
  0xc6   : > { %v586_v27 = vadd.f32 %v1614_v28, %v508_v16 }
  0xc8   : > { %v1620_v35 = vpop.f32.mrf.mxu1 }
  0xc9   : > { %v414_v33 = vpop.f32.mrf.mxu2  ;;  %v1618_v34 = vpop.f32.mrf.mxu3 }
  0xca   : > { %v430_v25 = vadd.f32 %v414_v33, %v345_v22 }
  0xcc   : > { %v1622_v36 = vpop.f32.mrf.mxu0  ;;  %v509_v15 = vadd.f32 %v1618_v34, %v430_v25 }
  0xd0   : > { %v1628_v39 = vpop.f32.mrf.mxu1 }
  0xd1   : > { %v1624_v37 = vpop.f32.mrf.mxu2  ;;  %v1626_v38 = vpop.f32.mrf.mxu3 }
  0xd4   : > { %v1630_v40 = vpop.f32.mrf.mxu0 }
  0xd8   : > { %v1636_v43 = vpop.f32.mrf.mxu1 }
  0xd9   : > { %v1632_v41 = vpop.f32.mrf.mxu2  ;;  %v1634_v42 = vpop.f32.mrf.mxu3  ;;  %v353_v16 = vadd.f32 %v1636_v43, %v1606_v14 }
  0xdc   : > { %v1638_v44 = vpop.f32.mrf.mxu0 }
  0xe0   : > { %v1644_v47 = vpop.f32.mrf.mxu1 }
  0xe1   : > { %v1640_v45 = vpop.f32.mrf.mxu2  ;;  %v1642_v46 = vpop.f32.mrf.mxu3 }
  0xe4   : > { %v1646_v49 = vpop.f32.mrf.mxu0 }
  0xe8   : > { %v642_v54 = vpop.f32.mrf.mxu1 }
  0xe9   : > { %v1648_v51 = vpop.f32.mrf.mxu2  ;;  %v1650_v52 = vpop.f32.mrf.mxu3  ;;  %v662_v59 = vadd.f32 %v642_v54, %v584_v58 }
  0xec   : > { %v877_v56 = vpop.f32.mrf.mxu0 }
  0xf0   : > { %v644_v0 = vpop.f32.mrf.mxu1 }
  0xf1   : > { %v721_v60 = vpop.f32.mrf.mxu2  ;;  %v799_v61 = vpop.f32.mrf.mxu3  ;;  %v663_v10 = vadd.f32 %v644_v0, %v585_v7  ;;  %v920_v7 = vld [vmem:[%s1658_s14 + $0x18] sm:$0xff] }
  0xf2   : > { %v741_v63 = vadd.f32 %v721_v60, %v662_v59  ;;  %v587_v59 = vadd.f32 %v1616_v32, %v509_v15  ;;  %v919_v60 = vld [vmem:[%s1658_s14 + $0x10] sm:$0xff] }
  0xf4   : > { %v819_v2 = vadd.f32 %v799_v61, %v741_v63  ;;  %v879_v4 = vpop.f32.mrf.mxu0 }
  0xf6   : > { %v897_v6 = vadd.f32 %v877_v56, %v819_v2  ;;  %v348_v56 = vadd.f32 %v1620_v35, %v1604_v13  ;;  %v350_v2 = vadd.f32 %v1628_v39, %v1610_v17 }
  0xf8   : > { %v909_v8 = vadd.f32 %v1663_v3, %v897_v6  ;;  %v647_v21 = vpop.f32.mrf.mxu1  ;;  %v431_v57 = vadd.f32 %v1624_v37, %v348_v56  ;;  %v432_v32 = vadd.f32 %v1632_v41, %v350_v2  ;;  %v433_v41 = vadd.f32 %v1640_v45, %v353_v16 }
  0xf9   : > { %v723_v11 = vpop.f32.mrf.mxu2  ;;  %v801_v12 = vpop.f32.mrf.mxu3  ;;  %v664_v48 = vadd.f32 %v647_v21, %v586_v27  ;;  %v921_v21 = vld [vmem:[%s1658_s14 + $0x20] sm:$0xff]  ;;  %v355_v45 = vadd.f32 %v1644_v47, %v1612_v18 }
  0xfa   : > { %v925_v19 = vadd.f32 %v917_v9, %v909_v8  ;;  %v742_v20 = vadd.f32 %v723_v11, %v663_v10  ;;  %v510_v0 = vadd.f32 %v1626_v38, %v431_v57  ;;  %v511_v11 = vadd.f32 %v1634_v42, %v432_v32 }
  0xfc   : > { %933 = vst.msk [vmem:[%s1670_s27] sm:$0xff] %vm262_vm0, %v925_v19  ;;  %v820_v23 = vadd.f32 %v801_v12, %v742_v20  ;;  %v882_v24 = vpop.f32.mrf.mxu0  ;;  %v588_v5 = vadd.f32 %v1622_v36, %v510_v0  ;;  %v589_v20 = vadd.f32 %v1630_v40, %v511_v11 }
  0xfe   : > { %v898_v26 = vadd.f32 %v879_v4, %v820_v23 }
 0x100   : > { %v910_v30 = vadd.f32 %v1663_v3, %v898_v26  ;;  %v649_v55 = vpop.f32.mrf.mxu1  ;;  %v512_v26 = vadd.f32 %v1642_v46, %v433_v41 }
 0x101   : > { %v726_v50 = vpop.f32.mrf.mxu2  ;;  %v804_v53 = vpop.f32.mrf.mxu3  ;;  %v665_v61 = vadd.f32 %v649_v55, %v587_v59 }
 0x102   : > { %v926_v31 = vadd.f32 %v918_v29, %v910_v30  ;;  %v743_v54 = vadd.f32 %v726_v50, %v664_v48  ;;  %v434_v29 = vadd.f32 %v1648_v51, %v355_v45  ;;  %v590_v48 = vadd.f32 %v1638_v44, %v512_v26  ;;  %v922_v50 = vld [vmem:[%s1658_s14 + $0x28] sm:$0xff] }
 0x104   : > { %934 = vst.msk [vmem:[%s1670_s27 + $0x8] sm:$0xff] %vm262_vm0, %v926_v31  ;;  %v821_v33 = vadd.f32 %v804_v53, %v743_v54  ;;  %v884_v28 = vpop.f32.mrf.mxu0  ;;  %v513_v54 = vadd.f32 %v1650_v52, %v434_v29 }
 0x106   : > { %v899_v58 = vadd.f32 %v882_v24, %v821_v33  ;;  %v591_v44 = vadd.f32 %v1646_v49, %v513_v54 }
 0x108   : > { %v911_v34 = vadd.f32 %v1663_v3, %v899_v58  ;;  %v652_v1 = vpop.f32.mrf.mxu1 }
 0x109   : > { %v728_v62 = vpop.f32.mrf.mxu2  ;;  %v806_v63 = vpop.f32.mrf.mxu3  ;;  %v666_v9 = vadd.f32 %v652_v1, %v588_v5 }
 0x10a   : > { %v927_v13 = vadd.f32 %v919_v60, %v911_v34  ;;  %v744_v35 = vadd.f32 %v728_v62, %v665_v61 }
 0x10c   : > { %935 = vst.msk [vmem:[%s1670_s27 + $0x10] sm:$0xff] %vm262_vm0, %v927_v13  ;;  %v822_v37 = vadd.f32 %v806_v63, %v744_v35  ;;  %v887_v6 = vpop.f32.mrf.mxu0  ;;  %v924_v63 = vld [vmem:[%s1658_s14 + $0x38] sm:$0xff] }
 0x10e   : > { %v900_v4 = vadd.f32 %v884_v28, %v822_v37  ;;  %v923_v28 = vld [vmem:[%s1658_s14 + $0x30] sm:$0xff] }
 0x110   : > { %v912_v38 = vadd.f32 %v1663_v3, %v900_v4  ;;  %v654_v12 = vpop.f32.mrf.mxu1 }
 0x111   : > { %v731_v8 = vpop.f32.mrf.mxu2  ;;  %v809_v10 = vpop.f32.mrf.mxu3  ;;  %v667_v42 = vadd.f32 %v654_v12, %v589_v20 }
 0x112   : > { %v928_v17 = vadd.f32 %v920_v7, %v912_v38  ;;  %v745_v39 = vadd.f32 %v731_v8, %v666_v9 }
 0x114   : > { %936 = vst.msk [vmem:[%s1670_s27 + $0x18] sm:$0xff] %vm262_vm0, %v928_v17  ;;  %v823_v36 = vadd.f32 %v809_v10, %v745_v39  ;;  %v889_v23 = vpop.f32.mrf.mxu0 }
 0x116   : > { %v901_v19 = vadd.f32 %v887_v6, %v823_v36 }
 0x118   : > { %v913_v22 = vadd.f32 %v1663_v3, %v901_v19  ;;  %v657_v27 = vpop.f32.mrf.mxu1 }
 0x119   : > { %v733_v24 = vpop.f32.mrf.mxu2  ;;  %v811_v25 = vpop.f32.mrf.mxu3  ;;  %v668_v46 = vadd.f32 %v657_v27, %v590_v48 }
 0x11a   : > { %v929_v14 = vadd.f32 %v921_v21, %v913_v22  ;;  %v746_v43 = vadd.f32 %v733_v24, %v667_v42 }
 0x11c   : > { %937 = vst.msk [vmem:[%s1670_s27 + $0x20] sm:$0xff] %vm262_vm0, %v929_v14  ;;  %v824_v40 = vadd.f32 %v811_v25, %v746_v43  ;;  %v892_v47 = vpop.f32.mrf.mxu0 }
 0x11e   : > { %v902_v30 = vadd.f32 %v889_v23, %v824_v40 }
 0x120   : > { %v914_v53 = vadd.f32 %v1663_v3, %v902_v30  ;;  %v659_v56 = vpop.f32.mrf.mxu1 }
 0x121   : > { %v736_v15 = vpop.f32.mrf.mxu2  ;;  %v814_v31 = vpop.f32.mrf.mxu3  ;;  %v669_v58 = vadd.f32 %v659_v56, %v591_v44 }
 0x122   : > { %v930_v55 = vadd.f32 %v922_v50, %v914_v53  ;;  %v747_v18 = vadd.f32 %v736_v15, %v668_v46 }
 0x124   : > { %938 = vst.msk [vmem:[%s1670_s27 + $0x28] sm:$0xff] %vm262_vm0, %v930_v55  ;;  %v825_v51 = vadd.f32 %v814_v31, %v747_v18  ;;  %v894_v49 = vpop.f32.mrf.mxu0 }
 0x126   : > { %v903_v33 = vadd.f32 %v892_v47, %v825_v51 }
 0x128   : > { %v915_v57 = vadd.f32 %v1663_v3, %v903_v33 }
 0x129   : > { %v738_v59 = vpop.f32.mrf.mxu2  ;;  %v816_v34 = vpop.f32.mrf.mxu3 }
 0x12a   : > { %v931_v52 = vadd.f32 %v923_v28, %v915_v57  ;;  %v748_v60 = vadd.f32 %v738_v59, %v669_v58 }
 0x12c   : > { %939 = vst.msk [vmem:[%s1670_s27 + $0x30] sm:$0xff] %vm262_vm0, %v931_v52  ;;  %v826_v61 = vadd.f32 %v816_v34, %v748_v60 }
 0x12e   : > { %v904_v62 = vadd.f32 %v894_v49, %v826_v61 }
 0x130   : > { %v916_v0 = vadd.f32 %v1663_v3, %v904_v62 }
 0x132   : > { %v932_v13 = vadd.f32 %v924_v63, %v916_v0 }
 0x134   : > { %940 = vst.msk [vmem:[%s1670_s27 + $0x38] sm:$0xff] %vm262_vm0, %v932_v13 }
 0x135   : > { %1328 = shalt.err (!%p1325_p3)
}
 0x136   : > { %s1365_s11 = smov 128   ;;  %s1366_s22 = smov 8  }
 0x137   : > { %1259 = dma.vmem_to_hbm [thread:$0]  (%p1430_p5), %s955_s7, 1024, %s957_s8, %s942_s19, %s1365_s11, %s1365_s11, %s1366_s22  }
 0x138 PF: > { %p1265_p4 = scmp.ge.s32.totalorder %s1363_s18, 2  ;;  %s971_s5 = sand.u32 1, %s1351_s15  }
 0x139   : > { %s972_s27 = scalar_lea.sflag [#allocation3], %s971_s5 }
 0x13a   : > { %p1262_p7 = pnand %p1265_p4, %p1434_p6 }
 0x13c   : > { %p1263_p8 = pneg %p1262_p7 }
 0x13e   : > { %1346 = dma.done.wait (%p1263_p8), %s972_s27, 1024  }
 0x13f   : > { %1348 = vsyncadd (%p1263_p8), %s972_s27, 4294966272  ;;  %p14_p9 = scmp.ge.s32.totalorder %s1417_s21, 4   ;;  %s1766_s15 = smov %s1355_s16 }
 0x140   : > { %s1767_s16 = smov %s1359_s17  ;;  %s1768_s17 = smov %s1428_s24 }
 0x141   : > { %s1769_s18 = smov %s1417_s21  ;;  %16 = sbr.rel (!%p14_p9) target bundleno = 3 (0x3), region = 84 }
 0x146   :  { %978 = vsyncpa [#allocation3], 1 }
 0x147   :  { %980 = vsyncpa [#allocation3 + $0x1], 1 }

</bundles_post_ra>
